<compile_context>
chip_gen: v6e
topology: v6e:2x2x1
jax: 0.10.0
libtpu: 0.0.40
codegen_flags: <defaults>
</compile_context>

<pallas_src>
import functools
import math

import jax
import jax.numpy as jnp
from jax import lax
from jax.experimental import pallas as pl
from jax.experimental.pallas import tpu as pltpu

N_CH = 512              # N
L_KER = 1024            # L
S_STR = 256             # S
TAPS = L_KER // S_STR   # 4 overlap-add taps of the final transposed conv
BN_EPS = 1e-5


def decoder_kernel(a_ref, bf_ref,                                   # SMEM (scalar prefetch)
                   x_ref, wd_ref, bd_ref, g_ref, bt_ref, wf_ref,    # inputs
                   out_ref,                                         # VMEM output
                   h_ref, dma_sem,                                  # scratch
                   *, depth, batch, t_in):
    l = pl.program_id(0)
    n_rows, C = h_ref.shape                       # n_rows = batch * t_in
    n_frames, S = out_ref.shape[1], out_ref.shape[2]

    # Layer 0: DMA the (already bf16) input straight from HBM into the carried
    # scratch -- no resident VMEM copy of x, no f32 round-trip, no store/load pair.
    @pl.when(l == 0)
    def _():
        cp = pltpu.make_async_copy(x_ref, h_ref, dma_sem)
        cp.start()
        cp.wait()

    h_bf = h_ref[...]                                               # [BT, C] bf16

    # --- ConvTranspose1d(C, C, k=3, s=1, p=1): ONE fused [C, 3C] bf16 matmul ---
    #   p = h @ [W(:,:,0) | W(:,:,1) | W(:,:,2)];  y[t] = p0[t+1] + p1[t] + p2[t-1] + b
    # TODO(synk): on v7x split into 3 [512,512] tap matmuls accumulated in place
    # (MRB) to cut the 6 KiB/row f32 intermediate; keep fused on v5e/v6e (MXU-bound).
    p = jnp.dot(h_bf, wd_ref[0], preferred_element_type=jnp.float32)  # [BT, 3C] f32
    p0, p1, p2 = p[:, :C], p[:, C:2 * C], p[:, 2 * C:]

    # Time shifts applied to the matmul OUTPUTS: sublane roll (XLU slot) + {0,1}
    # edge-mask multipliers for the per-batch boundary rows (computed once, reused).
    row_t = lax.broadcasted_iota(jnp.int32, (n_rows, 1), 0) % t_in
    m_hi = (row_t < t_in - 1).astype(jnp.float32)   # rows with a valid t+1 neighbour
    m_lo = (row_t > 0).astype(jnp.float32)          # rows with a valid t-1 neighbour
    z = (m_hi * pltpu.roll(p0, n_rows - 1, 0)       # p0[t+1]
         + p1
         + m_lo * pltpu.roll(p2, 1, 0)              # p2[t-1]
         + bd_ref[pl.ds(l, 1), :])

    # PReLU (single shared slope per layer, PyTorch default num_parameters=1).
    alpha = a_ref[l]
    z = jnp.where(z >= 0, z, alpha * z)

    # BatchNorm1d, training-mode stats over the (B, T) rows, single pass:
    # var = E[z^2] - E[z]^2 (biased); gamma/beta folded into one scale + shift,
    # the apply is fused with the bf16 cast at the carry store below.
    inv_n = 1.0 / n_rows
    m1 = jnp.sum(z, axis=0, keepdims=True) * inv_n                  # [1, C]
    m2 = jnp.sum(z * z, axis=0, keepdims=True) * inv_n
    inv_std = lax.rsqrt(m2 - m1 * m1 + BN_EPS)
    scale = g_ref[pl.ds(l, 1), :] * inv_std
    shift = bt_ref[pl.ds(l, 1), :] - m1 * scale
    h_new = z * scale + shift                                       # [BT, C] f32

    @pl.when(l < depth - 1)
    def _():
        # bf16 carry: the only consumer is next layer's bf16 matmul-operand cast.
        h_ref[...] = h_new.astype(jnp.bfloat16)

    # --- final ConvTranspose1d(C, 1, L=1024, S=256): ONE [C, TAPS*S] matmul + OLA ---
    @pl.when(l == depth - 1)
    def _():
        q = jnp.dot(h_new.astype(jnp.bfloat16), wf_ref[...],
                    preferred_element_type=jnp.float32)             # [BT, TAPS*S] f32
        # Overlap-add: bias written once, then TAPS in-place accumulating slice-adds
        # on the output block (no zero builds, no concatenate copies).
        out_ref[...] = jnp.full((batch, n_frames, S), bf_ref[0], jnp.float32)
        for m in range(TAPS):       # out[b, t + m, :] += q[b*t_in + t, m*S:(m+1)*S]
            qm = q[:, m * S:(m + 1) * S].reshape(batch, t_in, S)
            out_ref[:, m:m + t_in, :] += qm


def _vmem_limit_bytes():
    # Stay below the smallest physical VMEM (v7x: 64 MiB / TensorCore) with headroom;
    # query the real capacity when available.
    cap = 64 * 1024 * 1024
    try:
        cap = int(getattr(pltpu.get_tpu_info(), "vmem_capacity_bytes", cap))
    except Exception:
        pass
    return max(16 * 1024 * 1024, min(cap - 16 * 1024 * 1024, 96 * 1024 * 1024))


@functools.partial(jax.jit, static_argnames=("depth",))
def conv_tasnet_decoder(x_ncl, raw, *, depth):
    """x_ncl: PyTorch NCL input [B, 512, T].  Returns [B, 1, (T-1)*256 + 1024]."""
    B, C, T = x_ncl.shape
    assert C == N_CH and depth >= 1
    n_frames = T + TAPS - 1

    # Pack parameters into fused, MXU-friendly layouts (bf16 matmul operands;
    # accumulation and all elementwise math stay f32 inside the kernel).
    #   wd: [depth, Cin, Cout, 3] -> [depth, Cin, 3*Cout]   (tap-major columns)
    wd_cat = jnp.transpose(raw["wd"], (0, 1, 3, 2)).reshape(depth, N_CH, 3 * N_CH)
    wd_cat = wd_cat.astype(jnp.bfloat16)
    #   wf: [Cin, 1, L] -> [Cin, TAPS*S]   (column m*S + r == tap m, sample r)
    wf_cat = raw["wf"][:, 0, :].astype(jnp.bfloat16)
    x2d = jnp.transpose(x_ncl, (0, 2, 1)).reshape(B * T, N_CH).astype(jnp.bfloat16)

    flops = 2 * B * T * N_CH * (3 * N_CH * depth + TAPS * S_STR)
    bytes_accessed = (x2d.size * 2 + wd_cat.size * 2 + wf_cat.size * 2
                      + B * n_frames * S_STR * 4 + (3 * depth + 1) * N_CH * 4)

    # TODO(synk): for long sequences, tile the T axis (inner emit_pipeline over row
    # chunks + two-pass BatchNorm stats in a (1,512) scratch) and, on v7x, shard the
    # row chunks across the two TensorCores; this version keeps the whole [B*T, 512]
    # activation as one bf16 VMEM block.
    # TODO(synk): pipeline_mode=pl.Buffered(1) on the constant-index resident specs
    # (bd/g/bt/wf/out) would drop their second pipeline buffer (~1 MiB for wf).
    grid_spec = pltpu.PrefetchScalarGridSpec(
        num_scalar_prefetch=2,              # a (PReLU slopes), bf (final bias) -> SMEM
        grid=(depth,),                      # one grid step per decoder layer
        in_specs=[
            pl.BlockSpec(memory_space=pl.ANY),                            # x: HBM, DMA'd once
            pl.BlockSpec((1, N_CH, 3 * N_CH), lambda l, *_: (l, 0, 0)),   # wd  (streamed/layer)
            pl.BlockSpec((depth, N_CH), lambda l, *_: (0, 0)),            # conv bias
            pl.BlockSpec((depth, N_CH), lambda l, *_: (0, 0)),            # BN gamma
            pl.BlockSpec((depth, N_CH), lambda l, *_: (0, 0)),            # BN beta
            pl.BlockSpec((N_CH, TAPS * S_STR), lambda l, *_: (0, 0)),     # wf  (resident)
        ],
        out_specs=pl.BlockSpec((B, n_frames, S_STR), lambda l, *_: (0, 0, 0)),
        scratch_shapes=[pltpu.VMEM((B * T, N_CH), jnp.bfloat16),          # bf16 carried act.
                        pltpu.SemaphoreType.DMA],                         # x -> scratch DMA
    )

    out_frames = pl.pallas_call(
        functools.partial(decoder_kernel, depth=depth, batch=B, t_in=T),
        out_shape=jax.ShapeDtypeStruct((B, n_frames, S_STR), jnp.float32),
        grid_spec=grid_spec,
        compiler_params=pltpu.CompilerParams(
            dimension_semantics=("arbitrary",),          # sequential layer dependency
            vmem_limit_bytes=_vmem_limit_bytes()),
        cost_estimate=pl.CostEstimate(flops=flops, transcendentals=depth * N_CH,
                                      bytes_accessed=bytes_accessed),
    )(raw["a"], raw["bf"], x2d, wd_cat, raw["bd"], raw["g"], raw["bt"], wf_cat)

    # [B, T+TAPS-1, S] contiguous frames -> waveform [B, 1, (T-1)*S + L]  (NCL).
    return out_frames.reshape(B, 1, n_frames * S_STR)


def reference_forward(x_ncl, raw, *, depth):
    """Plain-JAX f32 reference (explicit pad/slice conv + per-step overlap-add)."""
    x = jnp.transpose(x_ncl, (0, 2, 1)).astype(jnp.float32)        # [B, T, C]
    B, T, C = x.shape
    hi = lax.Precision.HIGHEST
    for l in range(depth):
        xp = jnp.pad(x, ((0, 0), (1, 1), (0, 0)))
        z = sum(jnp.einsum("btc,co->bto", xp[:, 2 - k:2 - k + T, :],
                           raw["wd"][l, :, :, k], precision=hi) for k in range(3))
        z = z + raw["bd"][l][None, None, :]
        z = jnp.where(z >= 0, z, raw["a"][l] * z)
        mean = jnp.mean(z, axis=(0, 1), keepdims=True)
        var = jnp.mean((z - mean) ** 2, axis=(0, 1), keepdims=True)
        z = (z - mean) * lax.rsqrt(var + BN_EPS)
        x = z * raw["g"][l][None, None, :] + raw["bt"][l][None, None, :]
    wflat = raw["wf"][:, 0, :]                                     # [C, L]
    out_len = (T - 1) * S_STR + L_KER
    out = jnp.full((B, out_len), raw["bf"][0], jnp.float32)
    for t in range(T):
        seg = jnp.einsum("bc,cl->bl", x[:, t, :], wflat, precision=hi)
        out = out.at[:, t * S_STR: t * S_STR + L_KER].add(seg)
    return out[:, None, :]


if __name__ == "__main__":
    depth = 2
    B, T = 2, 16        # B*T multiple of 16, T multiple of 8 (bf16 tile friendly)

    key = jax.random.PRNGKey(0)
    ks = jax.random.split(key, 6)

    raw = {
        # ConvTranspose1d(512,512,3) weights, PyTorch layout [Cin, Cout, k], stacked over depth
        "wd": (jax.random.normal(ks[0], (depth, N_CH, N_CH, 3), jnp.float32)
               * (1.0 / math.sqrt(3 * N_CH))),
        "bd": 0.1 * jax.random.normal(ks[1], (depth, N_CH), jnp.float32),
        "a": jnp.full((depth,), 0.25, jnp.float32),                # PReLU default init
        "g": 1.0 + 0.1 * jax.random.normal(ks[2], (depth, N_CH), jnp.float32),
        "bt": 0.1 * jax.random.normal(ks[3], (depth, N_CH), jnp.float32),
        # final ConvTranspose1d(512, 1, L=1024) weight, PyTorch layout [Cin, 1, L]
        "wf": (jax.random.normal(ks[4], (N_CH, 1, L_KER), jnp.float32)
               * (1.0 / math.sqrt(N_CH))),
        "bf": jnp.array([0.01], jnp.float32),                      # final conv scalar bias
    }
    x = jax.random.normal(ks[5], (B, N_CH, T), jnp.float32)        # PyTorch NCL input

    out = jax.block_until_ready(conv_tasnet_decoder(x, raw, depth=depth))
    assert out.shape == (B, 1, (T - 1) * S_STR + L_KER), out.shape

    ref = jax.block_until_ready(reference_forward(x, raw, depth=depth))
    err = float(jnp.max(jnp.abs(out - ref)))
    scale = float(jnp.max(jnp.abs(ref)))
    # bf16 matmul operands (f32 accumulation) bound the error well inside this.
    assert err <= max(7.5e-2, 2e-2 * scale), f"max abs err {err} (ref scale {scale})"

    print("KERNEL_OK")
</pallas_src>

<mosaic_0001>
module attributes {stable_mosaic.version = 11 : i64} {
  func.func @decoder_kernel(%arg0: i32, %arg1: memref<2xf32, #tpu.memory_space<smem>>, %arg2: memref<1xf32, #tpu.memory_space<smem>>, %arg3: memref<32x512xbf16, #tpu.memory_space<any>>, %arg4: memref<1x512x1536xbf16, #tpu.memory_space<vmem>>, %arg5: memref<2x512xf32, #tpu.memory_space<vmem>>, %arg6: memref<2x512xf32, #tpu.memory_space<vmem>>, %arg7: memref<2x512xf32, #tpu.memory_space<vmem>>, %arg8: memref<512x1024xbf16, #tpu.memory_space<vmem>>, %arg9: memref<2x19x256xf32, #tpu.memory_space<vmem>>, %arg10: memref<32x512xbf16, #tpu.memory_space<vmem>>, %arg11: memref<!tpu.dma_semaphore, #tpu.memory_space<semaphore_mem>>) attributes {dimension_semantics = [#tpu.dimension_semantics<arbitrary>], iteration_bounds = array<i64: 2>, scalar_prefetch = 2 : i64, scratch_operands = 2 : i64, tpu.core_type = #tpu.core_type<tc>, window_params = [{}, {transform_indices = @transform_1, window_bounds = array<i64: 1, 512, 1536>}, {pipeline_mode = #tpu.pipeline_mode<synchronous>, transform_indices = @transform_2, window_bounds = array<i64: 2, 512>}, {pipeline_mode = #tpu.pipeline_mode<synchronous>, transform_indices = @transform_3, window_bounds = array<i64: 2, 512>}, {pipeline_mode = #tpu.pipeline_mode<synchronous>, transform_indices = @transform_4, window_bounds = array<i64: 2, 512>}, {pipeline_mode = #tpu.pipeline_mode<synchronous>, transform_indices = @transform_5, window_bounds = array<i64: 512, 1024>}, {pipeline_mode = #tpu.pipeline_mode<synchronous>, transform_indices = @transform_6, window_bounds = array<i64: 2, 19, 256>}]} {
    %c0_i32 = arith.constant 0 : i32
    %0 = arith.cmpi eq, %arg0, %c0_i32 : i32
    %1 = arith.extui %0 : i1 to i32
    %c0_i32_0 = arith.constant 0 : i32
    %2 = arith.cmpi ne, %1, %c0_i32_0 : i32
    scf.if %2 {
      tpu.enqueue_dma source(%arg3 : memref<32x512xbf16, #tpu.memory_space<any>>) target(%arg10 : memref<32x512xbf16, #tpu.memory_space<vmem>>) target_semaphore(%arg11 : memref<!tpu.dma_semaphore, #tpu.memory_space<semaphore_mem>>)
      tpu.wait_dma2 semaphore(%arg11 : memref<!tpu.dma_semaphore, #tpu.memory_space<semaphore_mem>>) src(%arg3 : memref<32x512xbf16, #tpu.memory_space<any>>) dst(%arg10 : memref<32x512xbf16, #tpu.memory_space<vmem>>)
    } else {
    }
    %c0 = arith.constant 0 : index
    %c0_1 = arith.constant 0 : index
    %3 = vector.load %arg10[%c0, %c0_1] : memref<32x512xbf16, #tpu.memory_space<vmem>>, vector<32x512xbf16>
    %c0_2 = arith.constant 0 : index
    %c0_3 = arith.constant 0 : index
    %c0_4 = arith.constant 0 : index
    %4 = vector.load %arg4[%c0_2, %c0_3, %c0_4] : memref<1x512x1536xbf16, #tpu.memory_space<vmem>>, vector<1x512x1536xbf16>
    %5 = vector.shape_cast %4 : vector<1x512x1536xbf16> to vector<512x1536xbf16>
    %cst = arith.constant dense<0.000000e+00> : vector<32x1536xf32>
    %6 = tpu.matmul %3, %5, %cst {dimension_numbers = #tpu.dot_dimension_numbers<[1], [0], [0], [1], [0, 0, 1, 1], [], []>} : vector<32x512xbf16>, vector<512x1536xbf16>, vector<32x1536xf32> -> vector<32x1536xf32>
    %7 = vector.extract_strided_slice %6 {offsets = [0, 0], sizes = [32, 512], strides = [1, 1]} : vector<32x1536xf32> to vector<32x512xf32>
    %8 = vector.extract_strided_slice %6 {offsets = [0, 512], sizes = [32, 512], strides = [1, 1]} : vector<32x1536xf32> to vector<32x512xf32>
    %9 = vector.extract_strided_slice %6 {offsets = [0, 1024], sizes = [32, 512], strides = [1, 1]} : vector<32x1536xf32> to vector<32x512xf32>
    %10 = tpu.iota {dimensions = array<i32: 0>} : vector<32x1xi32>
    %c16_i32 = arith.constant 16 : i32
    %c0_i32_5 = arith.constant 0 : i32
    %11 = arith.cmpi eq, %c16_i32, %c0_i32_5 : i32
    %c1_i32 = arith.constant 1 : i32
    %12 = arith.select %11, %c1_i32, %c16_i32 : i32
    %13 = vector.broadcast %12 : i32 to vector<32x1xi32>
    %14 = arith.remsi %10, %13 : vector<32x1xi32>
    %c0_i32_6 = arith.constant 0 : i32
    %15 = vector.broadcast %c0_i32_6 : i32 to vector<32x1xi32>
    %16 = arith.cmpi ne, %14, %15 : vector<32x1xi32>
    %c0_i32_7 = arith.constant 0 : i32
    %17 = vector.broadcast %c0_i32_7 : i32 to vector<32x1xi32>
    %18 = arith.cmpi slt, %14, %17 : vector<32x1xi32>
    %c0_i32_8 = arith.constant 0 : i32
    %19 = arith.cmpi slt, %12, %c0_i32_8 : i32
    %20 = vector.broadcast %19 : i1 to vector<32x1xi1>
    %21 = vector.broadcast %20 : vector<32x1xi1> to vector<32x1xi1>
    %22 = arith.xori %18, %21 : vector<32x1xi1>
    %23 = arith.andi %22, %16 : vector<32x1xi1>
    %24 = vector.broadcast %12 : i32 to vector<32x1xi32>
    %25 = arith.addi %14, %24 : vector<32x1xi32>
    %26 = arith.select %23, %25, %14 : vector<32x1xi1>, vector<32x1xi32>
    %c15_i32 = arith.constant 15 : i32
    %27 = vector.broadcast %c15_i32 : i32 to vector<32x1xi32>
    %28 = arith.cmpi slt, %26, %27 : vector<32x1xi32>
    %29 = arith.extui %28 : vector<32x1xi1> to vector<32x1xi32>
    %30 = arith.sitofp %29 : vector<32x1xi32> to vector<32x1xf32>
    %c0_i32_9 = arith.constant 0 : i32
    %31 = vector.broadcast %c0_i32_9 : i32 to vector<32x1xi32>
    %32 = arith.cmpi sgt, %26, %31 : vector<32x1xi32>
    %33 = arith.extui %32 : vector<32x1xi1> to vector<32x1xi32>
    %34 = arith.sitofp %33 : vector<32x1xi32> to vector<32x1xf32>
    %c31_i32 = arith.constant 31 : i32
    %35 = tpu.dynamic_rotate %7 by %c31_i32 dim 0 : vector<32x512xf32>, i32 -> vector<32x512xf32>
    %36 = vector.broadcast %30 : vector<32x1xf32> to vector<32x512xf32>
    %37 = arith.mulf %36, %35 : vector<32x512xf32>
    %38 = arith.addf %37, %8 : vector<32x512xf32>
    %c1_i32_10 = arith.constant 1 : i32
    %39 = tpu.dynamic_rotate %9 by %c1_i32_10 dim 0 : vector<32x512xf32>, i32 -> vector<32x512xf32>
    %40 = vector.broadcast %34 : vector<32x1xf32> to vector<32x512xf32>
    %41 = arith.mulf %40, %39 : vector<32x512xf32>
    %42 = arith.addf %38, %41 : vector<32x512xf32>
    %43 = arith.index_cast %arg0 : i32 to index
    %c0_11 = arith.constant 0 : index
    %44 = vector.load %arg5[%43, %c0_11] : memref<2x512xf32, #tpu.memory_space<vmem>>, vector<1x512xf32>
    %45 = vector.broadcast %44 : vector<1x512xf32> to vector<32x512xf32>
    %46 = arith.addf %42, %45 : vector<32x512xf32>
    %47 = arith.index_cast %arg0 : i32 to index
    %48 = memref.load %arg1[%47] : memref<2xf32, #tpu.memory_space<smem>>
    %cst_12 = arith.constant 0.000000e+00 : f32
    %49 = vector.broadcast %cst_12 : f32 to vector<32x512xf32>
    %50 = arith.cmpf oge, %46, %49 : vector<32x512xf32>
    %51 = vector.broadcast %48 : f32 to vector<32x512xf32>
    %52 = arith.mulf %51, %46 : vector<32x512xf32>
    %53 = arith.select %50, %46, %52 : vector<32x512xi1>, vector<32x512xf32>
    %cst_13 = arith.constant dense<0.000000e+00> : vector<512xf32>
    %54 = vector.multi_reduction <add>, %53, %cst_13 [0] : vector<32x512xf32> to vector<512xf32>
    %55 = vector.shape_cast %54 : vector<512xf32> to vector<1x512xf32>
    %cst_14 = arith.constant 3.125000e-02 : f32
    %56 = vector.broadcast %cst_14 : f32 to vector<1x512xf32>
    %57 = arith.mulf %55, %56 : vector<1x512xf32>
    %58 = arith.mulf %53, %53 : vector<32x512xf32>
    %cst_15 = arith.constant dense<0.000000e+00> : vector<512xf32>
    %59 = vector.multi_reduction <add>, %58, %cst_15 [0] : vector<32x512xf32> to vector<512xf32>
    %60 = vector.shape_cast %59 : vector<512xf32> to vector<1x512xf32>
    %cst_16 = arith.constant 3.125000e-02 : f32
    %61 = vector.broadcast %cst_16 : f32 to vector<1x512xf32>
    %62 = arith.mulf %60, %61 : vector<1x512xf32>
    %63 = arith.mulf %57, %57 : vector<1x512xf32>
    %64 = arith.subf %62, %63 : vector<1x512xf32>
    %cst_17 = arith.constant 9.99999974E-6 : f32
    %65 = vector.broadcast %cst_17 : f32 to vector<1x512xf32>
    %66 = arith.addf %64, %65 : vector<1x512xf32>
    %67 = math.rsqrt %66 : vector<1x512xf32>
    %68 = arith.index_cast %arg0 : i32 to index
    %c0_18 = arith.constant 0 : index
    %69 = vector.load %arg6[%68, %c0_18] : memref<2x512xf32, #tpu.memory_space<vmem>>, vector<1x512xf32>
    %70 = arith.mulf %69, %67 : vector<1x512xf32>
    %71 = arith.index_cast %arg0 : i32 to index
    %c0_19 = arith.constant 0 : index
    %72 = vector.load %arg7[%71, %c0_19] : memref<2x512xf32, #tpu.memory_space<vmem>>, vector<1x512xf32>
    %73 = arith.mulf %57, %70 : vector<1x512xf32>
    %74 = arith.subf %72, %73 : vector<1x512xf32>
    %75 = vector.broadcast %70 : vector<1x512xf32> to vector<32x512xf32>
    %76 = arith.mulf %53, %75 : vector<32x512xf32>
    %77 = vector.broadcast %74 : vector<1x512xf32> to vector<32x512xf32>
    %78 = arith.addf %76, %77 : vector<32x512xf32>
    %c1_i32_20 = arith.constant 1 : i32
    %79 = arith.cmpi slt, %arg0, %c1_i32_20 : i32
    %80 = arith.extui %79 : i1 to i32
    %c0_i32_21 = arith.constant 0 : i32
    %81 = arith.cmpi ne, %80, %c0_i32_21 : i32
    scf.if %81 {
      %85 = arith.truncf %78 : vector<32x512xf32> to vector<32x512xbf16>
      %c0_24 = arith.constant 0 : index
      %c0_25 = arith.constant 0 : index
      %86 = vector.load %arg10[%c0_24, %c0_25] : memref<32x512xbf16, #tpu.memory_space<vmem>>, vector<32x512xbf16>
      tpu.vector_store %arg10[%c0_24, %c0_25], %85 {strides = array<i32>} : memref<32x512xbf16, #tpu.memory_space<vmem>>, vector<32x512xbf16>,
    } else {
    }
    %c1_i32_22 = arith.constant 1 : i32
    %82 = arith.cmpi eq, %arg0, %c1_i32_22 : i32
    %83 = arith.extui %82 : i1 to i32
    %c0_i32_23 = arith.constant 0 : i32
    %84 = arith.cmpi ne, %83, %c0_i32_23 : i32
    scf.if %84 {
      %85 = arith.truncf %78 : vector<32x512xf32> to vector<32x512xbf16>
      %c0_24 = arith.constant 0 : index
      %c0_25 = arith.constant 0 : index
      %86 = vector.load %arg8[%c0_24, %c0_25] : memref<512x1024xbf16, #tpu.memory_space<vmem>>, vector<512x1024xbf16>
      %cst_26 = arith.constant dense<0.000000e+00> : vector<32x1024xf32>
      %87 = tpu.matmul %85, %86, %cst_26 {dimension_numbers = #tpu.dot_dimension_numbers<[1], [0], [0], [1], [0, 0, 1, 1], [], []>} : vector<32x512xbf16>, vector<512x1024xbf16>, vector<32x1024xf32> -> vector<32x1024xf32>
      %c0_27 = arith.constant 0 : index
      %88 = memref.load %arg2[%c0_27] : memref<1xf32, #tpu.memory_space<smem>>
      %89 = vector.broadcast %88 : f32 to vector<2x19x256xf32>
      %c0_28 = arith.constant 0 : index
      %c0_29 = arith.constant 0 : index
      %c0_30 = arith.constant 0 : index
      %90 = vector.load %arg9[%c0_28, %c0_29, %c0_30] : memref<2x19x256xf32, #tpu.memory_space<vmem>>, vector<2x19x256xf32>
      tpu.vector_store %arg9[%c0_28, %c0_29, %c0_30], %89 {strides = array<i32>} : memref<2x19x256xf32, #tpu.memory_space<vmem>>, vector<2x19x256xf32>,
      %91 = vector.extract_strided_slice %87 {offsets = [0, 0], sizes = [32, 256], strides = [1, 1]} : vector<32x1024xf32> to vector<32x256xf32>
      %92 = vector.shape_cast %91 : vector<32x256xf32> to vector<2x16x256xf32>
      %c0_31 = arith.constant 0 : index
      %c0_32 = arith.constant 0 : index
      %c0_33 = arith.constant 0 : index
      %93 = vector.load %arg9[%c0_31, %c0_32, %c0_33] : memref<2x19x256xf32, #tpu.memory_space<vmem>>, vector<2x16x256xf32>
      %94 = arith.addf %93, %92 : vector<2x16x256xf32>
      %c0_34 = arith.constant 0 : index
      %c0_35 = arith.constant 0 : index
      %c0_36 = arith.constant 0 : index
      %95 = vector.load %arg9[%c0_34, %c0_35, %c0_36] : memref<2x19x256xf32, #tpu.memory_space<vmem>>, vector<2x16x256xf32>
      tpu.vector_store %arg9[%c0_34, %c0_35, %c0_36], %94 {strides = array<i32>} : memref<2x19x256xf32, #tpu.memory_space<vmem>>, vector<2x16x256xf32>,
      %96 = vector.extract_strided_slice %87 {offsets = [0, 256], sizes = [32, 256], strides = [1, 1]} : vector<32x1024xf32> to vector<32x256xf32>
      %97 = vector.shape_cast %96 : vector<32x256xf32> to vector<2x16x256xf32>
      %c0_37 = arith.constant 0 : index
      %c1 = arith.constant 1 : index
      %c0_38 = arith.constant 0 : index
      %98 = vector.load %arg9[%c0_37, %c1, %c0_38] : memref<2x19x256xf32, #tpu.memory_space<vmem>>, vector<2x16x256xf32>
      %99 = arith.addf %98, %97 : vector<2x16x256xf32>
      %c0_39 = arith.constant 0 : index
      %c1_40 = arith.constant 1 : index
      %c0_41 = arith.constant 0 : index
      %100 = vector.load %arg9[%c0_39, %c1_40, %c0_41] : memref<2x19x256xf32, #tpu.memory_space<vmem>>, vector<2x16x256xf32>
      tpu.vector_store %arg9[%c0_39, %c1_40, %c0_41], %99 {strides = array<i32>} : memref<2x19x256xf32, #tpu.memory_space<vmem>>, vector<2x16x256xf32>,
      %101 = vector.extract_strided_slice %87 {offsets = [0, 512], sizes = [32, 256], strides = [1, 1]} : vector<32x1024xf32> to vector<32x256xf32>
      %102 = vector.shape_cast %101 : vector<32x256xf32> to vector<2x16x256xf32>
      %c0_42 = arith.constant 0 : index
      %c2 = arith.constant 2 : index
      %c0_43 = arith.constant 0 : index
      %103 = vector.load %arg9[%c0_42, %c2, %c0_43] : memref<2x19x256xf32, #tpu.memory_space<vmem>>, vector<2x16x256xf32>
      %104 = arith.addf %103, %102 : vector<2x16x256xf32>
      %c0_44 = arith.constant 0 : index
      %c2_45 = arith.constant 2 : index
      %c0_46 = arith.constant 0 : index
      %105 = vector.load %arg9[%c0_44, %c2_45, %c0_46] : memref<2x19x256xf32, #tpu.memory_space<vmem>>, vector<2x16x256xf32>
      tpu.vector_store %arg9[%c0_44, %c2_45, %c0_46], %104 {strides = array<i32>} : memref<2x19x256xf32, #tpu.memory_space<vmem>>, vector<2x16x256xf32>,
      %106 = vector.extract_strided_slice %87 {offsets = [0, 768], sizes = [32, 256], strides = [1, 1]} : vector<32x1024xf32> to vector<32x256xf32>
      %107 = vector.shape_cast %106 : vector<32x256xf32> to vector<2x16x256xf32>
      %c0_47 = arith.constant 0 : index
      %c3 = arith.constant 3 : index
      %c0_48 = arith.constant 0 : index
      %108 = vector.load %arg9[%c0_47, %c3, %c0_48] : memref<2x19x256xf32, #tpu.memory_space<vmem>>, vector<2x16x256xf32>
      %109 = arith.addf %108, %107 : vector<2x16x256xf32>
      %c0_49 = arith.constant 0 : index
      %c3_50 = arith.constant 3 : index
      %c0_51 = arith.constant 0 : index
      %110 = vector.load %arg9[%c0_49, %c3_50, %c0_51] : memref<2x19x256xf32, #tpu.memory_space<vmem>>, vector<2x16x256xf32>
      tpu.vector_store %arg9[%c0_49, %c3_50, %c0_51], %109 {strides = array<i32>} : memref<2x19x256xf32, #tpu.memory_space<vmem>>, vector<2x16x256xf32>,
    } else {
    }
    return
  }
  func.func @transform_1(%arg0: i32, %arg1: memref<2xf32, #tpu.memory_space<smem>>, %arg2: memref<1xf32, #tpu.memory_space<smem>>) -> (i32, i32, i32) {
    %c0_i32 = arith.constant 0 : i32
    %c0_i32_0 = arith.constant 0 : i32
    %c0_i32_1 = arith.constant 0 : i32
    return %arg0, %c0_i32, %c0_i32_0 : i32, i32, i32
  }
  func.func @transform_2(%arg0: i32, %arg1: memref<2xf32, #tpu.memory_space<smem>>, %arg2: memref<1xf32, #tpu.memory_space<smem>>) -> (i32, i32) {
    %c0_i32 = arith.constant 0 : i32
    %c0_i32_0 = arith.constant 0 : i32
    %c0_i32_1 = arith.constant 0 : i32
    return %c0_i32, %c0_i32_0 : i32, i32
  }
  func.func @transform_3(%arg0: i32, %arg1: memref<2xf32, #tpu.memory_space<smem>>, %arg2: memref<1xf32, #tpu.memory_space<smem>>) -> (i32, i32) {
    %c0_i32 = arith.constant 0 : i32
    %c0_i32_0 = arith.constant 0 : i32
    %c0_i32_1 = arith.constant 0 : i32
    return %c0_i32, %c0_i32_0 : i32, i32
  }
  func.func @transform_4(%arg0: i32, %arg1: memref<2xf32, #tpu.memory_space<smem>>, %arg2: memref<1xf32, #tpu.memory_space<smem>>) -> (i32, i32) {
    %c0_i32 = arith.constant 0 : i32
    %c0_i32_0 = arith.constant 0 : i32
    %c0_i32_1 = arith.constant 0 : i32
    return %c0_i32, %c0_i32_0 : i32, i32
  }
  func.func @transform_5(%arg0: i32, %arg1: memref<2xf32, #tpu.memory_space<smem>>, %arg2: memref<1xf32, #tpu.memory_space<smem>>) -> (i32, i32) {
    %c0_i32 = arith.constant 0 : i32
    %c0_i32_0 = arith.constant 0 : i32
    %c0_i32_1 = arith.constant 0 : i32
    return %c0_i32, %c0_i32_0 : i32, i32
  }
  func.func @transform_6(%arg0: i32, %arg1: memref<2xf32, #tpu.memory_space<smem>>, %arg2: memref<1xf32, #tpu.memory_space<smem>>) -> (i32, i32, i32) {
    %c0_i32 = arith.constant 0 : i32
    %c0_i32_0 = arith.constant 0 : i32
    %c0_i32_1 = arith.constant 0 : i32
    %c0_i32_2 = arith.constant 0 : i32
    return %c0_i32, %c0_i32_0, %c0_i32_1 : i32, i32, i32
  }
}

</mosaic_0001>

<bundles_post_ra>
// kernel: conv_tasnet_decoder.1
= control target key start
LH: loop header
LB: loop body
LE: loop exit
PB: predicated region body
PF: predicated region fallthrough
CT: control target
= control target key end

     0   :  { %s9569_s0 = inlined_call_operand.vmem [shape: f32[2], index: 0, kind: input, shape index: {}]   ;;  %s9570_s1 = inlined_call_operand.<no memory space> [shape: f32[1], index: 1, kind: input, shape index: {}]   ;;  %s9571_s2 = inlined_call_operand.vmem [shape: bf16[32,512], index: 2, kind: input, shape index: {}]   ;;  %s9572_s3 = inlined_call_operand.vmem [shape: bf16[2,512,1536], index: 3, kind: input, shape index: {}]   ;;  %s9573_s4 = inlined_call_operand.vmem [shape: f32[2,512], index: 4, kind: input, shape index: {}]   ;;  %s9574_s5 = inlined_call_operand.vmem [shape: f32[2,512], index: 5, kind: input, shape index: {}]   ;;  %s9575_s6 = inlined_call_operand.vmem [shape: f32[2,512], index: 6, kind: input, shape index: {}]   ;;  %s9576_s7 = inlined_call_operand.vmem [shape: bf16[512,1024], index: 7, kind: input, shape index: {}]   ;;  %s9577_s8 = inlined_call_operand.vmem [shape: f32[2,19,256], index: 8, kind: output, shape index: {}]  }
   0x1   :  { %s13_s29 = sshll.u32 %s9569_s0, 4  ;;  %17 = sst [smem:[#allocation6]] %s9570_s1  ;;  %s14_s29 = int_to_ptr.vmem [resolvable:$true] %s13_s29 }
   0x2   :  { %s7451_s10 = scalar_lea.vmem %s14_s29, 16  ;;  %p7456_p1 = scmp.lt.s32.totalorder %s14_s29, %s14_s29 }
   0x3   :  { %p7452_p0 = scmp.ne.s32.totalorder %s14_s29, %s7451_s10  ;;  %p7457_p2 = scmp.lt.s32.totalorder %s7451_s10, %s7451_s10 }
   0x5   :  { %p7458_p3 = por %p7457_p2, %p7456_p1 }
   0x7   :  { %p7459_p4 = pnand %p7458_p3, %p7452_p0 }
   0x9   :  { %7462 = shalt.err (!%p7459_p4)  }
   0xa   :  { %s7475_s11 = smov [#allocation5]  }
   0xb   :  { %16 = dma.vmem_to_smem %s14_s29, 16, %s7475_s11, [#allocation4] }
   0xc   :  { %7467 = dma.done.wait [#allocation4], 16 }
   0xd   :  { %7468 = vsyncadd [#allocation4], 4294967280 }
   0xe   :  { %19 = sfence }
   0xf   :  { %s7529_s12 = smov 0  }
  0x10 LB: > { %s7535_s0 = sadd.s32 4294967295, %s7473_s12   ;;  %p6161_p5 = scmp.ge.s32.totalorder %s7473_s12, 1  ;;  %s7473_s12 = sphi %s7529_s12, %s25_s12  }
  0x11   : > { %p192_p6 = scmp.lt.s32.totalorder %s7473_s12, 3 }
  0x13   : > { %p193_p7 = pnand %p6161_p5, %p192_p6 }
  0x15   : > { %196 = sbr.rel (%p193_p7) target bundleno = 1210 (0x4ba), region = 40 }
  0x1a   : > { %p215_p8 = scmp.lt.s32.totalorder %s7535_s0, 1  ;;  %p6163_p9 = scmp.ne.s32.totalorder %s7535_s0, 0 }
  0x1c   : > { %s216_s1 = scalar_select %p215_p8, %s7535_s0, 1 }
  0x1d   : > { %223 = sbr.rel (%p6163_p9) target bundleno = 42 (0x2a), region = 44 }
  0x1e   : > { %s6840_s13 = smul.u32 3072, %s216_s1 }
  0x20   : > { %s7544_s16 = scalar_lea.vmem %s9572_s3, %s6840_s13 }
  0x22   : > { %v257_v0 = vld [vmem:[%s9571_s2] sm:$0xff]  ;;  %v259_v1 = vld [vmem:[%s9571_s2 + $0x8] sm:$0xff]  ;;  %v261_v2 = vld [vmem:[%s9571_s2 + $0x10] sm:$0xff] }
  0x23   : > { %258 = vst [vmem:[#allocation2 + $0x30] sm:$0xff] %v257_v0  ;;  %260 = vst [vmem:[#allocation2] sm:$0xff] %v259_v1  ;;  %v263_v3 = vld [vmem:[%s9571_s2 + $0x18] sm:$0xff]  ;;  %v265_v4 = vld [vmem:[%s9571_s2 + $0x20] sm:$0xff] }
  0x24   : > { %262 = vst [vmem:[#allocation2 + $0x18] sm:$0xff] %v261_v2  ;;  %v267_v5 = vld [vmem:[%s9571_s2 + $0x28] sm:$0xff]  ;;  %264 = vst [vmem:[#allocation2 + $0x10] sm:$0xff] %v263_v3  ;;  %v269_v6 = vld [vmem:[%s9571_s2 + $0x30] sm:$0xff] }
  0x25   : > { %266 = vst [vmem:[#allocation2 + $0x8] sm:$0xff] %v265_v4  ;;  %268 = vst [vmem:[#allocation2 + $0x20] sm:$0xff] %v267_v5  ;;  %v271_v7 = vld [vmem:[%s9571_s2 + $0x38] sm:$0xff] }
  0x26   : > { %270 = vst [vmem:[#allocation2 + $0x28] sm:$0xff] %v269_v6  ;;  %272 = vst [vmem:[#allocation2 + $0x38] sm:$0xff] %v271_v7 }
  0x27   : > { %280 = vsyncadd [#allocation3], 1024 }
  0x28   : > { %7469 = dma.done.wait [#allocation3], 1024 }
  0x29   : > { %7470 = vsyncadd [#allocation3], 4294966272 }
  0x2a PF: > { %v6852_v8 = vld [vmem:[%s7544_s16 + $0x2a4] ss:$48 sps:$4 sm:$0xff]   ;;  %v6856_v10 = vld [vmem:[%s7544_s16 + $0x2a0] ss:$48 sps:$4 sm:$0xff]   ;;  %s3480_s11 = sshra.s32 %s7535_s0, 1  ;;  %s3483_s1 = sand.u32 1, %s7535_s0 }
  0x2b   : > { %v6854_v9 = vld [vmem:[%s7544_s16 + $0x8a4] ss:$48 sps:$4 sm:$0xff]   ;;  %2637 = vmatprep.subr.bf16.mxu0 %v6852_v8  ;;  %v6857_v11 = vld [vmem:[%s7544_s16 + $0x8a0] ss:$48 sps:$4 sm:$0xff]   ;;  %s6831_s13 = sshll.u32 %s3480_s11, 3  ;;  %s8202_s18 = sld [smem:[#allocation5 + %s7535_s0]] }
  0x2c   : > { %2690 = vmatprep.subr.bf16.mxu1 %v6854_v9  ;;  %v6858_v12 = vld [vmem:[%s7544_s16 + $0x244] ss:$48 sps:$4 sm:$0xff]   ;;  %2638 = vmatpush1.bf16.msra.mxu0 %v6856_v10  ;;  %v6862_v14 = vld [vmem:[%s7544_s16 + $0x240] ss:$48 sps:$4 sm:$0xff]   ;;  %s8172_s14 = sadd.s32 %s6831_s13, %s3483_s1  ;;  %p6562_p10 = scmp.ge.s32.totalorder %s7535_s0, 1 }
  0x2d   : > { %2691 = vmatpush1.bf16.msra.mxu1 %v6857_v11  ;;  %v6860_v13 = vld [vmem:[%s7544_s16 + $0x844] ss:$48 sps:$4 sm:$0xff]   ;;  %2639 = vmatprep.subr.bf16.mxu0 %v6858_v12  ;;  %v6863_v15 = vld [vmem:[%s7544_s16 + $0x840] ss:$48 sps:$4 sm:$0xff]   ;;  %v6956_v12 = vld [vmem:[%s7544_s16 + $0x2ac] ss:$48 sps:$4 sm:$0xff]   ;;  %s3487_s17 = scalar_lea.vmem %s9573_s4, %s8172_s14  ;;  %s3688_s21 = scalar_lea.vmem %s9574_s5, %s8172_s14 }
  0x2e   : > { %2692 = vmatprep.subr.bf16.mxu1 %v6860_v13  ;;  %v6864_v16 = vld [vmem:[%s7544_s16 + $0x1e4] ss:$48 sps:$4 sm:$0xff]   ;;  %v6868_v18 = vld [vmem:[%s7544_s16 + $0x1e0] ss:$48 sps:$4 sm:$0xff]   ;;  %v6959_v13 = vld [vmem:[%s7544_s16 + $0x8ac] ss:$48 sps:$4 sm:$0xff]   ;;  %s3720_s24 = scalar_lea.vmem %s9575_s6, %s8172_s14 }
  0x2f   : > { %v6866_v17 = vld [vmem:[%s7544_s16 + $0x7e4] ss:$48 sps:$4 sm:$0xff]   ;;  %v6869_v19 = vld [vmem:[%s7544_s16 + $0x7e0] ss:$48 sps:$4 sm:$0xff]  }
  0x30   : > { %2640 = vmatpush1.bf16.msra.mxu0 %v6862_v14  ;;  %v6870_v20 = vld [vmem:[%s7544_s16 + $0x184] ss:$48 sps:$4 sm:$0xff]   ;;  %v6874_v22 = vld [vmem:[%s7544_s16 + $0x180] ss:$48 sps:$4 sm:$0xff]   ;;  %v289_v14 = vld [vmem:[#allocation2 + $0x8] sm:$0xff] }
  0x31   : > { %2693 = vmatpush1.bf16.msra.mxu1 %v6863_v15  ;;  %2641 = vmatprep.subr.bf16.mxu0 %v6864_v16  ;;  %v6872_v21 = vld [vmem:[%s7544_s16 + $0x784] ss:$48 sps:$4 sm:$0xff]   ;;  %v6875_v23 = vld [vmem:[%s7544_s16 + $0x780] ss:$48 sps:$4 sm:$0xff]   ;;  %v291_v15 = vld [vmem:[#allocation2 + $0x28] sm:$0xff] }
  0x32   : > { %2694 = vmatprep.subr.bf16.mxu1 %v6866_v17  ;;  %v6876_v24 = vld [vmem:[%s7544_s16 + $0x124] ss:$48 sps:$4 sm:$0xff]   ;;  %v6880_v26 = vld [vmem:[%s7544_s16 + $0x120] ss:$48 sps:$4 sm:$0xff]   ;;  %v6954_v16 = vld [vmem:[%s7544_s16 + $0x2a8] ss:$48 sps:$4 sm:$0xff]  }
  0x33   : > { %v6878_v25 = vld [vmem:[%s7544_s16 + $0x724] ss:$48 sps:$4 sm:$0xff]   ;;  %v6881_v27 = vld [vmem:[%s7544_s16 + $0x720] ss:$48 sps:$4 sm:$0xff]   ;;  %v6957_v17 = vld [vmem:[%s7544_s16 + $0x8a8] ss:$48 sps:$4 sm:$0xff]  }
  0x34   : > { %2642 = vmatpush1.bf16.msra.mxu0 %v6868_v18  ;;  %v6882_v28 = vld [vmem:[%s7544_s16 + $0xc4] ss:$48 sps:$4 sm:$0xff]   ;;  %v6886_v30 = vld [vmem:[%s7544_s16 + $0xc0] ss:$48 sps:$4 sm:$0xff]   ;;  %v6962_v18 = vld [vmem:[%s7544_s16 + $0x24c] ss:$48 sps:$4 sm:$0xff]  }
  0x35   : > { %2695 = vmatpush1.bf16.msra.mxu1 %v6869_v19  ;;  %2643 = vmatprep.subr.bf16.mxu0 %v6870_v20  ;;  %v6884_v29 = vld [vmem:[%s7544_s16 + $0x6c4] ss:$48 sps:$4 sm:$0xff]   ;;  %v6887_v31 = vld [vmem:[%s7544_s16 + $0x6c0] ss:$48 sps:$4 sm:$0xff]   ;;  %v6965_v19 = vld [vmem:[%s7544_s16 + $0x84c] ss:$48 sps:$4 sm:$0xff]   ;;  %v7651_v20 = vcombine.high %v289_v14, %v291_v15 }
  0x36   : > { %2696 = vmatprep.subr.bf16.mxu1 %v6872_v21  ;;  %v6888_v32 = vld [vmem:[%s7544_s16 + $0x64] ss:$48 sps:$4 sm:$0xff]   ;;  %v6892_v34 = vld [vmem:[%s7544_s16 + $0x60] ss:$48 sps:$4 sm:$0xff]  }
  0x37   : > { %v6890_v33 = vld [vmem:[%s7544_s16 + $0x664] ss:$48 sps:$4 sm:$0xff]   ;;  %v6893_v35 = vld [vmem:[%s7544_s16 + $0x660] ss:$48 sps:$4 sm:$0xff]  }
  0x38   : > { %2644 = vmatpush1.bf16.msra.mxu0 %v6874_v22  ;;  %v6894_v36 = vld [vmem:[%s7544_s16 + $0x4] ss:$48 sps:$4 sm:$0xff]   ;;  %v6898_v38 = vld [vmem:[%s7544_s16] ss:$48 sps:$4 sm:$0xff]   ;;  %v6960_v22 = vld [vmem:[%s7544_s16 + $0x248] ss:$48 sps:$4 sm:$0xff]  }
  0x39   : > { %2697 = vmatpush1.bf16.msra.mxu1 %v6875_v23  ;;  %2645 = vmatprep.subr.bf16.mxu0 %v6876_v24  ;;  %v6896_v37 = vld [vmem:[%s7544_s16 + $0x604] ss:$48 sps:$4 sm:$0xff]   ;;  %v6899_v39 = vld [vmem:[%s7544_s16 + $0x600] ss:$48 sps:$4 sm:$0xff]   ;;  %v6963_v23 = vld [vmem:[%s7544_s16 + $0x848] ss:$48 sps:$4 sm:$0xff]  }
  0x3a   : > { %2698 = vmatprep.subr.bf16.mxu1 %v6878_v25  ;;  %v6900_v40 = vld [vmem:[%s7544_s16 + $0x5a4] ss:$48 sps:$4 sm:$0xff]   ;;  %v6904_v42 = vld [vmem:[%s7544_s16 + $0x5a0] ss:$48 sps:$4 sm:$0xff]   ;;  %v6971_v24 = vld [vmem:[%s7544_s16 + $0x1ec] ss:$48 sps:$4 sm:$0xff]  }
  0x3b   : > { %v6902_v41 = vld [vmem:[%s7544_s16 + $0xba4] ss:$48 sps:$4 sm:$0xff]   ;;  %v6905_v43 = vld [vmem:[%s7544_s16 + $0xba0] ss:$48 sps:$4 sm:$0xff]   ;;  %v6974_v25 = vld [vmem:[%s7544_s16 + $0x7ec] ss:$48 sps:$4 sm:$0xff]  }
  0x3c   : > { %2646 = vmatpush1.bf16.msra.mxu0 %v6880_v26  ;;  %v6906_v44 = vld [vmem:[%s7544_s16 + $0x544] ss:$48 sps:$4 sm:$0xff]   ;;  %v6910_v46 = vld [vmem:[%s7544_s16 + $0x540] ss:$48 sps:$4 sm:$0xff]   ;;  %v7663_v26 = vcombine.low %v289_v14, %v291_v15  ;;  %v7043_v14 = vld [vmem:[%s7544_s16 + $0x36c] ss:$48 sps:$4 sm:$0xff]  }
  0x3d   : > { %2699 = vmatpush1.bf16.msra.mxu1 %v6881_v27  ;;  %2647 = vmatprep.subr.bf16.mxu0 %v6882_v28  ;;  %v6908_v45 = vld [vmem:[%s7544_s16 + $0xb44] ss:$48 sps:$4 sm:$0xff]   ;;  %v6911_v47 = vld [vmem:[%s7544_s16 + $0xb40] ss:$48 sps:$4 sm:$0xff]   ;;  %v6969_v28 = vld [vmem:[%s7544_s16 + $0x1e8] ss:$48 sps:$4 sm:$0xff]  }
  0x3e   : > { %2700 = vmatprep.subr.bf16.mxu1 %v6884_v29  ;;  %v6912_v48 = vld [vmem:[%s7544_s16 + $0x4e4] ss:$48 sps:$4 sm:$0xff]   ;;  %v6916_v50 = vld [vmem:[%s7544_s16 + $0x4e0] ss:$48 sps:$4 sm:$0xff]   ;;  %v6972_v29 = vld [vmem:[%s7544_s16 + $0x7e8] ss:$48 sps:$4 sm:$0xff]  }
  0x3f   : > { %v6914_v49 = vld [vmem:[%s7544_s16 + $0xae4] ss:$48 sps:$4 sm:$0xff]   ;;  %v6917_v51 = vld [vmem:[%s7544_s16 + $0xae0] ss:$48 sps:$4 sm:$0xff]   ;;  %v7046_v15 = vld [vmem:[%s7544_s16 + $0x96c] ss:$48 sps:$4 sm:$0xff]  }
  0x40   : > { %2648 = vmatpush1.bf16.msra.mxu0 %v6886_v30  ;;  %v6918_v52 = vld [vmem:[%s7544_s16 + $0x484] ss:$48 sps:$4 sm:$0xff]   ;;  %v6922_v54 = vld [vmem:[%s7544_s16 + $0x480] ss:$48 sps:$4 sm:$0xff]   ;;  %v6977_v30 = vld [vmem:[%s7544_s16 + $0x18c] ss:$48 sps:$4 sm:$0xff]  }
  0x41   : > { %2701 = vmatpush1.bf16.msra.mxu1 %v6887_v31  ;;  %2649 = vmatprep.subr.bf16.mxu0 %v6888_v32  ;;  %v6920_v53 = vld [vmem:[%s7544_s16 + $0xa84] ss:$48 sps:$4 sm:$0xff]   ;;  %v6923_v55 = vld [vmem:[%s7544_s16 + $0xa80] ss:$48 sps:$4 sm:$0xff]   ;;  %v6980_v31 = vld [vmem:[%s7544_s16 + $0x78c] ss:$48 sps:$4 sm:$0xff]  }
  0x42   : > { %2702 = vmatprep.subr.bf16.mxu1 %v6890_v33  ;;  %v7619_v56 = vld [vmem:[#allocation2 + $0x34] ss:$-24 sps:$4 sm:$0xff]   ;;  %v6928_v60 = vld [vmem:[%s7544_s16 + $0x420] ss:$48 sps:$4 sm:$0xff]   ;;  %v6975_v32 = vld [vmem:[%s7544_s16 + $0x188] ss:$48 sps:$4 sm:$0xff]  }
  0x43   : > { %v6924_v57 = vld [vmem:[%s7544_s16 + $0x424] ss:$48 sps:$4 sm:$0xff]   ;;  %2669 = vmatprep.mubr.bf16.mxu0 %v7619_v56  ;;  %v6929_v61 = vld [vmem:[%s7544_s16 + $0xa20] ss:$48 sps:$4 sm:$0xff]   ;;  %v6978_v33 = vld [vmem:[%s7544_s16 + $0x788] ss:$48 sps:$4 sm:$0xff]  }
  0x44   : > { %2650 = vmatpush1.bf16.msra.mxu0 %v6892_v34  ;;  %v7622_v58 = vld [vmem:[#allocation2 + $0x4] ss:$16 sps:$4 sm:$0xff]   ;;  %v6934_v0 = vld [vmem:[%s7544_s16 + $0x3c0] ss:$48 sps:$4 sm:$0xff]   ;;  %v6983_v34 = vld [vmem:[%s7544_s16 + $0x12c] ss:$48 sps:$4 sm:$0xff]  }
  0x45   : > { %2703 = vmatpush1.bf16.msra.mxu1 %v6893_v35  ;;  %2651 = vmatprep.subr.bf16.mxu0 %v6894_v36  ;;  %v6926_v59 = vld [vmem:[%s7544_s16 + $0xa24] ss:$48 sps:$4 sm:$0xff]   ;;  %v6935_v1 = vld [vmem:[%s7544_s16 + $0x9c0] ss:$48 sps:$4 sm:$0xff]   ;;  %v6986_v35 = vld [vmem:[%s7544_s16 + $0x72c] ss:$48 sps:$4 sm:$0xff]  }
  0x46   : > { %2704 = vmatprep.subr.bf16.mxu1 %v6896_v37  ;;  %2722 = vmatprep.mubr.bf16.mxu1 %v7622_v58  ;;  %v6930_v62 = vld [vmem:[%s7544_s16 + $0x3c4] ss:$48 sps:$4 sm:$0xff]   ;;  %v6940_v4 = vld [vmem:[%s7544_s16 + $0x360] ss:$48 sps:$4 sm:$0xff]   ;;  %v6981_v36 = vld [vmem:[%s7544_s16 + $0x128] ss:$48 sps:$4 sm:$0xff]  }
  0x47   : > { %v6932_v63 = vld [vmem:[%s7544_s16 + $0x9c4] ss:$48 sps:$4 sm:$0xff]   ;;  %v6941_v5 = vld [vmem:[%s7544_s16 + $0x960] ss:$48 sps:$4 sm:$0xff]   ;;  %v6984_v37 = vld [vmem:[%s7544_s16 + $0x728] ss:$48 sps:$4 sm:$0xff]  }
  0x48   : > { %2652 = vmatpush1.bf16.msra.mxu0 %v6898_v38  ;;  %v6936_v2 = vld [vmem:[%s7544_s16 + $0x364] ss:$48 sps:$4 sm:$0xff]   ;;  %v6946_v8 = vld [vmem:[%s7544_s16 + $0x300] ss:$48 sps:$4 sm:$0xff]   ;;  %v6989_v38 = vld [vmem:[%s7544_s16 + $0xcc] ss:$48 sps:$4 sm:$0xff]  }
  0x49   : > { %2705 = vmatpush1.bf16.msra.mxu1 %v6899_v39  ;;  %2653 = vmatprep.subr.bf16.mxu0 %v6900_v40  ;;  %v6938_v3 = vld [vmem:[%s7544_s16 + $0x964] ss:$48 sps:$4 sm:$0xff]   ;;  %v6947_v9 = vld [vmem:[%s7544_s16 + $0x900] ss:$48 sps:$4 sm:$0xff]   ;;  %v6992_v39 = vld [vmem:[%s7544_s16 + $0x6cc] ss:$48 sps:$4 sm:$0xff]  }
  0x4a   : > { %2706 = vmatprep.subr.bf16.mxu1 %v6902_v41  ;;  %v6942_v6 = vld [vmem:[%s7544_s16 + $0x304] ss:$48 sps:$4 sm:$0xff]   ;;  %v7641_v10 = vld [vmem:[#allocation2 + $0x30] ss:$-24 sps:$4 sm:$0xff]  }
  0x4b   : > { %v6944_v7 = vld [vmem:[%s7544_s16 + $0x904] ss:$48 sps:$4 sm:$0xff]   ;;  %v7643_v11 = vld [vmem:[#allocation2] ss:$16 sps:$4 sm:$0xff]   ;;  %v6987_v40 = vld [vmem:[%s7544_s16 + $0xc8] ss:$48 sps:$4 sm:$0xff]  }
  0x4c   : > { %2654 = vmatpush2.bf16.msra.mxu0 %v6904_v42  ;;  %v7653_v21 = vld [vmem:[#allocation2 + $0x24] ss:$24 sps:$4 sm:$0xff]   ;;  %v7665_v27 = vld [vmem:[#allocation2 + $0x20] ss:$24 sps:$4 sm:$0xff]  }
  0x4d   : > { %2707 = vmatpush2.bf16.msra.mxu1 %v6905_v43  ;;  %2655 = vmatprep.subr.bf16.mxu0 %v6906_v44  ;;  %v6990_v41 = vld [vmem:[%s7544_s16 + $0x6c8] ss:$48 sps:$4 sm:$0xff]   ;;  %v6995_v42 = vld [vmem:[%s7544_s16 + $0x6c] ss:$48 sps:$4 sm:$0xff]  }
  0x4e   : > { %2708 = vmatprep.subr.bf16.mxu1 %v6908_v45  ;;  %v6998_v43 = vld [vmem:[%s7544_s16 + $0x66c] ss:$48 sps:$4 sm:$0xff]   ;;  %v6993_v44 = vld [vmem:[%s7544_s16 + $0x68] ss:$48 sps:$4 sm:$0xff]  }
  0x4f   : > { %v6996_v45 = vld [vmem:[%s7544_s16 + $0x668] ss:$48 sps:$4 sm:$0xff]  }
  0x50   : > { %2656 = vmatpush2.bf16.msra.mxu0 %v6910_v46  ;;  %v7001_v46 = vld [vmem:[%s7544_s16 + $0xc] ss:$48 sps:$4 sm:$0xff]  }
  0x51   : > { %2709 = vmatpush2.bf16.msra.mxu1 %v6911_v47  ;;  %2657 = vmatprep.subr.bf16.mxu0 %v6912_v48  ;;  %v7004_v47 = vld [vmem:[%s7544_s16 + $0x60c] ss:$48 sps:$4 sm:$0xff]   ;;  %v6999_v48 = vld [vmem:[%s7544_s16 + $0x8] ss:$48 sps:$4 sm:$0xff]  }
  0x52   : > { %2710 = vmatprep.subr.bf16.mxu1 %v6914_v49  ;;  %v7002_v49 = vld [vmem:[%s7544_s16 + $0x608] ss:$48 sps:$4 sm:$0xff]  }
  0x54   : > { %2658 = vmatpush2.bf16.msra.mxu0 %v6916_v50  ;;  %v7007_v50 = vld [vmem:[%s7544_s16 + $0x5ac] ss:$48 sps:$4 sm:$0xff]  }
  0x55   : > { %2711 = vmatpush2.bf16.msra.mxu1 %v6917_v51  ;;  %2659 = vmatprep.subr.bf16.mxu0 %v6918_v52  ;;  %v7010_v51 = vld [vmem:[%s7544_s16 + $0xbac] ss:$48 sps:$4 sm:$0xff]   ;;  %v7005_v52 = vld [vmem:[%s7544_s16 + $0x5a8] ss:$48 sps:$4 sm:$0xff]  }
  0x56   : > { %2712 = vmatprep.subr.bf16.mxu1 %v6920_v53  ;;  %v7008_v53 = vld [vmem:[%s7544_s16 + $0xba8] ss:$48 sps:$4 sm:$0xff]  }
  0x58   : > { %2660 = vmatpush2.bf16.msra.mxu0 %v6922_v54  ;;  %v7013_v54 = vld [vmem:[%s7544_s16 + $0x54c] ss:$48 sps:$4 sm:$0xff]  }
  0x59   : > { %2713 = vmatpush2.bf16.msra.mxu1 %v6923_v55  ;;  %2661 = vmatprep.subr.bf16.mxu0 %v6924_v57  ;;  %v7016_v55 = vld [vmem:[%s7544_s16 + $0xb4c] ss:$48 sps:$4 sm:$0xff]   ;;  %v7011_v57 = vld [vmem:[%s7544_s16 + $0x548] ss:$48 sps:$4 sm:$0xff]  }
  0x5a   : > { %2714 = vmatprep.subr.bf16.mxu1 %v6926_v59  ;;  %v7014_v59 = vld [vmem:[%s7544_s16 + $0xb48] ss:$48 sps:$4 sm:$0xff]  }
  0x5c   : > { %2662 = vmatpush2.bf16.msra.mxu0 %v6928_v60  ;;  %v7019_v60 = vld [vmem:[%s7544_s16 + $0x4ec] ss:$48 sps:$4 sm:$0xff]  }
  0x5d   : > { %2715 = vmatpush2.bf16.msra.mxu1 %v6929_v61  ;;  %2663 = vmatprep.subr.bf16.mxu0 %v6930_v62  ;;  %v7022_v61 = vld [vmem:[%s7544_s16 + $0xaec] ss:$48 sps:$4 sm:$0xff]   ;;  %v7017_v62 = vld [vmem:[%s7544_s16 + $0x4e8] ss:$48 sps:$4 sm:$0xff]  }
  0x5e   : > { %2716 = vmatprep.subr.bf16.mxu1 %v6932_v63  ;;  %v7020_v63 = vld [vmem:[%s7544_s16 + $0xae8] ss:$48 sps:$4 sm:$0xff]  }
  0x60   : > { %2664 = vmatpush2.bf16.msra.mxu0 %v6934_v0  ;;  %v7025_v0 = vld [vmem:[%s7544_s16 + $0x48c] ss:$48 sps:$4 sm:$0xff]  }
  0x61   : > { %2717 = vmatpush2.bf16.msra.mxu1 %v6935_v1  ;;  %2665 = vmatprep.subr.bf16.mxu0 %v6936_v2  ;;  %v7028_v1 = vld [vmem:[%s7544_s16 + $0xa8c] ss:$48 sps:$4 sm:$0xff]   ;;  %v7023_v2 = vld [vmem:[%s7544_s16 + $0x488] ss:$48 sps:$4 sm:$0xff]  }
  0x62   : > { %2718 = vmatprep.subr.bf16.mxu1 %v6938_v3  ;;  %v7026_v3 = vld [vmem:[%s7544_s16 + $0xa88] ss:$48 sps:$4 sm:$0xff]  }
  0x64   : > { %2666 = vmatpush2.bf16.msra.mxu0 %v6940_v4  ;;  %v7031_v4 = vld [vmem:[%s7544_s16 + $0x42c] ss:$48 sps:$4 sm:$0xff]  }
  0x65   : > { %2719 = vmatpush2.bf16.msra.mxu1 %v6941_v5  ;;  %2667 = vmatprep.subr.bf16.mxu0 %v6942_v6  ;;  %v7034_v5 = vld [vmem:[%s7544_s16 + $0xa2c] ss:$48 sps:$4 sm:$0xff]   ;;  %v7029_v6 = vld [vmem:[%s7544_s16 + $0x428] ss:$48 sps:$4 sm:$0xff]  }
  0x66   : > { %2720 = vmatprep.subr.bf16.mxu1 %v6944_v7  ;;  %v7032_v7 = vld [vmem:[%s7544_s16 + $0xa28] ss:$48 sps:$4 sm:$0xff]  }
  0x68   : > { %2668 = vmatpush2.bf16.msra.mxu0 %v6946_v8  ;;  %v7037_v8 = vld [vmem:[%s7544_s16 + $0x3cc] ss:$48 sps:$4 sm:$0xff]  }
  0x69   : > { %2721 = vmatpush2.bf16.msra.mxu1 %v6947_v9  ;;  %2743 = vmatprep.subr.bf16.mxu0 %v6956_v12  ;;  %v7040_v9 = vld [vmem:[%s7544_s16 + $0x9cc] ss:$48 sps:$4 sm:$0xff]   ;;  %v7035_v12 = vld [vmem:[%s7544_s16 + $0x3c8] ss:$48 sps:$4 sm:$0xff]  }
  0x6a   : > { %2796 = vmatprep.subr.bf16.mxu1 %v6959_v13  ;;  %v7038_v13 = vld [vmem:[%s7544_s16 + $0x9c8] ss:$48 sps:$4 sm:$0xff]  }
  0x6b   : > { %2670 = vmatmul.mubr.bf16.vlgmr.msra.gmra.mxu0 %v7641_v10 }
  0x6c   : > { %2723 = vmatmul.mubr.bf16.vlgmr.msra.gmra.mxu1 %v7643_v11  ;;  %2744 = vmatpush1.bf16.msra.mxu0 %v6954_v16  ;;  %v7041_v16 = vld [vmem:[%s7544_s16 + $0x368] ss:$48 sps:$4 sm:$0xff]  }
  0x6d   : > { %2797 = vmatpush1.bf16.msra.mxu1 %v6957_v17  ;;  %2745 = vmatprep.subr.bf16.mxu0 %v6962_v18  ;;  %v7044_v17 = vld [vmem:[%s7544_s16 + $0x968] ss:$48 sps:$4 sm:$0xff]   ;;  %v7049_v18 = vld [vmem:[%s7544_s16 + $0x30c] ss:$48 sps:$4 sm:$0xff]  }
  0x6e   : > { %2798 = vmatprep.subr.bf16.mxu1 %v6965_v19  ;;  %2679 = vmatprep.mubr.bf16.mxu0 %v7651_v20  ;;  %v7052_v19 = vld [vmem:[%s7544_s16 + $0x90c] ss:$48 sps:$4 sm:$0xff]  }
  0x6f   : > { %2732 = vmatprep.mubr.bf16.mxu1 %v7653_v21 }
  0x70   : > { %2746 = vmatpush1.bf16.msra.mxu0 %v6960_v22  ;;  %v7047_v22 = vld [vmem:[%s7544_s16 + $0x308] ss:$48 sps:$4 sm:$0xff]  }
  0x71   : > { %2799 = vmatpush1.bf16.msra.mxu1 %v6963_v23  ;;  %2747 = vmatprep.subr.bf16.mxu0 %v6971_v24  ;;  %v7050_v23 = vld [vmem:[%s7544_s16 + $0x908] ss:$48 sps:$4 sm:$0xff]   ;;  %v7055_v24 = vld [vmem:[%s7544_s16 + $0x2b4] ss:$48 sps:$4 sm:$0xff]  }
  0x72   : > { %2800 = vmatprep.subr.bf16.mxu1 %v6974_v25  ;;  %v7058_v25 = vld [vmem:[%s7544_s16 + $0x8b4] ss:$48 sps:$4 sm:$0xff]  }
  0x73   : > { %2680 = vmatmul.mubr.bf16.gmra.mxu0 %v7663_v26 }
  0x74   : > { %2733 = vmatmul.mubr.bf16.gmra.mxu1 %v7665_v27  ;;  %2748 = vmatpush1.bf16.msra.mxu0 %v6969_v28  ;;  %v7053_v28 = vld [vmem:[%s7544_s16 + $0x2b0] ss:$48 sps:$4 sm:$0xff]  }
  0x75   : > { %2801 = vmatpush1.bf16.msra.mxu1 %v6972_v29  ;;  %2749 = vmatprep.subr.bf16.mxu0 %v6977_v30  ;;  %v7056_v29 = vld [vmem:[%s7544_s16 + $0x8b0] ss:$48 sps:$4 sm:$0xff]   ;;  %v7061_v30 = vld [vmem:[%s7544_s16 + $0x254] ss:$48 sps:$4 sm:$0xff]  }
  0x76   : > { %2802 = vmatprep.subr.bf16.mxu1 %v6980_v31  ;;  %2775 = vmatprep.mubr.bf16.mxu0 %v7619_v56  ;;  %v7064_v31 = vld [vmem:[%s7544_s16 + $0x854] ss:$48 sps:$4 sm:$0xff]  }
  0x77   : > { %2828 = vmatprep.mubr.bf16.mxu1 %v7622_v58 }
  0x78   : > { %2750 = vmatpush1.bf16.msra.mxu0 %v6975_v32  ;;  %v7059_v32 = vld [vmem:[%s7544_s16 + $0x250] ss:$48 sps:$4 sm:$0xff]  }
  0x79   : > { %2803 = vmatpush1.bf16.msra.mxu1 %v6978_v33  ;;  %2751 = vmatprep.subr.bf16.mxu0 %v6983_v34  ;;  %v7062_v33 = vld [vmem:[%s7544_s16 + $0x850] ss:$48 sps:$4 sm:$0xff]   ;;  %v7067_v34 = vld [vmem:[%s7544_s16 + $0x1f4] ss:$48 sps:$4 sm:$0xff]  }
  0x7a   : > { %2804 = vmatprep.subr.bf16.mxu1 %v6986_v35  ;;  %v7070_v35 = vld [vmem:[%s7544_s16 + $0x7f4] ss:$48 sps:$4 sm:$0xff]  }
  0x7c   : > { %2752 = vmatpush1.bf16.msra.mxu0 %v6981_v36  ;;  %v7065_v36 = vld [vmem:[%s7544_s16 + $0x1f0] ss:$48 sps:$4 sm:$0xff]  }
  0x7d   : > { %2805 = vmatpush1.bf16.msra.mxu1 %v6984_v37  ;;  %2753 = vmatprep.subr.bf16.mxu0 %v6989_v38  ;;  %v7068_v37 = vld [vmem:[%s7544_s16 + $0x7f0] ss:$48 sps:$4 sm:$0xff]   ;;  %v7073_v38 = vld [vmem:[%s7544_s16 + $0x194] ss:$48 sps:$4 sm:$0xff]  }
  0x7e   : > { %2806 = vmatprep.subr.bf16.mxu1 %v6992_v39  ;;  %v7076_v39 = vld [vmem:[%s7544_s16 + $0x794] ss:$48 sps:$4 sm:$0xff]  }
  0x80   : > { %2754 = vmatpush1.bf16.msra.mxu0 %v6987_v40  ;;  %v7071_v40 = vld [vmem:[%s7544_s16 + $0x190] ss:$48 sps:$4 sm:$0xff]  }
  0x81   : > { %2807 = vmatpush1.bf16.msra.mxu1 %v6990_v41  ;;  %2755 = vmatprep.subr.bf16.mxu0 %v6995_v42  ;;  %v7074_v41 = vld [vmem:[%s7544_s16 + $0x790] ss:$48 sps:$4 sm:$0xff]   ;;  %v7079_v42 = vld [vmem:[%s7544_s16 + $0x134] ss:$48 sps:$4 sm:$0xff]  }
  0x82   : > { %2808 = vmatprep.subr.bf16.mxu1 %v6998_v43  ;;  %v7082_v43 = vld [vmem:[%s7544_s16 + $0x734] ss:$48 sps:$4 sm:$0xff]  }
  0x84   : > { %2756 = vmatpush1.bf16.msra.mxu0 %v6993_v44  ;;  %v7077_v44 = vld [vmem:[%s7544_s16 + $0x130] ss:$48 sps:$4 sm:$0xff]  }
  0x85   : > { %2809 = vmatpush1.bf16.msra.mxu1 %v6996_v45  ;;  %2757 = vmatprep.subr.bf16.mxu0 %v7001_v46  ;;  %v7080_v45 = vld [vmem:[%s7544_s16 + $0x730] ss:$48 sps:$4 sm:$0xff]   ;;  %v7085_v46 = vld [vmem:[%s7544_s16 + $0xd4] ss:$48 sps:$4 sm:$0xff]  }
  0x86   : > { %2810 = vmatprep.subr.bf16.mxu1 %v7004_v47  ;;  %v7088_v47 = vld [vmem:[%s7544_s16 + $0x6d4] ss:$48 sps:$4 sm:$0xff]  }
  0x88   : > { %2758 = vmatpush1.bf16.msra.mxu0 %v6999_v48  ;;  %v7083_v48 = vld [vmem:[%s7544_s16 + $0xd0] ss:$48 sps:$4 sm:$0xff]  }
  0x89   : > { %2811 = vmatpush1.bf16.msra.mxu1 %v7002_v49  ;;  %2759 = vmatprep.subr.bf16.mxu0 %v7007_v50  ;;  %v7094_v49 = vld [vmem:[%s7544_s16 + $0x674] ss:$48 sps:$4 sm:$0xff]   ;;  %v7089_v50 = vld [vmem:[%s7544_s16 + $0x70] ss:$48 sps:$4 sm:$0xff]  }
  0x8a   : > { %2812 = vmatprep.subr.bf16.mxu1 %v7010_v51  ;;  %v7092_v51 = vld [vmem:[%s7544_s16 + $0x670] ss:$48 sps:$4 sm:$0xff]  }
  0x8c   : > { %2760 = vmatpush2.bf16.msra.mxu0 %v7005_v52  ;;  %v7097_v52 = vld [vmem:[%s7544_s16 + $0x14] ss:$48 sps:$4 sm:$0xff]  }
  0x8d   : > { %2813 = vmatpush2.bf16.msra.mxu1 %v7008_v53  ;;  %2761 = vmatprep.subr.bf16.mxu0 %v7013_v54  ;;  %v7100_v53 = vld [vmem:[%s7544_s16 + $0x614] ss:$48 sps:$4 sm:$0xff]   ;;  %v7095_v54 = vld [vmem:[%s7544_s16 + $0x10] ss:$48 sps:$4 sm:$0xff]  }
  0x8e   : > { %2814 = vmatprep.subr.bf16.mxu1 %v7016_v55  ;;  %v7098_v55 = vld [vmem:[%s7544_s16 + $0x610] ss:$48 sps:$4 sm:$0xff]  }
  0x90   : > { %2762 = vmatpush2.bf16.msra.mxu0 %v7011_v57  ;;  %v7103_v57 = vld [vmem:[%s7544_s16 + $0x5b4] ss:$48 sps:$4 sm:$0xff]  }
  0x91   : > { %2815 = vmatpush2.bf16.msra.mxu1 %v7014_v59  ;;  %2763 = vmatprep.subr.bf16.mxu0 %v7019_v60  ;;  %v7106_v59 = vld [vmem:[%s7544_s16 + $0xbb4] ss:$48 sps:$4 sm:$0xff]   ;;  %v7101_v60 = vld [vmem:[%s7544_s16 + $0x5b0] ss:$48 sps:$4 sm:$0xff]  }
  0x92   : > { %2816 = vmatprep.subr.bf16.mxu1 %v7022_v61  ;;  %v7104_v61 = vld [vmem:[%s7544_s16 + $0xbb0] ss:$48 sps:$4 sm:$0xff]  }
  0x94   : > { %2764 = vmatpush2.bf16.msra.mxu0 %v7017_v62  ;;  %v7109_v62 = vld [vmem:[%s7544_s16 + $0x554] ss:$48 sps:$4 sm:$0xff]  }
  0x95   : > { %2817 = vmatpush2.bf16.msra.mxu1 %v7020_v63  ;;  %2765 = vmatprep.subr.bf16.mxu0 %v7025_v0  ;;  %v7112_v63 = vld [vmem:[%s7544_s16 + $0xb54] ss:$48 sps:$4 sm:$0xff]   ;;  %v7107_v0 = vld [vmem:[%s7544_s16 + $0x550] ss:$48 sps:$4 sm:$0xff]  }
  0x96   : > { %2818 = vmatprep.subr.bf16.mxu1 %v7028_v1  ;;  %v7110_v1 = vld [vmem:[%s7544_s16 + $0xb50] ss:$48 sps:$4 sm:$0xff]  }
  0x98   : > { %2766 = vmatpush2.bf16.msra.mxu0 %v7023_v2  ;;  %v7115_v2 = vld [vmem:[%s7544_s16 + $0x4f4] ss:$48 sps:$4 sm:$0xff]  }
  0x99   : > { %2819 = vmatpush2.bf16.msra.mxu1 %v7026_v3  ;;  %2767 = vmatprep.subr.bf16.mxu0 %v7031_v4  ;;  %v7118_v3 = vld [vmem:[%s7544_s16 + $0xaf4] ss:$48 sps:$4 sm:$0xff]   ;;  %v7113_v4 = vld [vmem:[%s7544_s16 + $0x4f0] ss:$48 sps:$4 sm:$0xff]  }
  0x9a   : > { %2820 = vmatprep.subr.bf16.mxu1 %v7034_v5  ;;  %v7116_v5 = vld [vmem:[%s7544_s16 + $0xaf0] ss:$48 sps:$4 sm:$0xff]  }
  0x9c   : > { %2768 = vmatpush2.bf16.msra.mxu0 %v7029_v6  ;;  %v7121_v6 = vld [vmem:[%s7544_s16 + $0x494] ss:$48 sps:$4 sm:$0xff]  }
  0x9d   : > { %2821 = vmatpush2.bf16.msra.mxu1 %v7032_v7  ;;  %2769 = vmatprep.subr.bf16.mxu0 %v7037_v8  ;;  %v7124_v7 = vld [vmem:[%s7544_s16 + $0xa94] ss:$48 sps:$4 sm:$0xff]   ;;  %v7119_v8 = vld [vmem:[%s7544_s16 + $0x490] ss:$48 sps:$4 sm:$0xff]  }
  0x9e   : > { %2822 = vmatprep.subr.bf16.mxu1 %v7040_v9  ;;  %v7122_v9 = vld [vmem:[%s7544_s16 + $0xa90] ss:$48 sps:$4 sm:$0xff]  }
  0xa0   : > { %2770 = vmatpush2.bf16.msra.mxu0 %v7035_v12  ;;  %v7127_v12 = vld [vmem:[%s7544_s16 + $0x434] ss:$48 sps:$4 sm:$0xff]  }
  0xa1   : > { %2823 = vmatpush2.bf16.msra.mxu1 %v7038_v13  ;;  %2771 = vmatprep.subr.bf16.mxu0 %v7043_v14  ;;  %v7130_v13 = vld [vmem:[%s7544_s16 + $0xa34] ss:$48 sps:$4 sm:$0xff]   ;;  %v7125_v14 = vld [vmem:[%s7544_s16 + $0x430] ss:$48 sps:$4 sm:$0xff]  }
  0xa2   : > { %2824 = vmatprep.subr.bf16.mxu1 %v7046_v15  ;;  %v7128_v15 = vld [vmem:[%s7544_s16 + $0xa30] ss:$48 sps:$4 sm:$0xff]  }
  0xa4   : > { %2772 = vmatpush2.bf16.msra.mxu0 %v7041_v16  ;;  %v7133_v16 = vld [vmem:[%s7544_s16 + $0x3d4] ss:$48 sps:$4 sm:$0xff]  }
  0xa5   : > { %2825 = vmatpush2.bf16.msra.mxu1 %v7044_v17  ;;  %2773 = vmatprep.subr.bf16.mxu0 %v7049_v18  ;;  %v7136_v17 = vld [vmem:[%s7544_s16 + $0x9d4] ss:$48 sps:$4 sm:$0xff]   ;;  %v7131_v18 = vld [vmem:[%s7544_s16 + $0x3d0] ss:$48 sps:$4 sm:$0xff]  }
  0xa6   : > { %2826 = vmatprep.subr.bf16.mxu1 %v7052_v19  ;;  %v7134_v19 = vld [vmem:[%s7544_s16 + $0x9d0] ss:$48 sps:$4 sm:$0xff]  }
  0xa8   : > { %2774 = vmatpush2.bf16.msra.mxu0 %v7047_v22  ;;  %v7139_v22 = vld [vmem:[%s7544_s16 + $0x374] ss:$48 sps:$4 sm:$0xff]  }
  0xa9   : > { %2827 = vmatpush2.bf16.msra.mxu1 %v7050_v23  ;;  %2849 = vmatprep.subr.bf16.mxu0 %v7055_v24  ;;  %v7142_v23 = vld [vmem:[%s7544_s16 + $0x974] ss:$48 sps:$4 sm:$0xff]   ;;  %v7137_v24 = vld [vmem:[%s7544_s16 + $0x370] ss:$48 sps:$4 sm:$0xff]  }
  0xaa   : > { %2902 = vmatprep.subr.bf16.mxu1 %v7058_v25  ;;  %v7140_v25 = vld [vmem:[%s7544_s16 + $0x970] ss:$48 sps:$4 sm:$0xff]  }
  0xab   : > { %2776 = vmatmul.mubr.bf16.vlgmr.msra.gmra.mxu0 %v7641_v10 }
  0xac   : > { %2829 = vmatmul.mubr.bf16.vlgmr.msra.gmra.mxu1 %v7643_v11  ;;  %2850 = vmatpush1.bf16.msra.mxu0 %v7053_v28  ;;  %v7145_v28 = vld [vmem:[%s7544_s16 + $0x314] ss:$48 sps:$4 sm:$0xff]  }
  0xad   : > { %2903 = vmatpush1.bf16.msra.mxu1 %v7056_v29  ;;  %2851 = vmatprep.subr.bf16.mxu0 %v7061_v30  ;;  %v7148_v29 = vld [vmem:[%s7544_s16 + $0x914] ss:$48 sps:$4 sm:$0xff]   ;;  %v7143_v30 = vld [vmem:[%s7544_s16 + $0x310] ss:$48 sps:$4 sm:$0xff]  }
  0xae   : > { %2904 = vmatprep.subr.bf16.mxu1 %v7064_v31  ;;  %2785 = vmatprep.mubr.bf16.mxu0 %v7651_v20  ;;  %v7146_v31 = vld [vmem:[%s7544_s16 + $0x910] ss:$48 sps:$4 sm:$0xff]  }
  0xaf   : > { %2838 = vmatprep.mubr.bf16.mxu1 %v7653_v21 }
  0xb0   : > { %2852 = vmatpush1.bf16.msra.mxu0 %v7059_v32  ;;  %v7151_v32 = vld [vmem:[%s7544_s16 + $0x2bc] ss:$48 sps:$4 sm:$0xff]  }
  0xb1   : > { %2905 = vmatpush1.bf16.msra.mxu1 %v7062_v33  ;;  %2853 = vmatprep.subr.bf16.mxu0 %v7067_v34  ;;  %v7154_v33 = vld [vmem:[%s7544_s16 + $0x8bc] ss:$48 sps:$4 sm:$0xff]   ;;  %v7149_v34 = vld [vmem:[%s7544_s16 + $0x2b8] ss:$48 sps:$4 sm:$0xff]  }
  0xb2   : > { %2906 = vmatprep.subr.bf16.mxu1 %v7070_v35  ;;  %v7152_v35 = vld [vmem:[%s7544_s16 + $0x8b8] ss:$48 sps:$4 sm:$0xff]  }
  0xb3   : > { %2786 = vmatmul.mubr.bf16.gmra.mxu0 %v7663_v26 }
  0xb4   : > { %2839 = vmatmul.mubr.bf16.gmra.mxu1 %v7665_v27  ;;  %2854 = vmatpush1.bf16.msra.mxu0 %v7065_v36  ;;  %v7157_v36 = vld [vmem:[%s7544_s16 + $0x25c] ss:$48 sps:$4 sm:$0xff]  }
  0xb5   : > { %2907 = vmatpush1.bf16.msra.mxu1 %v7068_v37  ;;  %2855 = vmatprep.subr.bf16.mxu0 %v7073_v38  ;;  %v7160_v37 = vld [vmem:[%s7544_s16 + $0x85c] ss:$48 sps:$4 sm:$0xff]   ;;  %v7155_v38 = vld [vmem:[%s7544_s16 + $0x258] ss:$48 sps:$4 sm:$0xff]  }
  0xb6   : > { %2908 = vmatprep.subr.bf16.mxu1 %v7076_v39  ;;  %2881 = vmatprep.mubr.bf16.mxu0 %v7619_v56  ;;  %v7086_v56 = vld [vmem:[%s7544_s16 + $0x6d0] ss:$48 sps:$4 sm:$0xff]   ;;  %v7158_v39 = vld [vmem:[%s7544_s16 + $0x858] ss:$48 sps:$4 sm:$0xff]  }
  0xb7   : > { %2934 = vmatprep.mubr.bf16.mxu1 %v7622_v58  ;;  %v7091_v58 = vld [vmem:[%s7544_s16 + $0x74] ss:$48 sps:$4 sm:$0xff]  }
  0xb8   : > { %2856 = vmatpush1.bf16.msra.mxu0 %v7071_v40  ;;  %v7163_v40 = vld [vmem:[%s7544_s16 + $0x1fc] ss:$48 sps:$4 sm:$0xff]  }
  0xb9   : > { %2909 = vmatpush1.bf16.msra.mxu1 %v7074_v41  ;;  %2857 = vmatprep.subr.bf16.mxu0 %v7079_v42  ;;  %v7166_v41 = vld [vmem:[%s7544_s16 + $0x7fc] ss:$48 sps:$4 sm:$0xff]  }
  0xba   : > { %2910 = vmatprep.subr.bf16.mxu1 %v7082_v43  ;;  %v7169_v42 = vld [vmem:[%s7544_s16 + $0x19c] ss:$48 sps:$4 sm:$0xff]  }
  0xbb   : > { %v7172_v43 = vld [vmem:[%s7544_s16 + $0x79c] ss:$48 sps:$4 sm:$0xff]  }
  0xbc   : > { %2858 = vmatpush1.bf16.msra.mxu0 %v7077_v44  ;;  %v7167_v44 = vld [vmem:[%s7544_s16 + $0x198] ss:$48 sps:$4 sm:$0xff]  }
  0xbd   : > { %2911 = vmatpush1.bf16.msra.mxu1 %v7080_v45  ;;  %2859 = vmatprep.subr.bf16.mxu0 %v7085_v46  ;;  %v7175_v45 = vld [vmem:[%s7544_s16 + $0x13c] ss:$48 sps:$4 sm:$0xff]  }
  0xbe   : > { %2912 = vmatprep.subr.bf16.mxu1 %v7088_v47  ;;  %v7178_v46 = vld [vmem:[%s7544_s16 + $0x73c] ss:$48 sps:$4 sm:$0xff]  }
  0xbf   : > { %v7821_v47 = vld [vmem:[#allocation2 + $0x34] ss:$-24 sps:$4 sm:$0xff]  }
  0xc0   : > { %2860 = vmatpush1.bf16.msra.mxu0 %v7083_v48  ;;  %v7824_v48 = vld [vmem:[#allocation2 + $0x4] ss:$16 sps:$4 sm:$0xff]  }
  0xc1   : > { %2913 = vmatpush1.bf16.msra.mxu1 %v7086_v56  ;;  %2861 = vmatprep.subr.bf16.mxu0 %v7091_v58  ;;  %v7176_v56 = vld [vmem:[%s7544_s16 + $0x738] ss:$48 sps:$4 sm:$0xff]   ;;  %v7181_v58 = vld [vmem:[%s7544_s16 + $0xdc] ss:$48 sps:$4 sm:$0xff]  }
  0xc2   : > { %2914 = vmatprep.subr.bf16.mxu1 %v7094_v49  ;;  %v7184_v49 = vld [vmem:[%s7544_s16 + $0x6dc] ss:$48 sps:$4 sm:$0xff]  }
  0xc4   : > { %2862 = vmatpush1.bf16.msra.mxu0 %v7089_v50  ;;  %v7179_v50 = vld [vmem:[%s7544_s16 + $0xd8] ss:$48 sps:$4 sm:$0xff]  }
  0xc5   : > { %2915 = vmatpush1.bf16.msra.mxu1 %v7092_v51  ;;  %2863 = vmatprep.subr.bf16.mxu0 %v7097_v52  ;;  %v7182_v51 = vld [vmem:[%s7544_s16 + $0x6d8] ss:$48 sps:$4 sm:$0xff]   ;;  %v7187_v52 = vld [vmem:[%s7544_s16 + $0x7c] ss:$48 sps:$4 sm:$0xff]  }
  0xc6   : > { %2916 = vmatprep.subr.bf16.mxu1 %v7100_v53  ;;  %v7190_v53 = vld [vmem:[%s7544_s16 + $0x67c] ss:$48 sps:$4 sm:$0xff]  }
  0xc8   : > { %2864 = vmatpush1.bf16.msra.mxu0 %v7095_v54  ;;  %v7185_v54 = vld [vmem:[%s7544_s16 + $0x78] ss:$48 sps:$4 sm:$0xff]  }
  0xc9   : > { %2917 = vmatpush1.bf16.msra.mxu1 %v7098_v55  ;;  %2865 = vmatprep.subr.bf16.mxu0 %v7103_v57  ;;  %v7188_v55 = vld [vmem:[%s7544_s16 + $0x678] ss:$48 sps:$4 sm:$0xff]   ;;  %v7193_v57 = vld [vmem:[%s7544_s16 + $0x1c] ss:$48 sps:$4 sm:$0xff]  }
  0xca   : > { %2918 = vmatprep.subr.bf16.mxu1 %v7106_v59  ;;  %v7196_v59 = vld [vmem:[%s7544_s16 + $0x61c] ss:$48 sps:$4 sm:$0xff]  }
  0xcc   : > { %2866 = vmatpush2.bf16.msra.mxu0 %v7101_v60  ;;  %v7191_v60 = vld [vmem:[%s7544_s16 + $0x18] ss:$48 sps:$4 sm:$0xff]  }
  0xcd   : > { %2919 = vmatpush2.bf16.msra.mxu1 %v7104_v61  ;;  %2867 = vmatprep.subr.bf16.mxu0 %v7109_v62  ;;  %v7194_v61 = vld [vmem:[%s7544_s16 + $0x618] ss:$48 sps:$4 sm:$0xff]   ;;  %v7199_v62 = vld [vmem:[%s7544_s16 + $0x5bc] ss:$48 sps:$4 sm:$0xff]  }
  0xce   : > { %2920 = vmatprep.subr.bf16.mxu1 %v7112_v63  ;;  %v7202_v63 = vld [vmem:[%s7544_s16 + $0xbbc] ss:$48 sps:$4 sm:$0xff]  }
  0xd0   : > { %2868 = vmatpush2.bf16.msra.mxu0 %v7107_v0  ;;  %v7197_v0 = vld [vmem:[%s7544_s16 + $0x5b8] ss:$48 sps:$4 sm:$0xff]  }
  0xd1   : > { %2921 = vmatpush2.bf16.msra.mxu1 %v7110_v1  ;;  %2869 = vmatprep.subr.bf16.mxu0 %v7115_v2  ;;  %v7200_v1 = vld [vmem:[%s7544_s16 + $0xbb8] ss:$48 sps:$4 sm:$0xff]   ;;  %v7205_v2 = vld [vmem:[%s7544_s16 + $0x55c] ss:$48 sps:$4 sm:$0xff]  }
  0xd2   : > { %2922 = vmatprep.subr.bf16.mxu1 %v7118_v3  ;;  %v7208_v3 = vld [vmem:[%s7544_s16 + $0xb5c] ss:$48 sps:$4 sm:$0xff]  }
  0xd4   : > { %2870 = vmatpush2.bf16.msra.mxu0 %v7113_v4  ;;  %v7203_v4 = vld [vmem:[%s7544_s16 + $0x558] ss:$48 sps:$4 sm:$0xff]  }
  0xd5   : > { %2923 = vmatpush2.bf16.msra.mxu1 %v7116_v5  ;;  %2871 = vmatprep.subr.bf16.mxu0 %v7121_v6  ;;  %v7206_v5 = vld [vmem:[%s7544_s16 + $0xb58] ss:$48 sps:$4 sm:$0xff]   ;;  %v7211_v6 = vld [vmem:[%s7544_s16 + $0x4fc] ss:$48 sps:$4 sm:$0xff]  }
  0xd6   : > { %2924 = vmatprep.subr.bf16.mxu1 %v7124_v7  ;;  %v7214_v7 = vld [vmem:[%s7544_s16 + $0xafc] ss:$48 sps:$4 sm:$0xff]  }
  0xd8   : > { %2872 = vmatpush2.bf16.msra.mxu0 %v7119_v8  ;;  %v7209_v8 = vld [vmem:[%s7544_s16 + $0x4f8] ss:$48 sps:$4 sm:$0xff]  }
  0xd9   : > { %2925 = vmatpush2.bf16.msra.mxu1 %v7122_v9  ;;  %2873 = vmatprep.subr.bf16.mxu0 %v7127_v12  ;;  %v7212_v9 = vld [vmem:[%s7544_s16 + $0xaf8] ss:$48 sps:$4 sm:$0xff]   ;;  %v7217_v12 = vld [vmem:[%s7544_s16 + $0x49c] ss:$48 sps:$4 sm:$0xff]  }
  0xda   : > { %2926 = vmatprep.subr.bf16.mxu1 %v7130_v13  ;;  %v7220_v13 = vld [vmem:[%s7544_s16 + $0xa9c] ss:$48 sps:$4 sm:$0xff]  }
  0xdc   : > { %2874 = vmatpush2.bf16.msra.mxu0 %v7125_v14  ;;  %v7215_v14 = vld [vmem:[%s7544_s16 + $0x498] ss:$48 sps:$4 sm:$0xff]  }
  0xdd   : > { %2927 = vmatpush2.bf16.msra.mxu1 %v7128_v15  ;;  %2875 = vmatprep.subr.bf16.mxu0 %v7133_v16  ;;  %v7218_v15 = vld [vmem:[%s7544_s16 + $0xa98] ss:$48 sps:$4 sm:$0xff]   ;;  %v7223_v16 = vld [vmem:[%s7544_s16 + $0x43c] ss:$48 sps:$4 sm:$0xff]  }
  0xde   : > { %2928 = vmatprep.subr.bf16.mxu1 %v7136_v17  ;;  %v7226_v17 = vld [vmem:[%s7544_s16 + $0xa3c] ss:$48 sps:$4 sm:$0xff]  }
  0xe0   : > { %2876 = vmatpush2.bf16.msra.mxu0 %v7131_v18  ;;  %v7221_v18 = vld [vmem:[%s7544_s16 + $0x438] ss:$48 sps:$4 sm:$0xff]  }
  0xe1   : > { %2929 = vmatpush2.bf16.msra.mxu1 %v7134_v19  ;;  %2877 = vmatprep.subr.bf16.mxu0 %v7139_v22  ;;  %v7224_v19 = vld [vmem:[%s7544_s16 + $0xa38] ss:$48 sps:$4 sm:$0xff]   ;;  %v7229_v22 = vld [vmem:[%s7544_s16 + $0x3dc] ss:$48 sps:$4 sm:$0xff]  }
  0xe2   : > { %2930 = vmatprep.subr.bf16.mxu1 %v7142_v23  ;;  %v7232_v23 = vld [vmem:[%s7544_s16 + $0x9dc] ss:$48 sps:$4 sm:$0xff]  }
  0xe4   : > { %2878 = vmatpush2.bf16.msra.mxu0 %v7137_v24  ;;  %v7227_v24 = vld [vmem:[%s7544_s16 + $0x3d8] ss:$48 sps:$4 sm:$0xff]  }
  0xe5   : > { %2931 = vmatpush2.bf16.msra.mxu1 %v7140_v25  ;;  %2879 = vmatprep.subr.bf16.mxu0 %v7145_v28  ;;  %v7230_v25 = vld [vmem:[%s7544_s16 + $0x9d8] ss:$48 sps:$4 sm:$0xff]   ;;  %v7235_v28 = vld [vmem:[%s7544_s16 + $0x37c] ss:$48 sps:$4 sm:$0xff]  }
  0xe6   : > { %2932 = vmatprep.subr.bf16.mxu1 %v7148_v29  ;;  %v7238_v29 = vld [vmem:[%s7544_s16 + $0x97c] ss:$48 sps:$4 sm:$0xff]  }
  0xe8   : > { %2880 = vmatpush2.bf16.msra.mxu0 %v7143_v30  ;;  %v7233_v30 = vld [vmem:[%s7544_s16 + $0x378] ss:$48 sps:$4 sm:$0xff]  }
  0xe9   : > { %2933 = vmatpush2.bf16.msra.mxu1 %v7146_v31  ;;  %2955 = vmatprep.subr.bf16.mxu0 %v7151_v32  ;;  %v7236_v31 = vld [vmem:[%s7544_s16 + $0x978] ss:$48 sps:$4 sm:$0xff]   ;;  %v7241_v32 = vld [vmem:[%s7544_s16 + $0x31c] ss:$48 sps:$4 sm:$0xff]  }
  0xea   : > { %3008 = vmatprep.subr.bf16.mxu1 %v7154_v33  ;;  %v7244_v33 = vld [vmem:[%s7544_s16 + $0x91c] ss:$48 sps:$4 sm:$0xff]  }
  0xeb   : > { %2882 = vmatmul.mubr.bf16.vlgmr.msra.gmra.mxu0 %v7641_v10  ;;  %v7161_v10 = vld [vmem:[%s7544_s16 + $0x1f8] ss:$48 sps:$4 sm:$0xff]  }
  0xec   : > { %2935 = vmatmul.mubr.bf16.vlgmr.msra.gmra.mxu1 %v7643_v11  ;;  %2956 = vmatpush1.bf16.msra.mxu0 %v7149_v34  ;;  %v7164_v11 = vld [vmem:[%s7544_s16 + $0x7f8] ss:$48 sps:$4 sm:$0xff]  }
  0xed   : > { %3009 = vmatpush1.bf16.msra.mxu1 %v7152_v35  ;;  %2957 = vmatprep.subr.bf16.mxu0 %v7157_v36  ;;  %v7239_v34 = vld [vmem:[%s7544_s16 + $0x318] ss:$48 sps:$4 sm:$0xff]   ;;  %v7247_v36 = vld [vmem:[%s7544_s16 + $0x2c4] ss:$48 sps:$4 sm:$0xff]  }
  0xee   : > { %3010 = vmatprep.subr.bf16.mxu1 %v7160_v37  ;;  %2891 = vmatprep.mubr.bf16.mxu0 %v7651_v20  ;;  %v7242_v35 = vld [vmem:[%s7544_s16 + $0x918] ss:$48 sps:$4 sm:$0xff]   ;;  %v7250_v37 = vld [vmem:[%s7544_s16 + $0x8c4] ss:$48 sps:$4 sm:$0xff]  }
  0xef   : > { %2944 = vmatprep.mubr.bf16.mxu1 %v7653_v21  ;;  %v7170_v21 = vld [vmem:[%s7544_s16 + $0x798] ss:$48 sps:$4 sm:$0xff]  }
  0xf0   : > { %2958 = vmatpush1.bf16.msra.mxu0 %v7155_v38  ;;  %v7245_v38 = vld [vmem:[%s7544_s16 + $0x2c0] ss:$48 sps:$4 sm:$0xff]  }
  0xf1   : > { %3011 = vmatpush1.bf16.msra.mxu1 %v7158_v39  ;;  %2959 = vmatprep.subr.bf16.mxu0 %v7163_v40  ;;  %v7248_v39 = vld [vmem:[%s7544_s16 + $0x8c0] ss:$48 sps:$4 sm:$0xff]   ;;  %v7253_v40 = vld [vmem:[%s7544_s16 + $0x264] ss:$48 sps:$4 sm:$0xff]  }
  0xf2   : > { %3012 = vmatprep.subr.bf16.mxu1 %v7166_v41  ;;  %v7256_v41 = vld [vmem:[%s7544_s16 + $0x864] ss:$48 sps:$4 sm:$0xff]  }
  0xf3   : > { %2892 = vmatmul.mubr.bf16.gmra.mxu0 %v7663_v26 }
  0xf4   : > { %2945 = vmatmul.mubr.bf16.gmra.mxu1 %v7665_v27  ;;  %2960 = vmatpush1.bf16.msra.mxu0 %v7161_v10  ;;  %v7173_v27 = vld [vmem:[%s7544_s16 + $0x138] ss:$48 sps:$4 sm:$0xff]   ;;  %v3273_v10 = vlaneseq }
  0xf5   : > { %3013 = vmatpush1.bf16.msra.mxu1 %v7164_v11  ;;  %2961 = vmatprep.subr.bf16.mxu0 %v7169_v42 }
  0xf6   : > { %3014 = vmatprep.subr.bf16.mxu1 %v7172_v43  ;;  %2987 = vmatprep.mubr.bf16.mxu0 %v7821_v47  ;;  %v7879_v43 = vld [vmem:[#allocation2 + $0x30] ss:$-24 sps:$4 sm:$0xff]  }
  0xf7   : > { %3040 = vmatprep.mubr.bf16.mxu1 %v7824_v48 }
  0xf8   : > { %2962 = vmatpush1.bf16.msra.mxu0 %v7167_v44  ;;  %v7882_v44 = vld [vmem:[#allocation2] ss:$16 sps:$4 sm:$0xff]  }
  0xf9   : > { %3015 = vmatpush1.bf16.msra.mxu1 %v7170_v21  ;;  %2963 = vmatprep.subr.bf16.mxu0 %v7175_v45  ;;  %v7251_v45 = vld [vmem:[%s7544_s16 + $0x260] ss:$48 sps:$4 sm:$0xff]  }
  0xfa   : > { %3016 = vmatprep.subr.bf16.mxu1 %v7178_v46  ;;  %v7254_v46 = vld [vmem:[%s7544_s16 + $0x860] ss:$48 sps:$4 sm:$0xff]  }
  0xfc   : > { %2964 = vmatpush1.bf16.msra.mxu0 %v7173_v27 }
  0xfd   : > { %3017 = vmatpush1.bf16.msra.mxu1 %v7176_v56  ;;  %2965 = vmatprep.subr.bf16.mxu0 %v7181_v58  ;;  %v7259_v58 = vld [vmem:[%s7544_s16 + $0x204] ss:$48 sps:$4 sm:$0xff]  }
  0xfe   : > { %3018 = vmatprep.subr.bf16.mxu1 %v7184_v49  ;;  %v7262_v49 = vld [vmem:[%s7544_s16 + $0x804] ss:$48 sps:$4 sm:$0xff]  }
 0x100   : > { %2966 = vmatpush1.bf16.msra.mxu0 %v7179_v50  ;;  %v7891_v50 = vshrl.u32 %v3273_v10, 7 }
 0x101   : > { %3019 = vmatpush1.bf16.msra.mxu1 %v7182_v51  ;;  %2967 = vmatprep.subr.bf16.mxu0 %v7187_v52  ;;  %v7896_v52 = vld [vmem:[#allocation2 + $0x24] ss:$24 sps:$4 sm:$0xff]  }
 0x102   : > { %3020 = vmatprep.subr.bf16.mxu1 %v7190_v53  ;;  %vm3366_vm0 = vcmp.lt.s32.totalorder %v7891_v50, 7  ;;  %vm3431_vm3 = vcmp.lt.s32.totalorder %v7891_v50, 1 }
 0x104   : > { %2968 = vmatpush1.bf16.msra.mxu0 %v7185_v54 }
 0x105   : > { %3021 = vmatpush1.bf16.msra.mxu1 %v7188_v55  ;;  %2969 = vmatprep.subr.bf16.mxu0 %v7193_v57  ;;  %v7257_v57 = vld [vmem:[%s7544_s16 + $0x200] ss:$48 sps:$4 sm:$0xff]  }
 0x106   : > { %3022 = vmatprep.subr.bf16.mxu1 %v7196_v59  ;;  %v7260_v59 = vld [vmem:[%s7544_s16 + $0x800] ss:$48 sps:$4 sm:$0xff]  }
 0x108   : > { %2970 = vmatpush1.bf16.msra.mxu0 %v7191_v60 }
 0x109   : > { %3023 = vmatpush1.bf16.msra.mxu1 %v7194_v61  ;;  %2971 = vmatprep.subr.bf16.mxu0 %v7199_v62  ;;  %v7265_v62 = vld [vmem:[%s7544_s16 + $0x1a4] ss:$48 sps:$4 sm:$0xff]  }
 0x10a   : > { %3024 = vmatprep.subr.bf16.mxu1 %v7202_v63  ;;  %v7268_v63 = vld [vmem:[%s7544_s16 + $0x7a4] ss:$48 sps:$4 sm:$0xff]  }
 0x10c   : > { %2972 = vmatpush2.bf16.msra.mxu0 %v7197_v0 }
 0x10d   : > { %3025 = vmatpush2.bf16.msra.mxu1 %v7200_v1  ;;  %2973 = vmatprep.subr.bf16.mxu0 %v7205_v2 }
 0x10e   : > { %3026 = vmatprep.subr.bf16.mxu1 %v7208_v3 }
 0x110   : > { %2974 = vmatpush2.bf16.msra.mxu0 %v7203_v4 }
 0x111   : > { %3027 = vmatpush2.bf16.msra.mxu1 %v7206_v5  ;;  %2975 = vmatprep.subr.bf16.mxu0 %v7211_v6  ;;  %v7906_v5 = vld [vmem:[#allocation2 + $0x20] ss:$24 sps:$4 sm:$0xff]  }
 0x112   : > { %3028 = vmatprep.subr.bf16.mxu1 %v7214_v7 }
 0x114   : > { %2976 = vmatpush2.bf16.msra.mxu0 %v7209_v8 }
 0x115   : > { %3029 = vmatpush2.bf16.msra.mxu1 %v7212_v9  ;;  %2977 = vmatprep.subr.bf16.mxu0 %v7217_v12  ;;  %v7263_v9 = vld [vmem:[%s7544_s16 + $0x1a0] ss:$48 sps:$4 sm:$0xff]  }
 0x116   : > { %3030 = vmatprep.subr.bf16.mxu1 %v7220_v13  ;;  %v7266_v12 = vld [vmem:[%s7544_s16 + $0x7a0] ss:$48 sps:$4 sm:$0xff]  }
 0x118   : > { %2978 = vmatpush2.bf16.msra.mxu0 %v7215_v14 }
 0x119   : > { %3031 = vmatpush2.bf16.msra.mxu1 %v7218_v15  ;;  %2979 = vmatprep.subr.bf16.mxu0 %v7223_v16  ;;  %v7271_v16 = vld [vmem:[%s7544_s16 + $0x144] ss:$48 sps:$4 sm:$0xff]  }
 0x11a   : > { %3032 = vmatprep.subr.bf16.mxu1 %v7226_v17  ;;  %v7274_v17 = vld [vmem:[%s7544_s16 + $0x744] ss:$48 sps:$4 sm:$0xff]  }
 0x11c   : > { %2980 = vmatpush2.bf16.msra.mxu0 %v7221_v18 }
 0x11d   : > { %3033 = vmatpush2.bf16.msra.mxu1 %v7224_v19  ;;  %2981 = vmatprep.subr.bf16.mxu0 %v7229_v22 }
 0x11e   : > { %3034 = vmatprep.subr.bf16.mxu1 %v7232_v23 }
 0x120   : > { %2982 = vmatpush2.bf16.msra.mxu0 %v7227_v24 }
 0x121   : > { %3035 = vmatpush2.bf16.msra.mxu1 %v7230_v25  ;;  %2983 = vmatprep.subr.bf16.mxu0 %v7235_v28 }
 0x122   : > { %3036 = vmatprep.subr.bf16.mxu1 %v7238_v29  ;;  %v7269_v29 = vld [vmem:[%s7544_s16 + $0x140] ss:$48 sps:$4 sm:$0xff]  }
 0x124   : > { %2984 = vmatpush2.bf16.msra.mxu0 %v7233_v30  ;;  %v7272_v30 = vld [vmem:[%s7544_s16 + $0x740] ss:$48 sps:$4 sm:$0xff]  }
 0x125   : > { %3037 = vmatpush2.bf16.msra.mxu1 %v7236_v31  ;;  %2985 = vmatprep.subr.bf16.mxu0 %v7241_v32 }
 0x126   : > { %3038 = vmatprep.subr.bf16.mxu1 %v7244_v33 }
 0x128   : > { %2986 = vmatpush2.bf16.msra.mxu0 %v7239_v34  ;;  %v7277_v34 = vld [vmem:[%s7544_s16 + $0xe4] ss:$48 sps:$4 sm:$0xff]  }
 0x129   : > { %3039 = vmatpush2.bf16.msra.mxu1 %v7242_v35  ;;  %3061 = vmatprep.subr.bf16.mxu0 %v7247_v36  ;;  %v7280_v35 = vld [vmem:[%s7544_s16 + $0x6e4] ss:$48 sps:$4 sm:$0xff]  }
 0x12a   : > { %3114 = vmatprep.subr.bf16.mxu1 %v7250_v37 }
 0x12b   : > { %v2671_v11 = vpop.f32.mrf.mxu0  ;;  %2988 = vmatmul.mubr.bf16.vlgmr.msra.gmra.mxu0 %v7879_v43 }
 0x12c   : > { %v2724_v42 = vpop.f32.mrf.mxu1  ;;  %3041 = vmatmul.mubr.bf16.vlgmr.msra.gmra.mxu1 %v7882_v44  ;;  %3062 = vmatpush1.bf16.msra.mxu0 %v7245_v38 }
 0x12d   : > { %v7885_v21 = vadd.f32 %v2724_v42, %v2671_v11  ;;  %3115 = vmatpush1.bf16.msra.mxu1 %v7248_v39  ;;  %v2673_v27 = vpop.f32.mrf.mxu0  ;;  %3063 = vmatprep.subr.bf16.mxu0 %v7253_v40  ;;  %v7275_v40 = vld [vmem:[%s7544_s16 + $0xe0] ss:$48 sps:$4 sm:$0xff]   ;;  %v7283_v42 = vld [vmem:[%s7544_s16 + $0x84] ss:$48 sps:$4 sm:$0xff]  }
 0x12e   : > { %v2726_v56 = vpop.f32.mrf.mxu1  ;;  %3116 = vmatprep.subr.bf16.mxu1 %v7256_v41  ;;  %2997 = vmatprep.mubr.bf16.mxu0 %v7651_v20  ;;  %v7278_v41 = vld [vmem:[%s7544_s16 + $0x6e0] ss:$48 sps:$4 sm:$0xff]  }
 0x12f   : > { %v7893_v51 = vadd.f32 %v2726_v56, %v2673_v27  ;;  %3050 = vmatprep.mubr.bf16.mxu1 %v7896_v52  ;;  %v2675_v53 = vpop.f32.mrf.mxu0  ;;  %v3350_v0 = vrot.slane %v7885_v21, 1  ;;  %v7286_v21 = vld [vmem:[%s7544_s16 + $0x684] ss:$48 sps:$4 sm:$0xff]   ;;  %v7281_v27 = vld [vmem:[%s7544_s16 + $0x80] ss:$48 sps:$4 sm:$0xff]  }
 0x130   : > { %v2728_v54 = vpop.f32.mrf.mxu1  ;;  %3064 = vmatpush1.bf16.msra.mxu0 %v7251_v45  ;;  %v7284_v56 = vld [vmem:[%s7544_s16 + $0x680] ss:$48 sps:$4 sm:$0xff]  }
 0x131   : > { %v2729_v55 = vadd.f32 %v2728_v54, %v2675_v53  ;;  %3117 = vmatpush1.bf16.msra.mxu1 %v7254_v46  ;;  %v2677_v60 = vpop.f32.mrf.mxu0  ;;  %3065 = vmatprep.subr.bf16.mxu0 %v7259_v58  ;;  %v3351_v6 = vrot.slane %v7893_v51, 1  ;;  %v7289_v58 = vld [vmem:[%s7544_s16 + $0x24] ss:$48 sps:$4 sm:$0xff]   ;;  %v7287_v51 = vld [vmem:[%s7544_s16 + $0x20] ss:$48 sps:$4 sm:$0xff]  }
 0x132   : > { %v2730_v61 = vpop.f32.mrf.mxu1  ;;  %3118 = vmatprep.subr.bf16.mxu1 %v7262_v49  ;;  %v7292_v49 = vld [vmem:[%s7544_s16 + $0x624] ss:$48 sps:$4 sm:$0xff]   ;;  %v7290_v53 = vld [vmem:[%s7544_s16 + $0x620] ss:$48 sps:$4 sm:$0xff]  }
 0x133   : > { %v3354_v1 = vrot.slane %v2729_v55, 1  ;;  %v2731_v2 = vadd.f32 %v2730_v61, %v2677_v60  ;;  %v2681_v3 = vpop.f32.mrf.mxu0  ;;  %2998 = vmatmul.mubr.bf16.gmra.mxu0 %v7663_v26  ;;  %v7295_v54 = vld [vmem:[%s7544_s16 + $0x5c4] ss:$48 sps:$4 sm:$0xff]  }
 0x134   : > { %v2734_v4 = vpop.f32.mrf.mxu1  ;;  %3051 = vmatmul.mubr.bf16.gmra.mxu1 %v7906_v5  ;;  %3066 = vmatpush1.bf16.msra.mxu0 %v7257_v57  ;;  %v7298_v55 = vld [vmem:[%s7544_s16 + $0xbc4] ss:$48 sps:$4 sm:$0xff]   ;;  %v7293_v57 = vld [vmem:[%s7544_s16 + $0x5c0] ss:$48 sps:$4 sm:$0xff]  }
 0x135   : > { %v3355_v7 = vrot.slane %v2731_v2, 1  ;;  %v2735_v8 = vadd.f32 %v2734_v4, %v2681_v3  ;;  %3119 = vmatpush1.bf16.msra.mxu1 %v7260_v59  ;;  %v7914_v13 = vsel %vm3366_vm0, %v3350_v0, %v3354_v1  ;;  %v2683_v14 = vpop.f32.mrf.mxu0  ;;  %3067 = vmatprep.subr.bf16.mxu0 %v7265_v62  ;;  %v7296_v59 = vld [vmem:[%s7544_s16 + $0xbc0] ss:$48 sps:$4 sm:$0xff]   ;;  %v7301_v60 = vld [vmem:[%s7544_s16 + $0x564] ss:$48 sps:$4 sm:$0xff]  }
 0x136   : > { %v2736_v15 = vpop.f32.mrf.mxu1  ;;  %3120 = vmatprep.subr.bf16.mxu1 %v7268_v63  ;;  %3093 = vmatprep.mubr.bf16.mxu0 %v7821_v47  ;;  %v7304_v61 = vld [vmem:[%s7544_s16 + $0xb64] ss:$48 sps:$4 sm:$0xff]   ;;  %v7299_v62 = vld [vmem:[%s7544_s16 + $0x560] ss:$48 sps:$4 sm:$0xff]  }
 0x137   : > { %v3358_v18 = vrot.slane %v2735_v8, 1  ;;  %v2737_v19 = vadd.f32 %v2736_v15, %v2683_v14  ;;  %3146 = vmatprep.mubr.bf16.mxu1 %v7824_v48  ;;  %v7922_v22 = vsel %vm3366_vm0, %v3351_v6, %v3355_v7  ;;  %v2685_v23 = vpop.f32.mrf.mxu0  ;;  %v7302_v63 = vld [vmem:[%s7544_s16 + $0xb60] ss:$48 sps:$4 sm:$0xff]   ;;  %v7313_v4 = vld [vmem:[%s7544_s16 + $0x4a4] ss:$48 sps:$4 sm:$0xff]  }
 0x138   : > { %v2738_v24 = vpop.f32.mrf.mxu1  ;;  %3068 = vmatpush1.bf16.msra.mxu0 %v7263_v9  ;;  %v7305_v2 = vld [vmem:[%s7544_s16 + $0x500] ss:$48 sps:$4 sm:$0xff]   ;;  %v7319_v9 = vld [vmem:[%s7544_s16 + $0x444] ss:$48 sps:$4 sm:$0xff]  }
 0x139   : > { %v3359_v25 = vrot.slane %v2737_v19, 1  ;;  %v2739_v28 = vadd.f32 %v2738_v24, %v2685_v23  ;;  %3121 = vmatpush1.bf16.msra.mxu1 %v7266_v12  ;;  %v7928_v31 = vsel %vm3366_vm0, %v3354_v1, %v3358_v18  ;;  %v2687_v32 = vpop.f32.mrf.mxu0  ;;  %3069 = vmatprep.subr.bf16.mxu0 %v7271_v16  ;;  %v7310_v1 = vld [vmem:[%s7544_s16 + $0xb04] ss:$48 sps:$4 sm:$0xff]   ;;  %v7308_v3 = vld [vmem:[%s7544_s16 + $0xb00] ss:$48 sps:$4 sm:$0xff]  }
 0x13a   : > { %v2740_v33 = vpop.f32.mrf.mxu1  ;;  %3122 = vmatprep.subr.bf16.mxu1 %v7274_v17  ;;  %v7314_v8 = vld [vmem:[%s7544_s16 + $0xaa0] ss:$48 sps:$4 sm:$0xff]   ;;  %v7322_v12 = vld [vmem:[%s7544_s16 + $0xa44] ss:$48 sps:$4 sm:$0xff]  }
 0x13b   : > { %v3362_v36 = vrot.slane %v2739_v28, 1  ;;  %v2741_v37 = vadd.f32 %v2740_v33, %v2687_v32  ;;  %v7934_v38 = vsel %vm3366_vm0, %v3355_v7, %v3359_v25  ;;  %v7311_v7 = vld [vmem:[%s7544_s16 + $0x4a0] ss:$48 sps:$4 sm:$0xff]   ;;  %v7325_v16 = vld [vmem:[%s7544_s16 + $0x3e4] ss:$48 sps:$4 sm:$0xff]  }
 0x13c   : > { %3070 = vmatpush1.bf16.msra.mxu0 %v7269_v29  ;;  %v7317_v14 = vld [vmem:[%s7544_s16 + $0x440] ss:$48 sps:$4 sm:$0xff]   ;;  %v7328_v17 = vld [vmem:[%s7544_s16 + $0x9e4] ss:$48 sps:$4 sm:$0xff]  }
 0x13d   : > { %v3363_v39 = vrot.slane %v2741_v37, 1  ;;  %3123 = vmatpush1.bf16.msra.mxu1 %v7272_v30  ;;  %v7940_v10 = vsel %vm3366_vm0, %v3358_v18, %v3362_v36  ;;  %v7944_v11 = vsel %vm3366_vm0, %v3362_v36, %v3350_v0  ;;  %3071 = vmatprep.subr.bf16.mxu0 %v7277_v34  ;;  %v7307_v0 = vld [vmem:[%s7544_s16 + $0x504] ss:$48 sps:$4 sm:$0xff]   ;;  %v7320_v15 = vld [vmem:[%s7544_s16 + $0xa40] ss:$48 sps:$4 sm:$0xff]  }
 0x13e   : > { %3124 = vmatprep.subr.bf16.mxu1 %v7280_v35  ;;  %v7323_v18 = vld [vmem:[%s7544_s16 + $0x3e0] ss:$48 sps:$4 sm:$0xff]   ;;  %v7331_v23 = vld [vmem:[%s7544_s16 + $0x384] ss:$48 sps:$4 sm:$0xff]   ;;  %v7343_v34 = vld [vmem:[%s7544_s16 + $0x2cc] ss:$48 sps:$4 sm:$0xff]  }
 0x13f   : > { %v7950_v45 = vsel %vm3366_vm0, %v3359_v25, %v3363_v39  ;;  %v7954_v46 = vsel %vm3366_vm0, %v3363_v39, %v3351_v6  ;;  %v7316_v6 = vld [vmem:[%s7544_s16 + $0xaa4] ss:$48 sps:$4 sm:$0xff]   ;;  %v7326_v19 = vld [vmem:[%s7544_s16 + $0x9e0] ss:$48 sps:$4 sm:$0xff]   ;;  %v7346_v35 = vld [vmem:[%s7544_s16 + $0x8cc] ss:$48 sps:$4 sm:$0xff]  }
 0x140   : > { %3072 = vmatpush1.bf16.msra.mxu0 %v7275_v40  ;;  %v7334_v24 = vld [vmem:[%s7544_s16 + $0x984] ss:$48 sps:$4 sm:$0xff]   ;;  %v7329_v25 = vld [vmem:[%s7544_s16 + $0x380] ss:$48 sps:$4 sm:$0xff]   ;;  %v7341_v36 = vld [vmem:[%s7544_s16 + $0x2c8] ss:$48 sps:$4 sm:$0xff]  }
 0x141   : > { %3125 = vmatpush1.bf16.msra.mxu1 %v7278_v41  ;;  %3073 = vmatprep.subr.bf16.mxu0 %v7283_v42  ;;  %v7332_v28 = vld [vmem:[%s7544_s16 + $0x980] ss:$48 sps:$4 sm:$0xff]   ;;  %v7337_v29 = vld [vmem:[%s7544_s16 + $0x324] ss:$48 sps:$4 sm:$0xff]   ;;  %v7344_v37 = vld [vmem:[%s7544_s16 + $0x8c8] ss:$48 sps:$4 sm:$0xff]  }
 0x142   : > { %3126 = vmatprep.subr.bf16.mxu1 %v7286_v21  ;;  %v7340_v30 = vld [vmem:[%s7544_s16 + $0x924] ss:$48 sps:$4 sm:$0xff]   ;;  %v7335_v32 = vld [vmem:[%s7544_s16 + $0x320] ss:$48 sps:$4 sm:$0xff]   ;;  %v7349_v39 = vld [vmem:[%s7544_s16 + $0x26c] ss:$48 sps:$4 sm:$0xff]  }
 0x143   : > { %v7338_v33 = vld [vmem:[%s7544_s16 + $0x920] ss:$48 sps:$4 sm:$0xff]   ;;  %v7352_v40 = vld [vmem:[%s7544_s16 + $0x86c] ss:$48 sps:$4 sm:$0xff]  }
 0x144   : > { %3074 = vmatpush1.bf16.msra.mxu0 %v7281_v27  ;;  %v7347_v27 = vld [vmem:[%s7544_s16 + $0x268] ss:$48 sps:$4 sm:$0xff]  }
 0x145   : > { %3127 = vmatpush1.bf16.msra.mxu1 %v7284_v56  ;;  %3075 = vmatprep.subr.bf16.mxu0 %v7289_v58  ;;  %v7350_v56 = vld [vmem:[%s7544_s16 + $0x868] ss:$48 sps:$4 sm:$0xff]  }
 0x146   : > { %3128 = vmatprep.subr.bf16.mxu1 %v7292_v49 }
 0x148   : > { %3076 = vmatpush1.bf16.msra.mxu0 %v7287_v51  ;;  %v7355_v51 = vld [vmem:[%s7544_s16 + $0x20c] ss:$48 sps:$4 sm:$0xff]  }
 0x149   : > { %3129 = vmatpush1.bf16.msra.mxu1 %v7290_v53  ;;  %3077 = vmatprep.subr.bf16.mxu0 %v7295_v54  ;;  %v7358_v53 = vld [vmem:[%s7544_s16 + $0x80c] ss:$48 sps:$4 sm:$0xff]  }
 0x14a   : > { %3130 = vmatprep.subr.bf16.mxu1 %v7298_v55 }
 0x14c   : > { %3078 = vmatpush2.bf16.msra.mxu0 %v7293_v57 }
 0x14d   : > { %3131 = vmatpush2.bf16.msra.mxu1 %v7296_v59  ;;  %3079 = vmatprep.subr.bf16.mxu0 %v7301_v60  ;;  %v7353_v60 = vld [vmem:[%s7544_s16 + $0x208] ss:$48 sps:$4 sm:$0xff]  }
 0x14e   : > { %3132 = vmatprep.subr.bf16.mxu1 %v7304_v61  ;;  %v7356_v61 = vld [vmem:[%s7544_s16 + $0x808] ss:$48 sps:$4 sm:$0xff]  }
 0x150   : > { %3080 = vmatpush2.bf16.msra.mxu0 %v7299_v62 }
 0x151   : > { %3133 = vmatpush2.bf16.msra.mxu1 %v7302_v63  ;;  %3081 = vmatprep.subr.bf16.mxu0 %v7307_v0  ;;  %v7361_v0 = vld [vmem:[%s7544_s16 + $0x1ac] ss:$48 sps:$4 sm:$0xff]  }
 0x152   : > { %3134 = vmatprep.subr.bf16.mxu1 %v7310_v1  ;;  %v7364_v1 = vld [vmem:[%s7544_s16 + $0x7ac] ss:$48 sps:$4 sm:$0xff]  }
 0x154   : > { %3082 = vmatpush2.bf16.msra.mxu0 %v7305_v2 }
 0x155   : > { %3135 = vmatpush2.bf16.msra.mxu1 %v7308_v3  ;;  %3083 = vmatprep.subr.bf16.mxu0 %v7313_v4 }
 0x156   : > { %3136 = vmatprep.subr.bf16.mxu1 %v7316_v6 }
 0x158   : > { %3084 = vmatpush2.bf16.msra.mxu0 %v7311_v7 }
 0x159   : > { %3137 = vmatpush2.bf16.msra.mxu1 %v7314_v8  ;;  %3085 = vmatprep.subr.bf16.mxu0 %v7319_v9 }
 0x15a   : > { %3138 = vmatprep.subr.bf16.mxu1 %v7322_v12 }
 0x15c   : > { %3086 = vmatpush2.bf16.msra.mxu0 %v7317_v14  ;;  %v7359_v14 = vld [vmem:[%s7544_s16 + $0x1a8] ss:$48 sps:$4 sm:$0xff]  }
 0x15d   : > { %3139 = vmatpush2.bf16.msra.mxu1 %v7320_v15  ;;  %3087 = vmatprep.subr.bf16.mxu0 %v7325_v16  ;;  %v7362_v15 = vld [vmem:[%s7544_s16 + $0x7a8] ss:$48 sps:$4 sm:$0xff]  }
 0x15e   : > { %3140 = vmatprep.subr.bf16.mxu1 %v7328_v17 }
 0x160   : > { %3088 = vmatpush2.bf16.msra.mxu0 %v7323_v18 }
 0x161   : > { %3141 = vmatpush2.bf16.msra.mxu1 %v7326_v19  ;;  %3089 = vmatprep.subr.bf16.mxu0 %v7331_v23  ;;  %v7367_v19 = vld [vmem:[%s7544_s16 + $0x14c] ss:$48 sps:$4 sm:$0xff]  }
 0x162   : > { %3142 = vmatprep.subr.bf16.mxu1 %v7334_v24  ;;  %v7370_v23 = vld [vmem:[%s7544_s16 + $0x74c] ss:$48 sps:$4 sm:$0xff]  }
 0x164   : > { %3090 = vmatpush2.bf16.msra.mxu0 %v7329_v25 }
 0x165   : > { %3143 = vmatpush2.bf16.msra.mxu1 %v7332_v28  ;;  %3091 = vmatprep.subr.bf16.mxu0 %v7337_v29 }
 0x166   : > { %3144 = vmatprep.subr.bf16.mxu1 %v7340_v30 }
 0x168   : > { %3092 = vmatpush2.bf16.msra.mxu0 %v7335_v32 }
 0x169   : > { %3145 = vmatpush2.bf16.msra.mxu1 %v7338_v33  ;;  %3167 = vmatprep.subr.bf16.mxu0 %v7343_v34  ;;  %v7365_v34 = vld [vmem:[%s7544_s16 + $0x148] ss:$48 sps:$4 sm:$0xff]  }
 0x16a   : > { %3220 = vmatprep.subr.bf16.mxu1 %v7346_v35  ;;  %v7368_v35 = vld [vmem:[%s7544_s16 + $0x748] ss:$48 sps:$4 sm:$0xff]  }
 0x16b   : > { %v2777_v41 = vpop.f32.mrf.mxu0  ;;  %3094 = vmatmul.mubr.bf16.vlgmr.msra.gmra.mxu0 %v7879_v43 }
 0x16c   : > { %v2830_v42 = vpop.f32.mrf.mxu1  ;;  %3147 = vmatmul.mubr.bf16.vlgmr.msra.gmra.mxu1 %v7882_v44  ;;  %3168 = vmatpush1.bf16.msra.mxu0 %v7341_v36 }
 0x16d   : > { %v8002_v21 = vadd.f32 %v2830_v42, %v2777_v41  ;;  %3221 = vmatpush1.bf16.msra.mxu1 %v7344_v37  ;;  %v2779_v58 = vpop.f32.mrf.mxu0  ;;  %3169 = vmatprep.subr.bf16.mxu0 %v7349_v39  ;;  %v7373_v37 = vld [vmem:[%s7544_s16 + $0xec] ss:$48 sps:$4 sm:$0xff]  }
 0x16e   : > { %v2832_v49 = vpop.f32.mrf.mxu1  ;;  %3222 = vmatprep.subr.bf16.mxu1 %v7352_v40  ;;  %3103 = vmatprep.mubr.bf16.mxu0 %v7651_v20  ;;  %v7376_v39 = vld [vmem:[%s7544_s16 + $0x6ec] ss:$48 sps:$4 sm:$0xff]  }
 0x16f   : > { %v8008_v54 = vadd.f32 %v2832_v49, %v2779_v58  ;;  %3156 = vmatprep.mubr.bf16.mxu1 %v7896_v52  ;;  %v2781_v55 = vpop.f32.mrf.mxu0  ;;  %v3352_v2 = vrot.slane %v8002_v21, 1 }
 0x170   : > { %v2834_v57 = vpop.f32.mrf.mxu1  ;;  %3170 = vmatpush1.bf16.msra.mxu0 %v7347_v27  ;;  %v7371_v27 = vld [vmem:[%s7544_s16 + $0xe8] ss:$48 sps:$4 sm:$0xff]  }
 0x171   : > { %v2835_v59 = vadd.f32 %v2834_v57, %v2781_v55  ;;  %3223 = vmatpush1.bf16.msra.mxu1 %v7350_v56  ;;  %v2783_v62 = vpop.f32.mrf.mxu0  ;;  %3171 = vmatprep.subr.bf16.mxu0 %v7355_v51  ;;  %v3353_v8 = vrot.slane %v8008_v54, 1  ;;  %v7374_v56 = vld [vmem:[%s7544_s16 + $0x6e8] ss:$48 sps:$4 sm:$0xff]   ;;  %v7379_v51 = vld [vmem:[%s7544_s16 + $0x8c] ss:$48 sps:$4 sm:$0xff]  }
 0x172   : > { %v2836_v63 = vpop.f32.mrf.mxu1  ;;  %3224 = vmatprep.subr.bf16.mxu1 %v7358_v53  ;;  %v7382_v53 = vld [vmem:[%s7544_s16 + $0x68c] ss:$48 sps:$4 sm:$0xff]   ;;  %v7377_v57 = vld [vmem:[%s7544_s16 + $0x88] ss:$48 sps:$4 sm:$0xff]  }
 0x173   : > { %v3356_v3 = vrot.slane %v2835_v59, 1  ;;  %v2837_v4 = vadd.f32 %v2836_v63, %v2783_v62  ;;  %v2787_v6 = vpop.f32.mrf.mxu0  ;;  %3104 = vmatmul.mubr.bf16.gmra.mxu0 %v7663_v26  ;;  %v7380_v59 = vld [vmem:[%s7544_s16 + $0x688] ss:$48 sps:$4 sm:$0xff]  }
 0x174   : > { %v2840_v7 = vpop.f32.mrf.mxu1  ;;  %3157 = vmatmul.mubr.bf16.gmra.mxu1 %v7906_v5  ;;  %3172 = vmatpush1.bf16.msra.mxu0 %v7353_v60  ;;  %v7385_v60 = vld [vmem:[%s7544_s16 + $0x2c] ss:$48 sps:$4 sm:$0xff]   ;;  %v7383_v62 = vld [vmem:[%s7544_s16 + $0x28] ss:$48 sps:$4 sm:$0xff]  }
 0x175   : > { %v3357_v9 = vrot.slane %v2837_v4, 1  ;;  %v2841_v12 = vadd.f32 %v2840_v7, %v2787_v6  ;;  %3225 = vmatpush1.bf16.msra.mxu1 %v7356_v61  ;;  %v8024_v16 = vsel %vm3366_vm0, %v3352_v2, %v3356_v3  ;;  %v2789_v17 = vpop.f32.mrf.mxu0  ;;  %3173 = vmatprep.subr.bf16.mxu0 %v7361_v0  ;;  %v7388_v61 = vld [vmem:[%s7544_s16 + $0x62c] ss:$48 sps:$4 sm:$0xff]   ;;  %v7386_v63 = vld [vmem:[%s7544_s16 + $0x628] ss:$48 sps:$4 sm:$0xff]  }
 0x176   : > { %v2842_v18 = vpop.f32.mrf.mxu1  ;;  %3226 = vmatprep.subr.bf16.mxu1 %v7364_v1  ;;  %3199 = vmatprep.mubr.bf16.mxu0 %v7821_v47  ;;  %v7391_v0 = vld [vmem:[%s7544_s16 + $0x5cc] ss:$48 sps:$4 sm:$0xff]   ;;  %v7395_v7 = vld [vmem:[%s7544_s16 + $0x568] ss:$48 sps:$4 sm:$0xff]  }
 0x177   : > { %v3360_v24 = vrot.slane %v2841_v12, 1  ;;  %v2843_v25 = vadd.f32 %v2842_v18, %v2789_v17  ;;  %3252 = vmatprep.mubr.bf16.mxu1 %v7824_v48  ;;  %v8032_v28 = vsel %vm3366_vm0, %v3353_v8, %v3357_v9  ;;  %v2791_v29 = vpop.f32.mrf.mxu0  ;;  %v7394_v1 = vld [vmem:[%s7544_s16 + $0xbcc] ss:$48 sps:$4 sm:$0xff]  }
 0x178   : > { %9580 = vst [vmem:[#allocation10_spill] sm:$0xff] %v8032_v28  ;;  %v2844_v30 = vpop.f32.mrf.mxu1  ;;  %3174 = vmatpush1.bf16.msra.mxu0 %v7359_v14  ;;  %v7397_v4 = vld [vmem:[%s7544_s16 + $0x56c] ss:$48 sps:$4 sm:$0xff]   ;;  %v7401_v14 = vld [vmem:[%s7544_s16 + $0x508] ss:$48 sps:$4 sm:$0xff]  }
 0x179   : > { %v3361_v32 = vrot.slane %v2843_v25, 1  ;;  %v2845_v33 = vadd.f32 %v2844_v30, %v2791_v29  ;;  %3227 = vmatpush1.bf16.msra.mxu1 %v7362_v15  ;;  %v8038_v47 = vsel %vm3366_vm0, %v3356_v3, %v3360_v24  ;;  %v2793_v48 = vpop.f32.mrf.mxu0  ;;  %3175 = vmatprep.subr.bf16.mxu0 %v7367_v19  ;;  %v7392_v3 = vld [vmem:[%s7544_s16 + $0xbc8] ss:$48 sps:$4 sm:$0xff]   ;;  %v7400_v6 = vld [vmem:[%s7544_s16 + $0xb6c] ss:$48 sps:$4 sm:$0xff]  }
 0x17a   : > { %v2846_v36 = vpop.f32.mrf.mxu1  ;;  %3228 = vmatprep.subr.bf16.mxu1 %v7370_v23  ;;  %v7406_v12 = vld [vmem:[%s7544_s16 + $0xb0c] ss:$48 sps:$4 sm:$0xff]   ;;  %v7404_v15 = vld [vmem:[%s7544_s16 + $0xb08] ss:$48 sps:$4 sm:$0xff]  }
 0x17b   : > { %v3364_v40 = vrot.slane %v2845_v33, 1  ;;  %v2847_v41 = vadd.f32 %v2846_v36, %v2793_v48  ;;  %v8044_v42 = vsel %vm3366_vm0, %v3357_v9, %v3361_v32  ;;  %v7403_v9 = vld [vmem:[%s7544_s16 + $0x50c] ss:$48 sps:$4 sm:$0xff]   ;;  %v7407_v19 = vld [vmem:[%s7544_s16 + $0x4a8] ss:$48 sps:$4 sm:$0xff]  }
 0x17c   : > { %3176 = vmatpush1.bf16.msra.mxu0 %v7365_v34  ;;  %v7409_v17 = vld [vmem:[%s7544_s16 + $0x4ac] ss:$48 sps:$4 sm:$0xff]   ;;  %v7410_v23 = vld [vmem:[%s7544_s16 + $0xaa8] ss:$48 sps:$4 sm:$0xff]  }
 0x17d   : > { %v3365_v21 = vrot.slane %v2847_v41, 1  ;;  %3229 = vmatpush1.bf16.msra.mxu1 %v7368_v35  ;;  %v8050_v58 = vsel %vm3366_vm0, %v3360_v24, %v3364_v40  ;;  %v8054_v49 = vsel %vm3366_vm0, %v3364_v40, %v3352_v2  ;;  %3177 = vmatprep.subr.bf16.mxu0 %v7373_v37  ;;  %v7389_v2 = vld [vmem:[%s7544_s16 + $0x5c8] ss:$48 sps:$4 sm:$0xff]   ;;  %v7412_v18 = vld [vmem:[%s7544_s16 + $0xaac] ss:$48 sps:$4 sm:$0xff]  }
 0x17e   : > { %3230 = vmatprep.subr.bf16.mxu1 %v7376_v39  ;;  %v7415_v24 = vld [vmem:[%s7544_s16 + $0x44c] ss:$48 sps:$4 sm:$0xff]   ;;  %v7413_v29 = vld [vmem:[%s7544_s16 + $0x448] ss:$48 sps:$4 sm:$0xff]  }
 0x17f   : > { %v8060_v54 = vsel %vm3366_vm0, %v3361_v32, %v3365_v21  ;;  %v8064_v55 = vsel %vm3366_vm0, %v3365_v21, %v3353_v8  ;;  %v7398_v8 = vld [vmem:[%s7544_s16 + $0xb68] ss:$48 sps:$4 sm:$0xff]   ;;  %v7418_v25 = vld [vmem:[%s7544_s16 + $0xa4c] ss:$48 sps:$4 sm:$0xff]  }
 0x180   : > { %9581 = vst [vmem:[#allocation11_spill] sm:$0xff] %v8064_v55  ;;  %3178 = vmatpush1.bf16.msra.mxu0 %v7371_v27  ;;  %v7416_v30 = vld [vmem:[%s7544_s16 + $0xa48] ss:$48 sps:$4 sm:$0xff]   ;;  %v7421_v32 = vld [vmem:[%s7544_s16 + $0x3ec] ss:$48 sps:$4 sm:$0xff]  }
 0x181   : > { %3231 = vmatpush1.bf16.msra.mxu1 %v7374_v56  ;;  %3179 = vmatprep.subr.bf16.mxu0 %v7379_v51  ;;  %v7424_v33 = vld [vmem:[%s7544_s16 + $0x9ec] ss:$48 sps:$4 sm:$0xff]   ;;  %v7419_v34 = vld [vmem:[%s7544_s16 + $0x3e8] ss:$48 sps:$4 sm:$0xff]  }
 0x182   : > { %3232 = vmatprep.subr.bf16.mxu1 %v7382_v53  ;;  %v7422_v35 = vld [vmem:[%s7544_s16 + $0x9e8] ss:$48 sps:$4 sm:$0xff]   ;;  %v7427_v48 = vld [vmem:[%s7544_s16 + $0x38c] ss:$48 sps:$4 sm:$0xff]  }
 0x183   : > { %v7430_v36 = vld [vmem:[%s7544_s16 + $0x98c] ss:$48 sps:$4 sm:$0xff]   ;;  %v7425_v37 = vld [vmem:[%s7544_s16 + $0x388] ss:$48 sps:$4 sm:$0xff]  }
 0x184   : > { %3180 = vmatpush1.bf16.msra.mxu0 %v7377_v57  ;;  %v7428_v39 = vld [vmem:[%s7544_s16 + $0x988] ss:$48 sps:$4 sm:$0xff]   ;;  %v7433_v40 = vld [vmem:[%s7544_s16 + $0x32c] ss:$48 sps:$4 sm:$0xff]  }
 0x185   : > { %3233 = vmatpush1.bf16.msra.mxu1 %v7380_v59  ;;  %3181 = vmatprep.subr.bf16.mxu0 %v7385_v60  ;;  %v7436_v41 = vld [vmem:[%s7544_s16 + $0x92c] ss:$48 sps:$4 sm:$0xff]   ;;  %v7431_v21 = vld [vmem:[%s7544_s16 + $0x328] ss:$48 sps:$4 sm:$0xff]  }
 0x186   : > { %3234 = vmatprep.subr.bf16.mxu1 %v7388_v61  ;;  %v7434_v27 = vld [vmem:[%s7544_s16 + $0x928] ss:$48 sps:$4 sm:$0xff]  }
 0x188   : > { %3182 = vmatpush1.bf16.msra.mxu0 %v7383_v62 }
 0x189   : > { %3235 = vmatpush1.bf16.msra.mxu1 %v7386_v63  ;;  %3183 = vmatprep.subr.bf16.mxu0 %v7391_v0 }
 0x18a   : > { %3236 = vmatprep.subr.bf16.mxu1 %v7394_v1 }
 0x18c   : > { %3184 = vmatpush2.bf16.msra.mxu0 %v7389_v2 }
 0x18d   : > { %3237 = vmatpush2.bf16.msra.mxu1 %v7392_v3  ;;  %3185 = vmatprep.subr.bf16.mxu0 %v7397_v4 }
 0x18e   : > { %3238 = vmatprep.subr.bf16.mxu1 %v7400_v6 }
 0x190   : > { %3186 = vmatpush2.bf16.msra.mxu0 %v7395_v7 }
 0x191   : > { %3239 = vmatpush2.bf16.msra.mxu1 %v7398_v8  ;;  %3187 = vmatprep.subr.bf16.mxu0 %v7403_v9 }
 0x192   : > { %3240 = vmatprep.subr.bf16.mxu1 %v7406_v12 }
 0x194   : > { %3188 = vmatpush2.bf16.msra.mxu0 %v7401_v14 }
 0x195   : > { %3241 = vmatpush2.bf16.msra.mxu1 %v7404_v15  ;;  %3189 = vmatprep.subr.bf16.mxu0 %v7409_v17 }
 0x196   : > { %3242 = vmatprep.subr.bf16.mxu1 %v7412_v18 }
 0x198   : > { %3190 = vmatpush2.bf16.msra.mxu0 %v7407_v19  ;;  %v3275_v19 = vadd.s32 8, %v7891_v50 }
 0x199   : > { %3243 = vmatpush2.bf16.msra.mxu1 %v7410_v23  ;;  %3191 = vmatprep.subr.bf16.mxu0 %v7415_v24  ;;  %v3277_v23 = vadd.s32 24, %v7891_v50 }
 0x19a   : > { %3244 = vmatprep.subr.bf16.mxu1 %v7418_v25 }
 0x19c   : > { %3192 = vmatpush2.bf16.msra.mxu0 %v7413_v29  ;;  %v3289_v29 = vand.u32 15, %v3275_v19 }
 0x19d   : > { %3245 = vmatpush2.bf16.msra.mxu1 %v7416_v30  ;;  %3193 = vmatprep.subr.bf16.mxu0 %v7421_v32  ;;  %v3303_v30 = vand.u32 15, %v3277_v23 }
 0x19e   : > { %3246 = vmatprep.subr.bf16.mxu1 %v7424_v33  ;;  %vm3327_vm1 = vcmp.lt.s32.totalorder %v3289_v29, 15 }
 0x19f   : > { %vm3329_vm2 = vcmp.lt.s32.totalorder %v3303_v30, 15 }
 0x1a0   : > { %3194 = vmatpush2.bf16.msra.mxu0 %v7419_v34 }
 0x1a1   : > { %3247 = vmatpush2.bf16.msra.mxu1 %v7422_v35  ;;  %3195 = vmatprep.subr.bf16.mxu0 %v7427_v48  ;;  %v3276_v48 = vadd.s32 16, %v7891_v50 }
 0x1a2   : > { %3248 = vmatprep.subr.bf16.mxu1 %v7430_v36  ;;  %v7476_v36 = vmov 0.0  }
 0x1a3   : > { %v8184_v19 = vsel %vm3329_vm2, 1.0, %v7476_v36 }
 0x1a4   : > { %3196 = vmatpush2.bf16.msra.mxu0 %v7425_v37  ;;  %v8174_v37 = vsel %vm3327_vm1, 1.0, %v7476_v36 }
 0x1a5   : > { %3249 = vmatpush2.bf16.msra.mxu1 %v7428_v39  ;;  %3197 = vmatprep.subr.bf16.mxu0 %v7433_v40  ;;  %v3388_v29 = vmul.f32 %v8174_v37, %v7934_v38 }
 0x1a6   : > { %3250 = vmatprep.subr.bf16.mxu1 %v7436_v41 }
 0x1a8   : > { %3198 = vmatpush2.bf16.msra.mxu0 %v7431_v21 }
 0x1a9   : > { %3251 = vmatpush2.bf16.msra.mxu1 %v7434_v27 }
 0x1ab   : > { %v2883_v56 = vpop.f32.mrf.mxu0  ;;  %3200 = vmatmul.mubr.bf16.vlgmr.msra.gmra.mxu0 %v7879_v43 }
 0x1ac   : > { %v2936_v51 = vpop.f32.mrf.mxu1  ;;  %3253 = vmatmul.mubr.bf16.vlgmr.msra.gmra.mxu1 %v7882_v44  ;;  %3209 = vmatprep.mubr.bf16.mxu0 %v7651_v20 }
 0x1ad   : > { %v2937_v53 = vadd.f32 %v2936_v51, %v2883_v56  ;;  %3262 = vmatprep.mubr.bf16.mxu1 %v7896_v52  ;;  %v8113_v59 = vpop.f32.mrf.mxu0  ;;  %v3296_v51 = vand.u32 15, %v3276_v48 }
 0x1ae   : > { %v8115_v60 = vpop.f32.mrf.mxu1 }
 0x1af   : > { %v8109_v57 = vadd.f32 %v7914_v13, %v2937_v53  ;;  %v2887_v61 = vpop.f32.mrf.mxu0  ;;  %v3387_v53 = vmul.f32 %v8174_v37, %v7928_v31  ;;  %v8195_v31 = vld [vmem:[%s3487_s17] ss:$2 sm:$0xf]  ;;  %vm3340_vm4 = vcmp.gt.s32.totalorder %v3296_v51, 0 }
 0x1b0   : > { %v2940_v43 = vpop.f32.mrf.mxu1  ;;  %v8214_v51 = vsel %vm3340_vm4, 1.0, %v7476_v36 }
 0x1b1   : > { %v8117_v62 = vpop.f32.mrf.mxu0  ;;  %v2941_v21 = vadd.f32 %v2940_v43, %v2887_v61  ;;  %v8192_v61 = vsub.s32 0, %v7891_v50 }
 0x1b2   : > { %v8119_v44 = vpop.f32.mrf.mxu1 }
 0x1b3   : > { %3210 = vmatmul.mubr.bf16.gmra.mxu0 %v7663_v26  ;;  %v8121_v20 = vpop.f32.mrf.mxu0  ;;  %9584 = vst [vmem:[#allocation14_spill] sm:$0xff] %v8192_v61  ;;  %v2943_v38 = vadd.f32 %v8119_v44, %v8117_v62  ;;  %v3493_v62 = vrot.slane %v8195_v31, %v8192_v61  ;;  %v8212_v44 = vsub.s32 1, %v7891_v50 }
 0x1b4   : > { %3263 = vmatmul.mubr.bf16.gmra.mxu1 %v7906_v5  ;;  %v2946_v52 = vpop.f32.mrf.mxu1 }
 0x1b5   : > { %v8123_v63 = vpop.f32.mrf.mxu0 }
 0x1b6   : > { %v8125_v13 = vpop.f32.mrf.mxu1 }
 0x1b7   : > { %v8127_v26 = vpop.f32.mrf.mxu0 }
 0x1b8   : > { %v8129_v5 = vpop.f32.mrf.mxu1 }
 0x1b9   : > { %v8131_v0 = vpop.f32.mrf.mxu0 }
 0x1ba   : > { %v8133_v1 = vpop.f32.mrf.mxu1 }
 0x1eb   : > { %v8135_v2 = vpop.f32.mrf.mxu0 }
 0x1ec   : > { %v8137_v3 = vpop.f32.mrf.mxu1 }
 0x1ed   : > { %v8139_v4 = vpop.f32.mrf.mxu0 }
 0x1ee   : > { %v8141_v6 = vpop.f32.mrf.mxu1 }
 0x1ef   : > { %v8143_v7 = vpop.f32.mrf.mxu0 }
 0x1f0   : > { %v8145_v8 = vpop.f32.mrf.mxu1 }
 0x1f1   : > { %v8147_v9 = vpop.f32.mrf.mxu0 }
 0x1f2   : > { %v8149_v12 = vpop.f32.mrf.mxu1 }
 0x1f3   : > { %v8151_v14 = vpop.f32.mrf.mxu0 }
 0x1f4   : > { %v8153_v15 = vpop.f32.mrf.mxu1 }
 0x1f5   : > { %v8155_v17 = vpop.f32.mrf.mxu0 }
 0x1f6   : > { %v8157_v18 = vpop.f32.mrf.mxu1 }
 0x1f7   : > { %v8161_v24 = vpop.f32.mrf.mxu0 }
 0x1f8   : > { %v8163_v25 = vpop.f32.mrf.mxu1 }
 0x1f9   : > { %v8166_v32 = vpop.f32.mrf.mxu0 }
 0x1fa   : > { %9582 = vst [vmem:[#allocation12_spill] sm:$0xff] %v8166_v32  ;;  %v8168_v33 = vpop.f32.mrf.mxu1  ;;  %v3404_v32 = vadd.f32 %v3388_v29, %v2943_v38 }
 0x1fb   : > { %9583 = vst [vmem:[#allocation13_spill] sm:$0xff] %v8168_v33 }
 0x22b   : > { %v3095_v34 = vpop.f32.mrf.mxu0 }
 0x22c   : > { %v3148_v35 = vpop.f32.mrf.mxu1 }
 0x22d   : > { %v3097_v39 = vpop.f32.mrf.mxu0  ;;  %v8176_v41 = vadd.f32 %v3148_v35, %v3095_v34 }
 0x22e   : > { %v3150_v40 = vpop.f32.mrf.mxu1 }
 0x22f   : > { %v3099_v27 = vpop.f32.mrf.mxu0  ;;  %v8188_v30 = vadd.f32 %v3150_v40, %v3097_v39  ;;  %v3415_v35 = vrot.slane %v8176_v41, 7  ;;  %v2947_v39 = vadd.f32 %v2946_v52, %v8121_v20  ;;  %v3395_v41 = vmul.f32 %v8184_v19, %v7944_v11 }
 0x230   : > { %v3152_v56 = vpop.f32.mrf.mxu1 }
 0x231   : > { %v3153_v23 = vadd.f32 %v3152_v56, %v3099_v27  ;;  %v3101_v43 = vpop.f32.mrf.mxu0  ;;  %v3282_v27 = vand.u32 15, %v7891_v50  ;;  %v3403_v56 = vadd.f32 %v3387_v53, %v2941_v21  ;;  %v3416_v21 = vrot.slane %v8188_v30, 7 }
 0x232   : > { %v3154_v34 = vpop.f32.mrf.mxu1 }
 0x233   : > { %v3419_v48 = vrot.slane %v3153_v23, 7  ;;  %v3155_v28 = vadd.f32 %v3154_v34, %v3101_v43  ;;  %v3105_v40 = vpop.f32.mrf.mxu0  ;;  %vm3338_vm5 = vcmp.gt.s32.totalorder %v3282_v27, 0 }
 0x234   : > { %v3158_v55 = vpop.f32.mrf.mxu1 }
 0x235   : > { %v3440_v23 = vsel %vm3431_vm3, %v3415_v35, %v3419_v48  ;;  %v3420_v43 = vrot.slane %v3155_v28, 7  ;;  %v3159_v34 = vadd.f32 %v3158_v55, %v3105_v40  ;;  %v3107_v20 = vpop.f32.mrf.mxu0  ;;  %v3407_v28 = vadd.f32 %v7940_v10, %v2947_v39 }
 0x236   : > { %v3468_v53 = vadd.f32 %v3440_v23, %v3403_v56  ;;  %v3160_v52 = vpop.f32.mrf.mxu1  ;;  %v2951_v55 = vadd.f32 %v8129_v5, %v8127_v26  ;;  %v2949_v23 = vadd.f32 %v8125_v13, %v8123_v63  ;;  %v3497_v10 = vrot.slane %v8195_v31, %v8212_v44 }
 0x237   : > { %v3423_v33 = vrot.slane %v3159_v34, 7  ;;  %v3161_v11 = vadd.f32 %v3160_v52, %v3107_v20  ;;  %v3441_v30 = vsel %vm3431_vm3, %v3416_v21, %v3420_v43  ;;  %v3109_v56 = vpop.f32.mrf.mxu0  ;;  %v8228_v5 = vsel %vm3338_vm5, 1.0, %v7476_v36 }
 0x238   : > { %v3162_v40 = vpop.f32.mrf.mxu1  ;;  %v3514_v29 = vadd.f32 %v3493_v62, %v3468_v53  ;;  %v3469_v52 = vadd.f32 %v3441_v30, %v3404_v32  ;;  %v8235_v53 = vstv %s8202_s18 }
 0x239   : > { %v3436_v34 = vsel %vm3431_vm3, %v3419_v48, %v3423_v33  ;;  %v3424_v20 = vrot.slane %v3161_v11, 7  ;;  %v3163_v27 = vadd.f32 %v3162_v40, %v3109_v56  ;;  %v3111_v38 = vpop.f32.mrf.mxu0  ;;  %v2939_v48 = vadd.f32 %v8115_v60, %v8113_v59 }
 0x23a   : > { %v3456_v26 = vmul.f32 %v8214_v51, %v3436_v34  ;;  %v3164_v39 = vpop.f32.mrf.mxu1  ;;  %v3411_v11 = vadd.f32 %v3395_v41, %v2951_v55  ;;  %v3408_v40 = vadd.f32 %v7950_v45, %v2949_v23  ;;  %v3548_v41 = vmul.f32 %v8235_v53, %v3514_v29 }
 0x23b   : > { %v3437_v63 = vsel %vm3431_vm3, %v3420_v43, %v3424_v20  ;;  %v3427_v13 = vrot.slane %v3163_v27, 7  ;;  %v3165_v61 = vadd.f32 %v3164_v39, %v3111_v38  ;;  %v2953_v43 = vadd.f32 %v8133_v1, %v8131_v0 }
 0x23c   : > { %v3472_v56 = vadd.f32 %v3456_v26, %v3407_v28  ;;  %v3457_v36 = vmul.f32 %v8214_v51, %v3437_v63  ;;  %v3515_v28 = vadd.f32 %v3497_v10, %v3469_v52  ;;  %v3396_v23 = vmul.f32 %v8184_v19, %v7954_v46 }
 0x23d   : > { %v3432_v34 = vsel %vm3431_vm3, %v3423_v33, %v3427_v13  ;;  %v3444_v32 = vsel %vm3431_vm3, %v3427_v13, %v3415_v35  ;;  %v3428_v45 = vrot.slane %v3165_v61, 7  ;;  %vm3531_vm6 = vcmp.ge.f32.partialorder %v3514_v29, 0.0 }
 0x23e   : > { %v3518_v30 = vadd.f32 %v3493_v62, %v3472_v56  ;;  %v3448_v59 = vmul.f32 %v8228_v5, %v3444_v32  ;;  %v3476_v60 = vadd.f32 %v3432_v34, %v3411_v11  ;;  %v3473_v55 = vadd.f32 %v3457_v36, %v3408_v40 }
 0x23f   : > { %v3433_v0 = vsel %vm3431_vm3, %v3424_v20, %v3428_v45  ;;  %v3445_v1 = vsel %vm3431_vm3, %v3428_v45, %v3416_v21  ;;  %v3412_v26 = vadd.f32 %v3396_v23, %v2953_v43  ;;  %v3400_v61 = vadd.f32 %v7922_v22, %v2939_v48 }
 0x240   : > { %v3464_v33 = vadd.f32 %v3448_v59, %v8109_v57  ;;  %v3522_v27 = vadd.f32 %v3493_v62, %v3476_v60  ;;  %v3552_v35 = vmul.f32 %v8235_v53, %v3518_v30  ;;  %vm3535_vm7 = vcmp.ge.f32.partialorder %v3518_v30, 0.0 }
 0x241   : > { %v3519_v38 = vadd.f32 %v3497_v10, %v3473_v55  ;;  %v8256_v52 = vsel %vm3531_vm6, %v3514_v29, %v3548_v41  ;;  %v3549_v46 = vmul.f32 %v8235_v53, %v3515_v28  ;;  %v3449_v57 = vmul.f32 %v8228_v5, %v3445_v1 }
 0x242   : > { %v3510_v39 = vadd.f32 %v3493_v62, %v3464_v33  ;;  %v3556_v20 = vmul.f32 %v8235_v53, %v3522_v27  ;;  %v3477_v13 = vadd.f32 %v3433_v0, %v3412_v26  ;;  %vm3532_vm9 = vcmp.ge.f32.partialorder %v3515_v28, 0.0 }
 0x243   : > { %v8262_v21 = vsel %vm3535_vm7, %v3518_v30, %v3552_v35  ;;  %vm3539_vm10 = vcmp.ge.f32.partialorder %v3522_v27, 0.0  ;;  %v3465_v11 = vadd.f32 %v3449_v57, %v3400_v61  ;;  %v3620_v22 = vmul.f32 %v8256_v52, %v8256_v52 }
 0x244   : > { %vm3527_vm8 = vcmp.ge.f32.partialorder %v3510_v39, 0.0  ;;  %v3544_v63 = vmul.f32 %v8235_v53, %v3510_v39  ;;  %v3553_v62 = vmul.f32 %v8235_v53, %v3519_v38  ;;  %v3523_v48 = vadd.f32 %v3497_v10, %v3477_v13 }
 0x245   : > { %vm3536_vm11 = vcmp.ge.f32.partialorder %v3519_v38, 0.0  ;;  %v3511_v36 = vadd.f32 %v3497_v10, %v3465_v11  ;;  %v8273_v34 = vsel %vm3532_vm9, %v3515_v28, %v3549_v46  ;;  %v3624_v32 = vmul.f32 %v8262_v21, %v8262_v21 }
 0x246   : > { %v8267_v29 = vsel %vm3527_vm8, %v3510_v39, %v3544_v63  ;;  %v8277_v43 = vsel %vm3539_vm10, %v3522_v27, %v3556_v20  ;;  %v3557_v30 = vmul.f32 %v8235_v53, %v3523_v48  ;;  %v8282_v55 = vsel %vm3536_vm11, %v3519_v38, %v3553_v62 }
 0x247   : > { %v3576_v56 = vadd.f32 %v8256_v52, %v8267_v29  ;;  %v3616_v40 = vmul.f32 %v8267_v29, %v8267_v29  ;;  %vm3528_vm12 = vcmp.ge.f32.partialorder %v3511_v36, 0.0  ;;  %v3545_v41 = vmul.f32 %v8235_v53, %v3511_v36 }
 0x248   : > { %vm3540_vm13 = vcmp.ge.f32.partialorder %v3523_v48, 0.0  ;;  %v3628_v28 = vmul.f32 %v8277_v43, %v8277_v43  ;;  %v3621_v33 = vmul.f32 %v8273_v34, %v8273_v34  ;;  %v3625_v38 = vmul.f32 %v8282_v55, %v8282_v55 }
 0x249   : > { %v3577_v59 = vadd.f32 %v3576_v56, %v8262_v21  ;;  %v3632_v60 = vadd.f32 %v3620_v22, %v3616_v40  ;;  %v8287_v23 = vsel %vm3528_vm12, %v3511_v36, %v3545_v41  ;;  %v8295_v26 = vsel %vm3540_vm13, %v3523_v48, %v3557_v30 }
 0x24a   : > { %v3585_v27 = vadd.f32 %v8273_v34, %v8287_v23  ;;  %v3617_v35 = vmul.f32 %v8287_v23, %v8287_v23  ;;  %v3629_v20 = vmul.f32 %v8295_v26, %v8295_v26 }
 0x24b   : > { %v3578_v10 = vadd.f32 %v3577_v59, %v8277_v43  ;;  %v3633_v45 = vadd.f32 %v3632_v60, %v3624_v32 }
 0x24c   : > { %v3586_v39 = vadd.f32 %v3585_v27, %v8282_v55  ;;  %v3641_v61 = vadd.f32 %v3621_v33, %v3617_v35 }
 0x24d   : > { %v3579_v0 = vrot.slane %v3578_v10, 4  ;;  %v3634_v1 = vadd.f32 %v3633_v45, %v3628_v28 }
 0x24e   : > { %v3587_v63 = vadd.f32 %v3586_v39, %v8295_v26  ;;  %v3642_v13 = vadd.f32 %v3641_v61, %v3625_v38 }
 0x24f   : > { %v3580_v46 = vadd.f32 %v3579_v0, %v3578_v10  ;;  %v3635_v57 = vrot.slane %v3634_v1, 4 }
 0x250   : > { %v3588_v62 = vrot.slane %v3587_v63, 4  ;;  %v3643_v56 = vadd.f32 %v3642_v13, %v3629_v20 }
 0x251   : > { %v3581_v11 = vrot.slane %v3580_v46, 2  ;;  %v3636_v22 = vadd.f32 %v3635_v57, %v3634_v1 }
 0x252   : > { %v3589_v36 = vadd.f32 %v3588_v62, %v3587_v63  ;;  %v3644_v32 = vrot.slane %v3643_v56, 4 }
 0x253   : > { %v3582_v48 = vadd.f32 %v3581_v11, %v3580_v46  ;;  %v3637_v40 = vrot.slane %v3636_v22, 2 }
 0x254   : > { %v3590_v60 = vrot.slane %v3589_v36, 2  ;;  %v3645_v41 = vadd.f32 %v3644_v32, %v3643_v56 }
 0x255   : > { %v3583_v30 = vrot.slane %v3582_v48, 1  ;;  %v3638_v59 = vadd.f32 %v3637_v40, %v3636_v22 }
 0x256   : > { %v3591_v45 = vadd.f32 %v3590_v60, %v3589_v36  ;;  %v3646_v33 = vrot.slane %v3645_v41, 2 }
 0x257   : > { %v3584_v10 = vadd.f32 %v3583_v30, %v3582_v48  ;;  %v3639_v28 = vrot.slane %v3638_v59, 1 }
 0x258   : > { %v3592_v0 = vrot.slane %v3591_v45, 1  ;;  %v3647_v38 = vadd.f32 %v3646_v33, %v3645_v41 }
 0x259   : > { %v8303_v27 = vmul.f32 0.03125, %v3584_v10  ;;  %v3640_v35 = vadd.f32 %v3639_v28, %v3638_v59  ;;  %v3047_v59 = vadd.f32 %v8145_v8, %v8143_v7 }
 0x25a   : > { %v3593_v61 = vadd.f32 %v3592_v0, %v3591_v45  ;;  %v3648_v46 = vrot.slane %v3647_v38, 1  ;;  %v3389_v45 = vmul.f32 %v8174_v37, %v8038_v47  ;;  %v3390_v47 = vmul.f32 %v8174_v37, %v8044_v42 }
 0x25b   : > { %v3668_v1 = vmul.f32 0.03125, %v3640_v35  ;;  %v3672_v39 = vmul.f32 %v8303_v27, %v8303_v27  ;;  %v8322_v35 = vsub.s32 2, %v7891_v50  ;;  %v8341_v42 = vsub.s32 3, %v7891_v50 }
 0x25c   : > { %v8307_v63 = vmul.f32 0.03125, %v3593_v61  ;;  %v3649_v20 = vadd.f32 %v3648_v46, %v3647_v38  ;;  %v3405_v61 = vadd.f32 %v3389_v45, %v3047_v59  ;;  %v3049_v46 = vadd.f32 %v8149_v12, %v8147_v9 }
 0x25d   : > { %v3676_v57 = vsub.f32 %v3668_v1, %v3672_v39  ;;  %v3501_v9 = vrot.slane %v8195_v31, %v8322_v35  ;;  %v3057_v59 = vadd.f32 %v8163_v25, %v8161_v24  ;;  %v3055_v45 = vadd.f32 %v8157_v18, %v8155_v17 }
 0x25e   : > { %v3669_v13 = vmul.f32 0.03125, %v3649_v20  ;;  %v3673_v11 = vmul.f32 %v8307_v63, %v8307_v63 }
 0x25f   : > { %v3680_v22 = vadd.f32 1e-05, %v3676_v57 }
 0x260   : > { %v3677_v62 = vsub.f32 %v3669_v13, %v3673_v11  ;;  %v3053_v11 = vadd.f32 %v8153_v15, %v8151_v14 }
 0x261   : > { %7437 = vrsqrt.f32 %v3680_v22 }
 0x262   : > { %v3681_v56 = vadd.f32 1e-05, %v3677_v62 }
 0x264   : > { %7439 = vrsqrt.f32 %v3681_v56 }
 0x26b   : > { %v3201_v48 = vpop.f32.mrf.mxu0 }
 0x26c   : > { %v3254_v40 = vpop.f32.mrf.mxu1 }
 0x26d   : > { %v3203_v36 = vpop.f32.mrf.mxu0  ;;  %v8311_v30 = vadd.f32 %v3254_v40, %v3201_v48 }
 0x26e   : > { %v3256_v32 = vpop.f32.mrf.mxu1  ;;  %v8315_v28 = vpop.eup %7437 }
 0x26f   : > { %v3205_v60 = vpop.f32.mrf.mxu0  ;;  %v8319_v33 = vadd.f32 %v3256_v32, %v3203_v36  ;;  %v3417_v39 = vrot.slane %v8311_v30, 7  ;;  %v3397_v36 = vmul.f32 %v8184_v19, %v8054_v49  ;;  %v3043_v32 = vadd.f32 %v8137_v3, %v8135_v2 }
 0x270   : > { %v3258_v41 = vpop.f32.mrf.mxu1  ;;  %v3406_v30 = vadd.f32 %v3390_v47, %v3049_v46  ;;  %v3505_v3 = vrot.slane %v8195_v31, %v8341_v42  ;;  %v3045_v47 = vadd.f32 %v8141_v6, %v8139_v4 }
 0x271   : > { %v3259_v10 = vadd.f32 %v3258_v41, %v3205_v60  ;;  %v3207_v0 = vpop.f32.mrf.mxu0  ;;  %v8324_v1 = vpop.eup %7439  ;;  %v3418_v48 = vrot.slane %v8319_v33, 7 }
 0x272   : > { %v3260_v38 = vpop.f32.mrf.mxu1  ;;  %v3694_v57 = vcombine.low %v8315_v28, %v8324_v1 }
 0x273   : > { %v3421_v7 = vrot.slane %v3259_v10, 7  ;;  %v3261_v8 = vadd.f32 %v3260_v38, %v3207_v0  ;;  %v3211_v20 = vpop.f32.mrf.mxu0  ;;  %v3409_v38 = vadd.f32 %v8050_v58, %v3053_v11  ;;  %v3413_v58 = vadd.f32 %v3397_v36, %v3057_v59 }
 0x274   : > { %v3264_v13 = vpop.f32.mrf.mxu1 }
 0x275   : > { %v3442_v22 = vsel %vm3431_vm3, %v3417_v39, %v3421_v7  ;;  %v3422_v62 = vrot.slane %v3261_v8, 7  ;;  %v3265_v56 = vadd.f32 %v3264_v13, %v3211_v20  ;;  %v3213_v12 = vpop.f32.mrf.mxu0  ;;  %v3410_v13 = vadd.f32 %v8060_v54, %v3055_v45  ;;  %v9588_v45 = vld [vmem:[#allocation10_spill] sm:$0xff] }
 0x276   : > { %v3470_v40 = vadd.f32 %v3442_v22, %v3405_v61  ;;  %v3266_v37 = vpop.f32.mrf.mxu1 }
 0x277   : > { %v3425_v14 = vrot.slane %v3265_v56, 7  ;;  %v3267_v15 = vadd.f32 %v3266_v37, %v3213_v12  ;;  %v3443_v60 = vsel %vm3431_vm3, %v3418_v48, %v3422_v62  ;;  %v3215_v41 = vpop.f32.mrf.mxu0  ;;  %v9586_v56 = vld [vmem:[#allocation13_spill] sm:$0xff] }
 0x278   : > { %v3268_v10 = vpop.f32.mrf.mxu1  ;;  %v3516_v2 = vadd.f32 %v3501_v9, %v3470_v40  ;;  %v3471_v61 = vadd.f32 %v3443_v60, %v3406_v30 }
 0x279   : > { %v3438_v49 = vsel %vm3431_vm3, %v3421_v7, %v3425_v14  ;;  %v3426_v33 = vrot.slane %v3267_v15, 7  ;;  %v3269_v0 = vadd.f32 %v3268_v10, %v3215_v41  ;;  %v3217_v25 = vpop.f32.mrf.mxu0  ;;  %v3401_v7 = vadd.f32 %v8024_v16, %v3043_v32  ;;  %v9587_v15 = vld [vmem:[#allocation11_spill] sm:$0xff] }
 0x27a   : > { %v3458_v24 = vmul.f32 %v8214_v51, %v3438_v49  ;;  %v3270_v8 = vpop.f32.mrf.mxu1  ;;  %v3550_v4 = vmul.f32 %v8235_v53, %v3516_v2  ;;  %v3517_v6 = vadd.f32 %v3505_v3, %v3471_v61  ;;  %vm3533_vm14 = vcmp.ge.f32.partialorder %v3516_v2, 0.0 }
 0x27b   : > { %v3439_v46 = vsel %vm3431_vm3, %v3422_v62, %v3426_v33  ;;  %v3429_v17 = vrot.slane %v3269_v0, 7  ;;  %v3271_v18 = vadd.f32 %v3270_v8, %v3217_v25  ;;  %v9585_v62 = vld [vmem:[#allocation12_spill] sm:$0xff]  ;;  %v3402_v49 = vadd.f32 %v9588_v45, %v3045_v47 }
 0x27c   : > { %v3474_v20 = vadd.f32 %v3458_v24, %v3409_v38  ;;  %v3459_v31 = vmul.f32 %v8214_v51, %v3439_v46  ;;  %v3059_v40 = vadd.f32 %v9586_v56, %v9585_v62  ;;  %v3398_v51 = vmul.f32 %v8184_v19, %v9587_v15 }
 0x27d   : > { %v3434_v11 = vsel %vm3431_vm3, %v3425_v14, %v3429_v17  ;;  %v3446_v22 = vsel %vm3431_vm3, %v3429_v17, %v3417_v39  ;;  %v3430_v54 = vrot.slane %v3271_v18, 7  ;;  %v8382_v0 = vsel %vm3533_vm14, %v3516_v2, %v3550_v4 }
 0x27e   : > { %v3520_v12 = vadd.f32 %v3501_v9, %v3474_v20  ;;  %v3450_v16 = vmul.f32 %v8228_v5, %v3446_v22  ;;  %v3478_v37 = vadd.f32 %v3434_v11, %v3413_v58  ;;  %v3475_v36 = vadd.f32 %v3459_v31, %v3410_v13 }
 0x27f   : > { %v3435_v30 = vsel %vm3431_vm3, %v3426_v33, %v3430_v54  ;;  %v3447_v59 = vsel %vm3431_vm3, %v3430_v54, %v3418_v48  ;;  %v3414_v60 = vadd.f32 %v3398_v51, %v3059_v40  ;;  %v3551_v19 = vmul.f32 %v8235_v53, %v3517_v6 }
 0x280   : > { %v3466_v14 = vadd.f32 %v3450_v16, %v3401_v7  ;;  %v3524_v32 = vadd.f32 %v3501_v9, %v3478_v37  ;;  %v3554_v39 = vmul.f32 %v8235_v53, %v3520_v12  ;;  %vm3537_vm15 = vcmp.ge.f32.partialorder %v3520_v12, 0.0 }
 0x281   : > { %v3521_v41 = vadd.f32 %v3505_v3, %v3475_v36  ;;  %v3451_v38 = vmul.f32 %v8228_v5, %v3447_v59  ;;  %v3479_v25 = vadd.f32 %v3435_v30, %v3414_v60  ;;  %vm3534_vm1 = vcmp.ge.f32.partialorder %v3517_v6, 0.0 }
 0x282   : > { %v3512_v10 = vadd.f32 %v3501_v9, %v3466_v14  ;;  %v3558_v33 = vmul.f32 %v8235_v53, %v3524_v32  ;;  %v8388_v48 = vsel %vm3537_vm15, %v3520_v12, %v3554_v39  ;;  %vm3541_vm2 = vcmp.ge.f32.partialorder %v3524_v32, 0.0 }
 0x283   : > { %v3467_v8 = vadd.f32 %v3451_v38, %v3402_v49  ;;  %v3622_v9 = vmul.f32 %v8382_v0, %v8382_v0  ;;  %v3555_v2 = vmul.f32 %v8235_v53, %v3521_v41  ;;  %v3525_v46 = vadd.f32 %v3505_v3, %v3479_v25 }
 0x284   : > { %vm3529_vm0 = vcmp.ge.f32.partialorder %v3512_v10, 0.0  ;;  %v3546_v24 = vmul.f32 %v8235_v53, %v3512_v10  ;;  %vm3538_vm3 = vcmp.ge.f32.partialorder %v3521_v41, 0.0  ;;  %v8399_v7 = vsel %vm3534_vm1, %v3517_v6, %v3551_v19 }
 0x285   : > { %v3513_v18 = vadd.f32 %v3505_v3, %v3467_v8  ;;  %v3626_v47 = vmul.f32 %v8388_v48, %v8388_v48  ;;  %v8403_v58 = vsel %vm3541_vm2, %v3524_v32, %v3558_v33  ;;  %v3559_v20 = vmul.f32 %v8235_v53, %v3525_v46 }
 0x286   : > { %v8393_v61 = vsel %vm3529_vm0, %v3512_v10, %v3546_v24  ;;  %v8408_v22 = vsel %vm3538_vm3, %v3521_v41, %v3555_v2  ;;  %vm3542_vm5 = vcmp.ge.f32.partialorder %v3525_v46, 0.0  ;;  %v3630_v62 = vmul.f32 %v8403_v58, %v8403_v58 }
 0x287   : > { %v3594_v5 = vadd.f32 %v8382_v0, %v8393_v61  ;;  %v3618_v17 = vmul.f32 %v8393_v61, %v8393_v61  ;;  %vm3530_vm4 = vcmp.ge.f32.partialorder %v3513_v18, 0.0  ;;  %v3547_v11 = vmul.f32 %v8235_v53, %v3513_v18 }
 0x288   : > { %v3623_v12 = vmul.f32 %v8399_v7, %v8399_v7  ;;  %v8421_v6 = vsel %vm3542_vm5, %v3525_v46, %v3559_v20  ;;  %v3627_v36 = vmul.f32 %v8408_v22, %v8408_v22 }
 0x289   : > { %v3595_v13 = vadd.f32 %v3594_v5, %v8388_v48  ;;  %v3650_v31 = vadd.f32 %v3622_v9, %v3618_v17  ;;  %v8413_v40 = vsel %vm3530_vm4, %v3513_v18, %v3547_v11  ;;  %v3631_v39 = vmul.f32 %v8421_v6, %v8421_v6 }
 0x28a   : > { %v3603_v16 = vadd.f32 %v8399_v7, %v8413_v40  ;;  %v3619_v53 = vmul.f32 %v8413_v40, %v8413_v40 }
 0x28b   : > { %v3596_v3 = vadd.f32 %v3595_v13, %v8403_v58  ;;  %v3651_v56 = vadd.f32 %v3650_v31, %v3626_v47 }
 0x28c   : > { %v3604_v54 = vadd.f32 %v3603_v16, %v8408_v22  ;;  %v3659_v15 = vadd.f32 %v3623_v12, %v3619_v53 }
 0x28d   : > { %v3597_v37 = vrot.slane %v3596_v3, 4  ;;  %v3652_v4 = vadd.f32 %v3651_v56, %v3630_v62 }
 0x28e   : > { %v3605_v32 = vadd.f32 %v3604_v54, %v8421_v6  ;;  %v3660_v30 = vadd.f32 %v3659_v15, %v3627_v36  ;;  %v7477_v54 = vmov 1966171168  }
 0x28f   : > { %v3598_v51 = vadd.f32 %v3597_v37, %v3596_v3  ;;  %v3653_v14 = vrot.slane %v3652_v4, 4  ;;  %v3697_v15 = vunpack.c.l.s4 %v7477_v54 }
 0x290   : > { %v3606_v41 = vrot.slane %v3605_v32, 4  ;;  %v3661_v10 = vadd.f32 %v3660_v30, %v3631_v39 }
 0x291   : > { %v3599_v59 = vrot.slane %v3598_v51, 2  ;;  %v3654_v60 = vadd.f32 %v3653_v14, %v3652_v4 }
 0x292   : > { %v3607_v19 = vadd.f32 %v3606_v41, %v3605_v32  ;;  %v3662_v38 = vrot.slane %v3661_v10, 4 }
 0x293   : > { %v3600_v45 = vadd.f32 %v3599_v59, %v3598_v51  ;;  %v3655_v49 = vrot.slane %v3654_v60, 2  ;;  %v3698_v51 = vunpack.c.0.s8 %v3697_v15 }
 0x294   : > { %v3608_v25 = vrot.slane %v3607_v19, 2  ;;  %v3663_v8 = vadd.f32 %v3662_v38, %v3661_v10  ;;  %v3689_v10 = vld [vmem:[%s3688_s21] ss:$2 sm:$0xf] }
 0x295   : > { %v3601_v24 = vrot.slane %v3600_v45, 1  ;;  %v3656_v33 = vadd.f32 %v3655_v49, %v3654_v60  ;;  %v3701_v32 = vsub.s32 %v3698_v51, %v7891_v50 }
 0x296   : > { %v3609_v46 = vadd.f32 %v3608_v25, %v3607_v19  ;;  %v3664_v5 = vrot.slane %v3663_v8, 2  ;;  %v9589_v19 = vld [vmem:[#allocation14_spill] sm:$0xff] }
 0x297   : > { %v3602_v9 = vadd.f32 %v3601_v24, %v3600_v45  ;;  %v3657_v2 = vrot.slane %v3656_v33, 1  ;;  %v3702_v59 = vrot.slane %v3694_v57, %v3701_v32 }
 0x298   : > { %v3610_v47 = vrot.slane %v3609_v46, 1  ;;  %v3665_v20 = vadd.f32 %v3664_v5, %v3663_v8 }
 0x299   : > { %v3614_v17 = vmul.f32 0.03125, %v3602_v9  ;;  %v3658_v18 = vadd.f32 %v3657_v2, %v3656_v33 }
 0x29a   : > { %v3611_v11 = vadd.f32 %v3610_v47, %v3609_v46  ;;  %v3666_v3 = vrot.slane %v3665_v20, 1 }
 0x29b   : > { %v3670_v13 = vmul.f32 0.03125, %v3658_v18  ;;  %v3674_v31 = vmul.f32 %v3614_v17, %v3614_v17 }
 0x29c   : > { %v3615_v56 = vmul.f32 0.03125, %v3611_v11  ;;  %v3667_v12 = vadd.f32 %v3666_v3, %v3665_v20 }
 0x29d   : > { %v3678_v62 = vsub.f32 %v3670_v13, %v3674_v31 }
 0x29e   : > { %v3671_v16 = vmul.f32 0.03125, %v3667_v12  ;;  %v3675_v53 = vmul.f32 %v3615_v56, %v3615_v56 }
 0x29f   : > { %v3682_v37 = vadd.f32 1e-05, %v3678_v62 }
 0x2a0   : > { %v3679_v4 = vsub.f32 %v3671_v16, %v3675_v53 }
 0x2a1   : > { %7441 = vrsqrt.f32 %v3682_v37 }
 0x2a2   : > { %v3683_v36 = vadd.f32 1e-05, %v3679_v4 }
 0x2a4   : > { %7443 = vrsqrt.f32 %v3683_v36 }
 0x2ae   : > { %v7442_v14 = vpop.eup %7441 }
 0x2b1   : > { %v7444_v39 = vpop.eup %7443 }
 0x2b2   : > { %v3695_v30 = vcombine.low %v7442_v14, %v7444_v39 }
 0x2b4   : > { %v3709_v60 = vrot.slane %v3695_v30, %v3701_v32 }
 0x2b6   : > { %v3710_v41 = vcombine.low %v3702_v59, %v3709_v60 }
 0x2b8   : > { %v3717_v45 = vrot.slane %v3710_v41, %v3701_v32 }
 0x2ba   : > { %v3719_v49 = vmul.f32 %v3717_v45, %v3689_v10 }
 0x2bc   : > { %v3726_v38 = vrot.slane %v3719_v49, %v9589_v19  ;;  %v3730_v24 = vrot.slane %v3719_v49, %v8212_v44  ;;  %v3734_v50 = vrot.slane %v3719_v49, %v8322_v35  ;;  %v3738_v33 = vrot.slane %v3719_v49, %v8341_v42 }
 0x2be   : > { %v3743_v25 = vmul.f32 %v3726_v38, %v8303_v27  ;;  %v3744_v8 = vmul.f32 %v3730_v24, %v8307_v63  ;;  %v3745_v28 = vmul.f32 %v3734_v50, %v3614_v17  ;;  %v3746_v1 = vmul.f32 %v3738_v33, %v3615_v56 }
 0x2bf   : > { %v3777_v57 = vmul.f32 %v3726_v38, %v8267_v29  ;;  %v3778_v9 = vmul.f32 %v3730_v24, %v8287_v23  ;;  %v3779_v2 = vmul.f32 %v3734_v50, %v8393_v61  ;;  %v3780_v46 = vmul.f32 %v3738_v33, %v8413_v40 }
 0x2c0   : > { %v3751_v5 = vcombine.low %v3743_v25, %v3744_v8  ;;  %v3752_v18 = vcombine.low %v3745_v28, %v3746_v1  ;;  %v3781_v47 = vmul.f32 %v3726_v38, %v8256_v52  ;;  %v3782_v20 = vmul.f32 %v3730_v24, %v8273_v34 }
 0x2c1   : > { %v3783_v27 = vmul.f32 %v3734_v50, %v8382_v0  ;;  %v3784_v63 = vmul.f32 %v3738_v33, %v8399_v7  ;;  %v3785_v17 = vmul.f32 %v3726_v38, %v8262_v21  ;;  %v3786_v29 = vmul.f32 %v3730_v24, %v8282_v55  ;;  %v3721_v55 = vld [vmem:[%s3720_s24] ss:$2 sm:$0xf] }
 0x2c2   : > { %v3759_v23 = vrot.slane %v3751_v5, %v3701_v32  ;;  %v3766_v61 = vrot.slane %v3752_v18, %v3701_v32  ;;  %v3787_v40 = vmul.f32 %v3734_v50, %v8388_v48  ;;  %v3788_v52 = vmul.f32 %v3738_v33, %v8408_v22 }
 0x2c3   : > { %v3789_v34 = vmul.f32 %v3726_v38, %v8277_v43  ;;  %v3790_v0 = vmul.f32 %v3730_v24, %v8295_v26  ;;  %v3791_v7 = vmul.f32 %v3734_v50, %v8403_v58  ;;  %v3792_v21 = vmul.f32 %v3738_v33, %v8421_v6 }
 0x2c4   : > { %v3767_v13 = vcombine.low %v3759_v23, %v3766_v61 }
 0x2c6   : > { %v3774_v31 = vrot.slane %v3767_v13, %v3701_v32 }
 0x2c8   : > { %v3776_v11 = vsub.f32 %v3721_v55, %v3774_v31 }
 0x2ca   : > { %v3797_v3 = vrot.slane %v3776_v11, %v9589_v19  ;;  %v3801_v62 = vrot.slane %v3776_v11, %v8212_v44  ;;  %v3805_v48 = vrot.slane %v3776_v11, %v8322_v35  ;;  %v3809_v22 = vrot.slane %v3776_v11, %v8341_v42 }
 0x2cb   : > { %3833 = sbr.rel (%p6562_p10) target bundleno = 726 (0x2d6), region = 82 }
 0x2cc   : > { %v8467_v56 = vadd.f32 %v3797_v3, %v3777_v57  ;;  %v3815_v43 = vadd.f32 %v3801_v62, %v3778_v9  ;;  %v8469_v26 = vadd.f32 %v3805_v48, %v3779_v2  ;;  %v3817_v58 = vadd.f32 %v3809_v22, %v3780_v46 }
 0x2cd   : > { %v8471_v12 = vadd.f32 %v3797_v3, %v3781_v47  ;;  %v3819_v6 = vadd.f32 %v3801_v62, %v3782_v20  ;;  %v8473_v16 = vadd.f32 %v3805_v48, %v3783_v27  ;;  %v3821_v53 = vadd.f32 %v3809_v22, %v3784_v63 }
 0x2ce   : > { %v8475_v37 = vadd.f32 %v3797_v3, %v3785_v17  ;;  %v8477_v4 = vadd.f32 %v3801_v62, %v3786_v29  ;;  %v8479_v44 = vadd.f32 %v3805_v48, %v3787_v40  ;;  %v8481_v35 = vadd.f32 %v3809_v22, %v3788_v52 }
 0x2cf   : > { %v8483_v42 = vadd.f32 %v3797_v3, %v3789_v34  ;;  %v8485_v36 = vadd.f32 %v3801_v62, %v3790_v0  ;;  %v8487_v54 = vadd.f32 %v3805_v48, %v3791_v7  ;;  %v8489_v15 = vadd.f32 %v3809_v22, %v3792_v21 }
 0x2d0   : > { %v6832_v51 = vpack.c.bf16 %v3815_v43, %v8467_v56  ;;  %v6833_v14 = vpack.c.bf16 %v3817_v58, %v8469_v26  ;;  %v6834_v32 = vpack.c.bf16 %v3819_v6, %v8471_v12  ;;  %v6835_v39 = vpack.c.bf16 %v3821_v53, %v8473_v16 }
 0x2d1   : > { %v6836_v30 = vpack.c.bf16 %v8477_v4, %v8475_v37  ;;  %v6837_v59 = vpack.c.bf16 %v8481_v35, %v8479_v44  ;;  %v6838_v60 = vpack.c.bf16 %v8485_v36, %v8483_v42  ;;  %v6839_v41 = vpack.c.bf16 %v8489_v15, %v8487_v54 }
 0x2d2   : > { %3882 = vst [vmem:[#allocation2 + $0x30] sm:$0xff] %v6832_v51  ;;  %3883 = vst [vmem:[#allocation2] sm:$0xff] %v6833_v14 }
 0x2d3   : > { %3884 = vst [vmem:[#allocation2 + $0x18] sm:$0xff] %v6834_v32  ;;  %3885 = vst [vmem:[#allocation2 + $0x10] sm:$0xff] %v6835_v39 }
 0x2d4   : > { %3886 = vst [vmem:[#allocation2 + $0x8] sm:$0xff] %v6836_v30  ;;  %3887 = vst [vmem:[#allocation2 + $0x20] sm:$0xff] %v6837_v59 }
 0x2d5   : > { %3888 = vst [vmem:[#allocation2 + $0x28] sm:$0xff] %v6838_v60  ;;  %3889 = vst [vmem:[#allocation2 + $0x38] sm:$0xff] %v6839_v41 }
 0x2d6 PF: > { %p6571_p11 = scmp.ne.s32.totalorder %s7535_s0, 1 }
 0x2d7   : > { %s5862_s21 = sld [smem:[#allocation6]] (!%p6571_p11) }
 0x2d8   : > { %3893 = sbr.rel (%p6571_p11) target bundleno = 1210 (0x4ba), region = 86 }
 0x2dd   : > { %v3958_v10 = vld [vmem:[%s9576_s7 + $0x1c0] sm:$0xff]  ;;  %v8514_v19 = vpack.c.bf16 %v3819_v6, %v3815_v43  ;;  %v8516_v38 = vpack.c.bf16 %v3821_v53, %v3817_v58  ;;  %vm5920_vm6 = vcmask 1040384   ;;  %vm5989_vm7 = vcmask 1041408  }
 0x2de   : > { %v3962_v45 = vld [vmem:[%s9576_s7 + $0x1e0] sm:$0xff]  ;;  %vm6058_vm8 = vcmask 1042432  }
 0x2df   : > { %v4086_v49 = vld [vmem:[%s9576_s7 + $0x5c0] sm:$0xff]  ;;  %v6629_v24 = vcombine.high %v3958_v10, %v3962_v45  ;;  %v6628_v33 = vcombine.low %v3958_v10, %v3962_v45  ;;  %5470 = vmatprep.mubr.bf16.mxu0 %v8514_v19  ;;  %5523 = vmatprep.mubr.bf16.mxu1 %v8516_v38 }
 0x2e0   : > { %v4090_v50 = vld [vmem:[%s9576_s7 + $0x5e0] sm:$0xff] }
 0x2e1   : > { %v3950_v25 = vld [vmem:[%s9576_s7 + $0x180] sm:$0xff]  ;;  %v6757_v28 = vcombine.high %v4086_v49, %v4090_v50  ;;  %v6756_v1 = vcombine.low %v4086_v49, %v4090_v50  ;;  %5438 = vmatprep.subr.bf16.mxu0 %v6629_v24 }
 0x2e2   : > { %v3954_v8 = vld [vmem:[%s9576_s7 + $0x1a0] sm:$0xff]  ;;  %5439 = vmatpush1.bf16.msra.mxu0 %v6628_v33 }
 0x2e3   : > { %v6621_v57 = vcombine.high %v3950_v25, %v3954_v8  ;;  %v4078_v9 = vld [vmem:[%s9576_s7 + $0x580] sm:$0xff]  ;;  %5491 = vmatprep.subr.bf16.mxu1 %v6757_v28  ;;  %v6620_v27 = vcombine.low %v3950_v25, %v3954_v8 }
 0x2e4   : > { %v4082_v2 = vld [vmem:[%s9576_s7 + $0x5a0] sm:$0xff]  ;;  %5492 = vmatpush1.bf16.msra.mxu1 %v6756_v1 }
 0x2e5   : > { %v3942_v46 = vld [vmem:[%s9576_s7 + $0x140] sm:$0xff]  ;;  %v6749_v5 = vcombine.high %v4078_v9, %v4082_v2  ;;  %5440 = vmatprep.subr.bf16.mxu0 %v6621_v57  ;;  %v6748_v63 = vcombine.low %v4078_v9, %v4082_v2 }
 0x2e6   : > { %v3946_v18 = vld [vmem:[%s9576_s7 + $0x160] sm:$0xff]  ;;  %5441 = vmatpush1.bf16.msra.mxu0 %v6620_v27 }
 0x2e7   : > { %v4070_v47 = vld [vmem:[%s9576_s7 + $0x540] sm:$0xff]  ;;  %v6613_v17 = vcombine.high %v3942_v46, %v3946_v18  ;;  %5493 = vmatprep.subr.bf16.mxu1 %v6749_v5  ;;  %v6612_v34 = vcombine.low %v3942_v46, %v3946_v18 }
 0x2e8   : > { %v4074_v20 = vld [vmem:[%s9576_s7 + $0x560] sm:$0xff]  ;;  %5494 = vmatpush1.bf16.msra.mxu1 %v6748_v63 }
 0x2e9   : > { %v6741_v29 = vcombine.high %v4070_v47, %v4074_v20  ;;  %v3934_v23 = vld [vmem:[%s9576_s7 + $0x100] sm:$0xff]  ;;  %5442 = vmatprep.subr.bf16.mxu0 %v6613_v17  ;;  %v6740_v0 = vcombine.low %v4070_v47, %v4074_v20 }
 0x2ea   : > { %v3938_v61 = vld [vmem:[%s9576_s7 + $0x120] sm:$0xff]  ;;  %5443 = vmatpush1.bf16.msra.mxu0 %v6612_v34 }
 0x2eb   : > { %v4062_v40 = vld [vmem:[%s9576_s7 + $0x500] sm:$0xff]  ;;  %v6605_v7 = vcombine.high %v3934_v23, %v3938_v61  ;;  %5495 = vmatprep.subr.bf16.mxu1 %v6741_v29  ;;  %v6604_v3 = vcombine.low %v3934_v23, %v3938_v61 }
 0x2ec   : > { %v4066_v52 = vld [vmem:[%s9576_s7 + $0x520] sm:$0xff]  ;;  %5496 = vmatpush1.bf16.msra.mxu1 %v6740_v0 }
 0x2ed   : > { %v6733_v21 = vcombine.high %v4062_v40, %v4066_v52  ;;  %v3926_v13 = vld [vmem:[%s9576_s7 + $0xc0] sm:$0xff]  ;;  %5444 = vmatprep.subr.bf16.mxu0 %v6605_v7  ;;  %v6732_v62 = vcombine.low %v4062_v40, %v4066_v52 }
 0x2ee   : > { %v3930_v55 = vld [vmem:[%s9576_s7 + $0xe0] sm:$0xff]  ;;  %5445 = vmatpush1.bf16.msra.mxu0 %v6604_v3 }
 0x2ef   : > { %v4054_v31 = vld [vmem:[%s9576_s7 + $0x4c0] sm:$0xff]  ;;  %v6597_v48 = vcombine.high %v3926_v13, %v3930_v55  ;;  %5497 = vmatprep.subr.bf16.mxu1 %v6733_v21  ;;  %v6596_v51 = vcombine.low %v3926_v13, %v3930_v55 }
 0x2f0   : > { %v4058_v11 = vld [vmem:[%s9576_s7 + $0x4e0] sm:$0xff]  ;;  %5498 = vmatpush1.bf16.msra.mxu1 %v6732_v62 }
 0x2f1   : > { %v6725_v22 = vcombine.high %v4054_v31, %v4058_v11  ;;  %v3918_v43 = vld [vmem:[%s9576_s7 + $0x80] sm:$0xff]  ;;  %5446 = vmatprep.subr.bf16.mxu0 %v6597_v48  ;;  %v6724_v14 = vcombine.low %v4054_v31, %v4058_v11 }
 0x2f2   : > { %v3922_v58 = vld [vmem:[%s9576_s7 + $0xa0] sm:$0xff]  ;;  %5447 = vmatpush1.bf16.msra.mxu0 %v6596_v51 }
 0x2f3   : > { %v4046_v6 = vld [vmem:[%s9576_s7 + $0x480] sm:$0xff]  ;;  %v6589_v32 = vcombine.high %v3918_v43, %v3922_v58  ;;  %5499 = vmatprep.subr.bf16.mxu1 %v6725_v22  ;;  %v6588_v10 = vcombine.low %v3918_v43, %v3922_v58 }
 0x2f4   : > { %v4050_v53 = vld [vmem:[%s9576_s7 + $0x4a0] sm:$0xff]  ;;  %5500 = vmatpush1.bf16.msra.mxu1 %v6724_v14 }
 0x2f5   : > { %v6717_v39 = vcombine.high %v4046_v6, %v4050_v53  ;;  %v3910_v30 = vld [vmem:[%s9576_s7 + $0x40] sm:$0xff]  ;;  %5448 = vmatprep.subr.bf16.mxu0 %v6589_v32  ;;  %v6716_v45 = vcombine.low %v4046_v6, %v4050_v53 }
 0x2f6   : > { %v3914_v59 = vld [vmem:[%s9576_s7 + $0x60] sm:$0xff]  ;;  %5449 = vmatpush1.bf16.msra.mxu0 %v6588_v10 }
 0x2f7   : > { %v4038_v60 = vld [vmem:[%s9576_s7 + $0x440] sm:$0xff]  ;;  %v6581_v49 = vcombine.high %v3910_v30, %v3914_v59  ;;  %5501 = vmatprep.subr.bf16.mxu1 %v6717_v39  ;;  %v6580_v28 = vcombine.low %v3910_v30, %v3914_v59 }
 0x2f8   : > { %v4042_v41 = vld [vmem:[%s9576_s7 + $0x460] sm:$0xff]  ;;  %5502 = vmatpush1.bf16.msra.mxu1 %v6716_v45 }
 0x2f9   : > { %v6709_v24 = vcombine.high %v4038_v60, %v4042_v41  ;;  %v3902_v50 = vld [vmem:[%s9576_s7] sm:$0xff]  ;;  %5450 = vmatprep.subr.bf16.mxu0 %v6581_v49  ;;  %v6708_v1 = vcombine.low %v4038_v60, %v4042_v41 }
 0x2fa   : > { %v3906_v33 = vld [vmem:[%s9576_s7 + $0x20] sm:$0xff]  ;;  %5451 = vmatpush1.bf16.msra.mxu0 %v6580_v28 }
 0x2fb   : > { %v4030_v25 = vld [vmem:[%s9576_s7 + $0x400] sm:$0xff]  ;;  %v6573_v57 = vcombine.high %v3902_v50, %v3906_v33  ;;  %5503 = vmatprep.subr.bf16.mxu1 %v6709_v24  ;;  %v6572_v47 = vcombine.low %v3902_v50, %v3906_v33 }
 0x2fc   : > { %v4034_v8 = vld [vmem:[%s9576_s7 + $0x420] sm:$0xff]  ;;  %5504 = vmatpush1.bf16.msra.mxu1 %v6708_v1 }
 0x2fd   : > { %v6701_v9 = vcombine.high %v4030_v25, %v4034_v8  ;;  %v4022_v2 = vld [vmem:[%s9576_s7 + $0x3c0] sm:$0xff]  ;;  %5452 = vmatprep.subr.bf16.mxu0 %v6573_v57  ;;  %v6700_v20 = vcombine.low %v4030_v25, %v4034_v8 }
 0x2fe   : > { %v4026_v46 = vld [vmem:[%s9576_s7 + $0x3e0] sm:$0xff]  ;;  %5453 = vmatpush1.bf16.msra.mxu0 %v6572_v47 }
 0x2ff   : > { %v4150_v5 = vld [vmem:[%s9576_s7 + $0x7c0] sm:$0xff]  ;;  %v6693_v27 = vcombine.high %v4022_v2, %v4026_v46  ;;  %5505 = vmatprep.subr.bf16.mxu1 %v6701_v9  ;;  %v6692_v40 = vcombine.low %v4022_v2, %v4026_v46 }
 0x300   : > { %v4154_v18 = vld [vmem:[%s9576_s7 + $0x7e0] sm:$0xff]  ;;  %5506 = vmatpush1.bf16.msra.mxu1 %v6700_v20 }
 0x301   : > { %v6821_v63 = vcombine.high %v4150_v5, %v4154_v18  ;;  %v4014_v17 = vld [vmem:[%s9576_s7 + $0x380] sm:$0xff]  ;;  %5454 = vmatprep.subr.bf16.mxu0 %v6693_v27  ;;  %v6820_v52 = vcombine.low %v4150_v5, %v4154_v18 }
 0x302   : > { %v4018_v29 = vld [vmem:[%s9576_s7 + $0x3a0] sm:$0xff]  ;;  %5455 = vmatpush2.bf16.msra.mxu0 %v6692_v40 }
 0x303   : > { %v4142_v23 = vld [vmem:[%s9576_s7 + $0x780] sm:$0xff]  ;;  %v6685_v34 = vcombine.high %v4014_v17, %v4018_v29  ;;  %5507 = vmatprep.subr.bf16.mxu1 %v6821_v63  ;;  %v6684_v31 = vcombine.low %v4014_v17, %v4018_v29 }
 0x304   : > { %v4146_v61 = vld [vmem:[%s9576_s7 + $0x7a0] sm:$0xff]  ;;  %5508 = vmatpush2.bf16.msra.mxu1 %v6820_v52 }
 0x305   : > { %v6813_v0 = vcombine.high %v4142_v23, %v4146_v61  ;;  %v4006_v7 = vld [vmem:[%s9576_s7 + $0x340] sm:$0xff]  ;;  %5456 = vmatprep.subr.bf16.mxu0 %v6685_v34  ;;  %v6812_v11 = vcombine.low %v4142_v23, %v4146_v61  ;;  %v3959_v34 = vld [vmem:[%s9576_s7 + $0x1c8] sm:$0xff] }
 0x306   : > { %v4010_v21 = vld [vmem:[%s9576_s7 + $0x360] sm:$0xff]  ;;  %5457 = vmatpush2.bf16.msra.mxu0 %v6684_v31 }
 0x307   : > { %v4134_v13 = vld [vmem:[%s9576_s7 + $0x740] sm:$0xff]  ;;  %v6677_v3 = vcombine.high %v4006_v7, %v4010_v21  ;;  %5509 = vmatprep.subr.bf16.mxu1 %v6813_v0  ;;  %v6676_v6 = vcombine.low %v4006_v7, %v4010_v21  ;;  %v3963_v0 = vld [vmem:[%s9576_s7 + $0x1e8] sm:$0xff] }
 0x308   : > { %v4138_v55 = vld [vmem:[%s9576_s7 + $0x760] sm:$0xff]  ;;  %5510 = vmatpush2.bf16.msra.mxu1 %v6812_v11  ;;  %v4087_v7 = vld [vmem:[%s9576_s7 + $0x5c8] sm:$0xff]  ;;  %v6631_v31 = vcombine.high %v3959_v34, %v3963_v0 }
 0x309   : > { %v6805_v62 = vcombine.high %v4134_v13, %v4138_v55  ;;  %v3998_v48 = vld [vmem:[%s9576_s7 + $0x300] sm:$0xff]  ;;  %5458 = vmatprep.subr.bf16.mxu0 %v6677_v3  ;;  %v6804_v53 = vcombine.low %v4134_v13, %v4138_v55  ;;  %v4091_v21 = vld [vmem:[%s9576_s7 + $0x5e8] sm:$0xff] }
 0x30a   : > { %v4002_v22 = vld [vmem:[%s9576_s7 + $0x320] sm:$0xff]  ;;  %5459 = vmatpush2.bf16.msra.mxu0 %v6676_v6  ;;  %v6759_v11 = vcombine.high %v4087_v7, %v4091_v21  ;;  %v3951_v3 = vld [vmem:[%s9576_s7 + $0x188] sm:$0xff]  ;;  %v6630_v6 = vcombine.low %v3959_v34, %v3963_v0 }
 0x30b   : > { %v4126_v43 = vld [vmem:[%s9576_s7 + $0x700] sm:$0xff]  ;;  %v6669_v51 = vcombine.high %v3998_v48, %v4002_v22  ;;  %5511 = vmatprep.subr.bf16.mxu1 %v6805_v62  ;;  %v6668_v60 = vcombine.low %v3998_v48, %v4002_v22  ;;  %v3955_v62 = vld [vmem:[%s9576_s7 + $0x1a8] sm:$0xff]  ;;  %v8723_v48 = vpack.c.bf16 %v8471_v12, %v8467_v56 }
 0x30c   : > { %v4130_v58 = vld [vmem:[%s9576_s7 + $0x720] sm:$0xff]  ;;  %5512 = vmatpush2.bf16.msra.mxu1 %v6804_v53  ;;  %v4079_v22 = vld [vmem:[%s9576_s7 + $0x588] sm:$0xff]  ;;  %v6758_v53 = vcombine.low %v4087_v7, %v4091_v21 }
 0x30d   : > { %v6797_v14 = vcombine.high %v4126_v43, %v4130_v58  ;;  %v3990_v32 = vld [vmem:[%s9576_s7 + $0x2c0] sm:$0xff]  ;;  %5460 = vmatprep.subr.bf16.mxu0 %v6669_v51  ;;  %v6796_v41 = vcombine.low %v4126_v43, %v4130_v58  ;;  %v4083_v43 = vld [vmem:[%s9576_s7 + $0x5a8] sm:$0xff]  ;;  %v8733_v58 = vpack.c.bf16 %v8473_v16, %v8469_v26  ;;  %v6623_v51 = vcombine.high %v3951_v3, %v3955_v62 }
 0x30e   : > { %v3994_v39 = vld [vmem:[%s9576_s7 + $0x2e0] sm:$0xff]  ;;  %5461 = vmatpush2.bf16.msra.mxu0 %v6668_v60  ;;  %v6751_v56 = vcombine.high %v4079_v22, %v4083_v43  ;;  %v3943_v12 = vld [vmem:[%s9576_s7 + $0x148] sm:$0xff] }
 0x30f   : > { %v4118_v30 = vld [vmem:[%s9576_s7 + $0x6c0] sm:$0xff]  ;;  %v6661_v10 = vcombine.high %v3990_v32, %v3994_v39  ;;  %5513 = vmatprep.subr.bf16.mxu1 %v6797_v14  ;;  %v6660_v25 = vcombine.low %v3990_v32, %v3994_v39  ;;  %v3947_v14 = vld [vmem:[%s9576_s7 + $0x168] sm:$0xff]  ;;  %v8743_v32 = vpack.c.bf16 %v8485_v36, %v8477_v4  ;;  %v8754_v39 = vpack.c.bf16 %v8489_v15, %v8481_v35 }
 0x310   : > { %v4122_v59 = vld [vmem:[%s9576_s7 + $0x6e0] sm:$0xff]  ;;  %5514 = vmatpush2.bf16.msra.mxu1 %v6796_v41  ;;  %v4071_v26 = vld [vmem:[%s9576_s7 + $0x548] sm:$0xff]  ;;  %v6750_v4 = vcombine.low %v4079_v22, %v4083_v43  ;;  %v6615_v36 = vcombine.high %v3943_v12, %v3947_v14 }
 0x311   : > { %v6789_v45 = vcombine.high %v4118_v30, %v4122_v59  ;;  %v3982_v49 = vld [vmem:[%s9576_s7 + $0x280] sm:$0xff]  ;;  %5462 = vmatprep.subr.bf16.mxu0 %v6661_v10  ;;  %v6788_v8 = vcombine.low %v4118_v30, %v4122_v59  ;;  %v4075_v16 = vld [vmem:[%s9576_s7 + $0x568] sm:$0xff]  ;;  %v6622_v30 = vcombine.low %v3951_v3, %v3955_v62  ;;  %v8773_v10 = vpack.c.bf16 %v8483_v42, %v8475_v37 }
 0x312   : > { %v3986_v24 = vld [vmem:[%s9576_s7 + $0x2a0] sm:$0xff]  ;;  %5463 = vmatpush2.bf16.msra.mxu0 %v6660_v25  ;;  %v6743_v59 = vcombine.high %v4071_v26, %v4075_v16  ;;  %v3935_v60 = vld [vmem:[%s9576_s7 + $0x108] sm:$0xff] }
 0x313   : > { %v4110_v50 = vld [vmem:[%s9576_s7 + $0x680] sm:$0xff]  ;;  %v6653_v28 = vcombine.high %v3982_v49, %v3986_v24  ;;  %5515 = vmatprep.subr.bf16.mxu1 %v6789_v45  ;;  %v6652_v5 = vcombine.low %v3982_v49, %v3986_v24  ;;  %v3939_v41 = vld [vmem:[%s9576_s7 + $0x128] sm:$0xff]  ;;  %v6614_v45 = vcombine.low %v3943_v12, %v3947_v14  ;;  %v8777_v49 = vpack.c.bf16 %v8487_v54, %v8479_v44 }
 0x314   : > { %v4114_v33 = vld [vmem:[%s9576_s7 + $0x6a0] sm:$0xff]  ;;  %5516 = vmatpush2.bf16.msra.mxu1 %v6788_v8  ;;  %v4063_v35 = vld [vmem:[%s9576_s7 + $0x508] sm:$0xff]  ;;  %v6742_v24 = vcombine.low %v4071_v26, %v4075_v16  ;;  %v6606_v54 = vcombine.low %v3935_v60, %v3939_v41 }
 0x315   : > { %v6781_v1 = vcombine.high %v4110_v50, %v4114_v33  ;;  %v3974_v57 = vld [vmem:[%s9576_s7 + $0x240] sm:$0xff]  ;;  %5464 = vmatprep.subr.bf16.mxu0 %v6653_v28  ;;  %v6780_v18 = vcombine.low %v4110_v50, %v4114_v33  ;;  %v4067_v15 = vld [vmem:[%s9576_s7 + $0x528] sm:$0xff]  ;;  %v6607_v50 = vcombine.high %v3935_v60, %v3939_v41 }
 0x316   : > { %v3978_v9 = vld [vmem:[%s9576_s7 + $0x260] sm:$0xff]  ;;  %5465 = vmatpush2.bf16.msra.mxu0 %v6652_v5  ;;  %v6735_v33 = vcombine.high %v4063_v35, %v4067_v15  ;;  %v3927_v25 = vld [vmem:[%s9576_s7 + $0xc8] sm:$0xff]  ;;  %v6734_v8 = vcombine.low %v4063_v35, %v4067_v15 }
 0x317   : > { %v4102_v2 = vld [vmem:[%s9576_s7 + $0x640] sm:$0xff]  ;;  %v6645_v47 = vcombine.high %v3974_v57, %v3978_v9  ;;  %5517 = vmatprep.subr.bf16.mxu1 %v6781_v1  ;;  %v6644_v23 = vcombine.low %v3974_v57, %v3978_v9  ;;  %v3931_v37 = vld [vmem:[%s9576_s7 + $0xe8] sm:$0xff] }
 0x318   : > { %v4106_v46 = vld [vmem:[%s9576_s7 + $0x660] sm:$0xff]  ;;  %5518 = vmatpush2.bf16.msra.mxu1 %v6780_v18  ;;  %v4055_v42 = vld [vmem:[%s9576_s7 + $0x4c8] sm:$0xff]  ;;  %v6599_v28 = vcombine.high %v3927_v25, %v3931_v37  ;;  %v6598_v5 = vcombine.low %v3927_v25, %v3931_v37 }
 0x319   : > { %v6773_v20 = vcombine.high %v4102_v2, %v4106_v46  ;;  %v3966_v27 = vld [vmem:[%s9576_s7 + $0x200] sm:$0xff]  ;;  %5466 = vmatprep.subr.bf16.mxu0 %v6645_v47  ;;  %v6772_v61 = vcombine.low %v4102_v2, %v4106_v46  ;;  %v4059_v44 = vld [vmem:[%s9576_s7 + $0x4e8] sm:$0xff] }
 0x31a   : > { %v3970_v63 = vld [vmem:[%s9576_s7 + $0x220] sm:$0xff]  ;;  %5467 = vmatpush2.bf16.msra.mxu0 %v6644_v23  ;;  %v6727_v1 = vcombine.high %v4055_v42, %v4059_v44  ;;  %v3919_v57 = vld [vmem:[%s9576_s7 + $0x88] sm:$0xff]  ;;  %v6726_v18 = vcombine.low %v4055_v42, %v4059_v44 }
 0x31b   : > { %v4094_v17 = vld [vmem:[%s9576_s7 + $0x600] sm:$0xff]  ;;  %v6637_v40 = vcombine.high %v3966_v27, %v3970_v63  ;;  %5519 = vmatprep.subr.bf16.mxu1 %v6773_v20  ;;  %v6636_v13 = vcombine.low %v3966_v27, %v3970_v63  ;;  %v3923_v9 = vld [vmem:[%s9576_s7 + $0xa8] sm:$0xff] }
 0x31c   : > { %v4098_v29 = vld [vmem:[%s9576_s7 + $0x620] sm:$0xff]  ;;  %5520 = vmatpush2.bf16.msra.mxu1 %v6772_v61  ;;  %v4047_v2 = vld [vmem:[%s9576_s7 + $0x488] sm:$0xff]  ;;  %v6591_v47 = vcombine.high %v3919_v57, %v3923_v9  ;;  %v6590_v23 = vcombine.low %v3919_v57, %v3923_v9 }
 0x31d   : > { %v6765_v52 = vcombine.high %v4094_v17, %v4098_v29  ;;  %5468 = vmatprep.subr.bf16.mxu0 %v6637_v40  ;;  %v6764_v55 = vcombine.low %v4094_v17, %v4098_v29  ;;  %v4051_v46 = vld [vmem:[%s9576_s7 + $0x4a8] sm:$0xff] }
 0x31e   : > { %5469 = vmatpush2.bf16.msra.mxu0 %v6636_v13  ;;  %v6719_v20 = vcombine.high %v4047_v2, %v4051_v46  ;;  %v3911_v27 = vld [vmem:[%s9576_s7 + $0x48] sm:$0xff]  ;;  %v6718_v61 = vcombine.low %v4047_v2, %v4051_v46 }
 0x31f   : > { %5521 = vmatprep.subr.bf16.mxu1 %v6765_v52  ;;  %5544 = vmatprep.subr.bf16.mxu0 %v6631_v31  ;;  %v3915_v63 = vld [vmem:[%s9576_s7 + $0x68] sm:$0xff] }
 0x320   : > { %5522 = vmatpush2.bf16.msra.mxu1 %v6764_v55  ;;  %v4039_v17 = vld [vmem:[%s9576_s7 + $0x448] sm:$0xff]  ;;  %v6583_v40 = vcombine.high %v3911_v27, %v3915_v63  ;;  %v6582_v13 = vcombine.low %v3911_v27, %v3915_v63 }
 0x321   : > { %5597 = vmatprep.subr.bf16.mxu1 %v6759_v11  ;;  %5471 = vmatmul.mubr.bf16.vlgmr.msra.gmra.mxu0 %v8723_v48  ;;  %v4043_v29 = vld [vmem:[%s9576_s7 + $0x468] sm:$0xff] }
 0x322   : > { %5545 = vmatpush1.bf16.msra.mxu0 %v6630_v6  ;;  %5480 = vmatprep.mubr.bf16.mxu0 %v8743_v32  ;;  %v6711_v52 = vcombine.high %v4039_v17, %v4043_v29  ;;  %v3903_v34 = vld [vmem:[%s9576_s7 + $0x8] sm:$0xff]  ;;  %v6710_v55 = vcombine.low %v4039_v17, %v4043_v29 }
 0x323   : > { %5524 = vmatmul.mubr.bf16.vlgmr.msra.gmra.mxu1 %v8733_v58  ;;  %5546 = vmatprep.subr.bf16.mxu0 %v6623_v51  ;;  %v3907_v0 = vld [vmem:[%s9576_s7 + $0x28] sm:$0xff] }
 0x324   : > { %5598 = vmatpush1.bf16.msra.mxu1 %v6758_v53  ;;  %5533 = vmatprep.mubr.bf16.mxu1 %v8754_v39  ;;  %v4031_v7 = vld [vmem:[%s9576_s7 + $0x408] sm:$0xff]  ;;  %v6575_v31 = vcombine.high %v3903_v34, %v3907_v0  ;;  %v6574_v6 = vcombine.low %v3903_v34, %v3907_v0 }
 0x325   : > { %5599 = vmatprep.subr.bf16.mxu1 %v6751_v56  ;;  %v4035_v21 = vld [vmem:[%s9576_s7 + $0x428] sm:$0xff] }
 0x326   : > { %5547 = vmatpush1.bf16.msra.mxu0 %v6622_v30  ;;  %v6703_v11 = vcombine.high %v4031_v7, %v4035_v21  ;;  %v4023_v3 = vld [vmem:[%s9576_s7 + $0x3c8] sm:$0xff]  ;;  %v6702_v53 = vcombine.low %v4031_v7, %v4035_v21 }
 0x327   : > { %5548 = vmatprep.subr.bf16.mxu0 %v6615_v36  ;;  %v4027_v62 = vld [vmem:[%s9576_s7 + $0x3e8] sm:$0xff] }
 0x328   : > { %5600 = vmatpush1.bf16.msra.mxu1 %v6750_v4  ;;  %v4151_v22 = vld [vmem:[%s9576_s7 + $0x7c8] sm:$0xff]  ;;  %v6695_v51 = vcombine.high %v4023_v3, %v4027_v62  ;;  %v6694_v30 = vcombine.low %v4023_v3, %v4027_v62 }
 0x329   : > { %5601 = vmatprep.subr.bf16.mxu1 %v6743_v59  ;;  %5481 = vmatmul.mubr.bf16.gmra.mxu0 %v8773_v10  ;;  %v4155_v43 = vld [vmem:[%s9576_s7 + $0x7e8] sm:$0xff] }
 0x32a   : > { %5549 = vmatpush1.bf16.msra.mxu0 %v6614_v45  ;;  %5576 = vmatprep.mubr.bf16.mxu0 %v8514_v19  ;;  %v6823_v56 = vcombine.high %v4151_v22, %v4155_v43  ;;  %v4015_v12 = vld [vmem:[%s9576_s7 + $0x388] sm:$0xff]  ;;  %v6822_v4 = vcombine.low %v4151_v22, %v4155_v43 }
 0x32b   : > { %5534 = vmatmul.mubr.bf16.gmra.mxu1 %v8777_v49  ;;  %5550 = vmatprep.subr.bf16.mxu0 %v6607_v50  ;;  %v4019_v14 = vld [vmem:[%s9576_s7 + $0x3a8] sm:$0xff] }
 0x32c   : > { %5602 = vmatpush1.bf16.msra.mxu1 %v6742_v24  ;;  %5629 = vmatprep.mubr.bf16.mxu1 %v8516_v38  ;;  %v4143_v26 = vld [vmem:[%s9576_s7 + $0x788] sm:$0xff]  ;;  %v6687_v36 = vcombine.high %v4015_v12, %v4019_v14  ;;  %v6686_v45 = vcombine.low %v4015_v12, %v4019_v14  ;;  %v3960_v12 = vld [vmem:[%s9576_s7 + $0x1d0] sm:$0xff] }
 0x32d   : > { %5603 = vmatprep.subr.bf16.mxu1 %v6735_v33  ;;  %v4147_v16 = vld [vmem:[%s9576_s7 + $0x7a8] sm:$0xff]  ;;  %v3964_v14 = vld [vmem:[%s9576_s7 + $0x1f0] sm:$0xff] }
 0x32e   : > { %5551 = vmatpush1.bf16.msra.mxu0 %v6606_v54  ;;  %v6815_v59 = vcombine.high %v4143_v26, %v4147_v16  ;;  %v4007_v60 = vld [vmem:[%s9576_s7 + $0x348] sm:$0xff]  ;;  %v6814_v24 = vcombine.low %v4143_v26, %v4147_v16  ;;  %v4088_v26 = vld [vmem:[%s9576_s7 + $0x5d0] sm:$0xff] }
 0x32f   : > { %5552 = vmatprep.subr.bf16.mxu0 %v6599_v28  ;;  %v4011_v41 = vld [vmem:[%s9576_s7 + $0x368] sm:$0xff]  ;;  %v4092_v16 = vld [vmem:[%s9576_s7 + $0x5f0] sm:$0xff] }
 0x330   : > { %5604 = vmatpush1.bf16.msra.mxu1 %v6734_v8  ;;  %v4135_v35 = vld [vmem:[%s9576_s7 + $0x748] sm:$0xff]  ;;  %v6679_v50 = vcombine.high %v4007_v60, %v4011_v41  ;;  %v6678_v54 = vcombine.low %v4007_v60, %v4011_v41  ;;  %v3952_v60 = vld [vmem:[%s9576_s7 + $0x190] sm:$0xff] }
 0x331   : > { %5605 = vmatprep.subr.bf16.mxu1 %v6727_v1  ;;  %v4139_v15 = vld [vmem:[%s9576_s7 + $0x768] sm:$0xff]  ;;  %v3956_v41 = vld [vmem:[%s9576_s7 + $0x1b0] sm:$0xff] }
 0x332   : > { %5553 = vmatpush1.bf16.msra.mxu0 %v6598_v5  ;;  %v6807_v33 = vcombine.high %v4135_v35, %v4139_v15  ;;  %v3999_v25 = vld [vmem:[%s9576_s7 + $0x308] sm:$0xff]  ;;  %v6806_v8 = vcombine.low %v4135_v35, %v4139_v15  ;;  %v4080_v35 = vld [vmem:[%s9576_s7 + $0x590] sm:$0xff] }
 0x333   : > { %5554 = vmatprep.subr.bf16.mxu0 %v6591_v47  ;;  %v4003_v37 = vld [vmem:[%s9576_s7 + $0x328] sm:$0xff]  ;;  %v4084_v15 = vld [vmem:[%s9576_s7 + $0x5b0] sm:$0xff] }
 0x334   : > { %5606 = vmatpush1.bf16.msra.mxu1 %v6726_v18  ;;  %v4127_v42 = vld [vmem:[%s9576_s7 + $0x708] sm:$0xff]  ;;  %v6671_v28 = vcombine.high %v3999_v25, %v4003_v37  ;;  %v6670_v5 = vcombine.low %v3999_v25, %v4003_v37  ;;  %v3944_v25 = vld [vmem:[%s9576_s7 + $0x150] sm:$0xff] }
 0x335   : > { %5607 = vmatprep.subr.bf16.mxu1 %v6719_v20  ;;  %v4131_v44 = vld [vmem:[%s9576_s7 + $0x728] sm:$0xff]  ;;  %v3948_v37 = vld [vmem:[%s9576_s7 + $0x170] sm:$0xff] }
 0x336   : > { %5555 = vmatpush1.bf16.msra.mxu0 %v6590_v23  ;;  %v6799_v1 = vcombine.high %v4127_v42, %v4131_v44  ;;  %v3991_v57 = vld [vmem:[%s9576_s7 + $0x2c8] sm:$0xff]  ;;  %v6798_v18 = vcombine.low %v4127_v42, %v4131_v44  ;;  %v4072_v42 = vld [vmem:[%s9576_s7 + $0x550] sm:$0xff] }
 0x337   : > { %5556 = vmatprep.subr.bf16.mxu0 %v6583_v40  ;;  %v3995_v9 = vld [vmem:[%s9576_s7 + $0x2e8] sm:$0xff]  ;;  %v4076_v44 = vld [vmem:[%s9576_s7 + $0x570] sm:$0xff] }
 0x338   : > { %5608 = vmatpush1.bf16.msra.mxu1 %v6718_v61  ;;  %v4119_v2 = vld [vmem:[%s9576_s7 + $0x6c8] sm:$0xff]  ;;  %v6663_v47 = vcombine.high %v3991_v57, %v3995_v9  ;;  %v6662_v23 = vcombine.low %v3991_v57, %v3995_v9  ;;  %v3936_v57 = vld [vmem:[%s9576_s7 + $0x110] sm:$0xff] }
 0x339   : > { %5609 = vmatprep.subr.bf16.mxu1 %v6711_v52  ;;  %v4123_v46 = vld [vmem:[%s9576_s7 + $0x6e8] sm:$0xff]  ;;  %v3940_v9 = vld [vmem:[%s9576_s7 + $0x130] sm:$0xff] }
 0x33a   : > { %5557 = vmatpush1.bf16.msra.mxu0 %v6582_v13  ;;  %v6791_v20 = vcombine.high %v4119_v2, %v4123_v46  ;;  %v3983_v27 = vld [vmem:[%s9576_s7 + $0x288] sm:$0xff]  ;;  %v6790_v61 = vcombine.low %v4119_v2, %v4123_v46  ;;  %v4064_v2 = vld [vmem:[%s9576_s7 + $0x510] sm:$0xff] }
 0x33b   : > { %5558 = vmatprep.subr.bf16.mxu0 %v6575_v31  ;;  %v3987_v63 = vld [vmem:[%s9576_s7 + $0x2a8] sm:$0xff]  ;;  %v4068_v46 = vld [vmem:[%s9576_s7 + $0x530] sm:$0xff] }
 0x33c   : > { %5610 = vmatpush1.bf16.msra.mxu1 %v6710_v55  ;;  %v4111_v17 = vld [vmem:[%s9576_s7 + $0x688] sm:$0xff]  ;;  %v6655_v40 = vcombine.high %v3983_v27, %v3987_v63  ;;  %v6654_v13 = vcombine.low %v3983_v27, %v3987_v63  ;;  %v6737_v27 = vcombine.high %v4064_v2, %v4068_v46  ;;  %v3928_v63 = vld [vmem:[%s9576_s7 + $0xd0] sm:$0xff] }
 0x33d   : > { %5611 = vmatprep.subr.bf16.mxu1 %v6703_v11  ;;  %v4115_v29 = vld [vmem:[%s9576_s7 + $0x6a8] sm:$0xff] }
 0x33e   : > { %5559 = vmatpush1.bf16.msra.mxu0 %v6574_v6  ;;  %v6783_v52 = vcombine.high %v4111_v17, %v4115_v29  ;;  %v3975_v34 = vld [vmem:[%s9576_s7 + $0x248] sm:$0xff]  ;;  %v6782_v55 = vcombine.low %v4111_v17, %v4115_v29  ;;  %v3932_v17 = vld [vmem:[%s9576_s7 + $0xf0] sm:$0xff] }
 0x33f   : > { %5560 = vmatprep.subr.bf16.mxu0 %v6695_v51  ;;  %v3979_v0 = vld [vmem:[%s9576_s7 + $0x268] sm:$0xff]  ;;  %v4056_v29 = vld [vmem:[%s9576_s7 + $0x4d0] sm:$0xff] }
 0x340   : > { %5612 = vmatpush1.bf16.msra.mxu1 %v6702_v53  ;;  %v4103_v7 = vld [vmem:[%s9576_s7 + $0x648] sm:$0xff]  ;;  %v6647_v31 = vcombine.high %v3975_v34, %v3979_v0  ;;  %v6646_v6 = vcombine.low %v3975_v34, %v3979_v0  ;;  %v3920_v0 = vld [vmem:[%s9576_s7 + $0x90] sm:$0xff] }
 0x341   : > { %5613 = vmatprep.subr.bf16.mxu1 %v6823_v56  ;;  %v4107_v21 = vld [vmem:[%s9576_s7 + $0x668] sm:$0xff] }
 0x342   : > { %5561 = vmatpush2.bf16.msra.mxu0 %v6694_v30  ;;  %v6775_v11 = vcombine.high %v4103_v7, %v4107_v21  ;;  %v3967_v3 = vld [vmem:[%s9576_s7 + $0x208] sm:$0xff]  ;;  %v6774_v53 = vcombine.low %v4103_v7, %v4107_v21  ;;  %v3924_v7 = vld [vmem:[%s9576_s7 + $0xb0] sm:$0xff] }
 0x343   : > { %5562 = vmatprep.subr.bf16.mxu0 %v6687_v36  ;;  %v3971_v62 = vld [vmem:[%s9576_s7 + $0x228] sm:$0xff]  ;;  %v6633_v36 = vcombine.high %v3960_v12, %v3964_v14  ;;  %v4048_v21 = vld [vmem:[%s9576_s7 + $0x490] sm:$0xff] }
 0x344   : > { %5614 = vmatpush2.bf16.msra.mxu1 %v6822_v4  ;;  %v4095_v22 = vld [vmem:[%s9576_s7 + $0x608] sm:$0xff]  ;;  %v6639_v51 = vcombine.high %v3967_v3, %v3971_v62  ;;  %v6638_v30 = vcombine.low %v3967_v3, %v3971_v62  ;;  %v3912_v62 = vld [vmem:[%s9576_s7 + $0x50] sm:$0xff] }
 0x345   : > { %5615 = vmatprep.subr.bf16.mxu1 %v6815_v59  ;;  %v4099_v43 = vld [vmem:[%s9576_s7 + $0x628] sm:$0xff]  ;;  %v6761_v59 = vcombine.high %v4088_v26, %v4092_v16 }
 0x346   : > { %5563 = vmatpush2.bf16.msra.mxu0 %v6686_v45  ;;  %v6767_v56 = vcombine.high %v4095_v22, %v4099_v43  ;;  %v6766_v4 = vcombine.low %v4095_v22, %v4099_v43  ;;  %v6632_v45 = vcombine.low %v3960_v12, %v3964_v14  ;;  %v3916_v22 = vld [vmem:[%s9576_s7 + $0x70] sm:$0xff] }
 0x347   : > { %5564 = vmatprep.subr.bf16.mxu0 %v6679_v50  ;;  %v6625_v50 = vcombine.high %v3952_v60, %v3956_v41  ;;  %v4040_v43 = vld [vmem:[%s9576_s7 + $0x450] sm:$0xff] }
 0x348   : > { %5616 = vmatpush2.bf16.msra.mxu1 %v6814_v24  ;;  %v6760_v24 = vcombine.low %v4088_v26, %v4092_v16  ;;  %v3904_v14 = vld [vmem:[%s9576_s7 + $0x10] sm:$0xff] }
 0x349   : > { %5617 = vmatprep.subr.bf16.mxu1 %v6807_v33  ;;  %v6753_v33 = vcombine.high %v4080_v35, %v4084_v15  ;;  %v3908_v26 = vld [vmem:[%s9576_s7 + $0x30] sm:$0xff] }
 0x34a   : > { %5565 = vmatpush2.bf16.msra.mxu0 %v6678_v54  ;;  %v6624_v54 = vcombine.low %v3952_v60, %v3956_v41  ;;  %v4032_v16 = vld [vmem:[%s9576_s7 + $0x410] sm:$0xff] }
 0x34b   : > { %5566 = vmatprep.subr.bf16.mxu0 %v6671_v28  ;;  %v6617_v28 = vcombine.high %v3944_v25, %v3948_v37  ;;  %v4024_v41 = vld [vmem:[%s9576_s7 + $0x3d0] sm:$0xff] }
 0x34c   : > { %5618 = vmatpush2.bf16.msra.mxu1 %v6806_v8  ;;  %v6752_v8 = vcombine.low %v4080_v35, %v4084_v15  ;;  %v4028_v35 = vld [vmem:[%s9576_s7 + $0x3f0] sm:$0xff] }
 0x34d   : > { %5619 = vmatprep.subr.bf16.mxu1 %v6799_v1  ;;  %v6745_v1 = vcombine.high %v4072_v42, %v4076_v44  ;;  %v4152_v15 = vld [vmem:[%s9576_s7 + $0x7d0] sm:$0xff] }
 0x34e   : > { %5567 = vmatpush2.bf16.msra.mxu0 %v6670_v5  ;;  %v8979_v5 = vstv %s5862_s21 }
 0x34f   : > { %5568 = vmatprep.subr.bf16.mxu0 %v6663_v47  ;;  %5868 = vst [vmem:[%s9577_s8 + $0x20] sm:$0x7] %v8979_v5  ;;  %5869 = vst [vmem:[%s9577_s8 + $0x28] sm:$0x7] %v8979_v5  ;;  %v6744_v47 = vcombine.low %v4072_v42, %v4076_v44  ;;  %v4020_v42 = vld [vmem:[%s9576_s7 + $0x3b0] sm:$0xff] }
 0x350   : > { %5620 = vmatpush2.bf16.msra.mxu1 %v6798_v18  ;;  %v6616_v18 = vcombine.low %v3944_v25, %v3948_v37  ;;  %5874 = vst [vmem:[%s9577_s8 + $0x50] sm:$0x7] %v8979_v5  ;;  %5875 = vst [vmem:[%s9577_s8 + $0x58] sm:$0x7] %v8979_v5  ;;  %v4016_v37 = vld [vmem:[%s9576_s7 + $0x390] sm:$0xff] }
 0x351   : > { %5621 = vmatprep.subr.bf16.mxu1 %v6791_v20  ;;  %v6609_v20 = vcombine.high %v3936_v57, %v3940_v9  ;;  %v4144_v44 = vld [vmem:[%s9576_s7 + $0x790] sm:$0xff] }
 0x352   : > { %5569 = vmatpush2.bf16.msra.mxu0 %v6662_v23  ;;  %v4060_v23 = vld [vmem:[%s9576_s7 + $0x4f0] sm:$0xff] }
 0x353   : > { %5570 = vmatprep.subr.bf16.mxu0 %v6655_v40  ;;  %v6736_v40 = vcombine.low %v4064_v2, %v4068_v46  ;;  %v6729_v34 = vcombine.high %v4056_v29, %v4060_v23  ;;  %v4012_v2 = vld [vmem:[%s9576_s7 + $0x370] sm:$0xff] }
 0x354   : > { %5622 = vmatpush2.bf16.msra.mxu1 %v6790_v61  ;;  %v6608_v61 = vcombine.low %v3936_v57, %v3940_v9  ;;  %v4008_v9 = vld [vmem:[%s9576_s7 + $0x350] sm:$0xff] }
 0x355   : > { %5623 = vmatprep.subr.bf16.mxu1 %v6783_v52  ;;  %v6601_v52 = vcombine.high %v3928_v63, %v3932_v17  ;;  %v4136_v46 = vld [vmem:[%s9576_s7 + $0x750] sm:$0xff] }
 0x356   : > { %5571 = vmatpush2.bf16.msra.mxu0 %v6654_v13  ;;  %v4052_v13 = vld [vmem:[%s9576_s7 + $0x4b0] sm:$0xff] }
 0x357   : > { %5572 = vmatprep.subr.bf16.mxu0 %v6647_v31  ;;  %v6728_v31 = vcombine.low %v4056_v29, %v4060_v23  ;;  %v6721_v3 = vcombine.high %v4048_v21, %v4052_v13  ;;  %v4004_v29 = vld [vmem:[%s9576_s7 + $0x330] sm:$0xff] }
 0x358   : > { %5624 = vmatpush2.bf16.msra.mxu1 %v6782_v55  ;;  %v6600_v55 = vcombine.low %v3928_v63, %v3932_v17  ;;  %v4000_v17 = vld [vmem:[%s9576_s7 + $0x310] sm:$0xff] }
 0x359   : > { %5625 = vmatprep.subr.bf16.mxu1 %v6775_v11  ;;  %v6593_v11 = vcombine.high %v3920_v0, %v3924_v7  ;;  %v4128_v23 = vld [vmem:[%s9576_s7 + $0x710] sm:$0xff] }
 0x35a   : > { %5573 = vmatpush2.bf16.msra.mxu0 %v6646_v6  ;;  %v4044_v6 = vld [vmem:[%s9576_s7 + $0x470] sm:$0xff] }
 0x35b   : > { %5574 = vmatprep.subr.bf16.mxu0 %v6639_v51  ;;  %v6720_v51 = vcombine.low %v4048_v21, %v4052_v13  ;;  %v6713_v12 = vcombine.high %v4040_v43, %v4044_v6  ;;  %v3996_v21 = vld [vmem:[%s9576_s7 + $0x2f0] sm:$0xff] }
 0x35c   : > { %5626 = vmatpush2.bf16.msra.mxu1 %v6774_v53  ;;  %v6592_v53 = vcombine.low %v3920_v0, %v3924_v7  ;;  %v3992_v7 = vld [vmem:[%s9576_s7 + $0x2d0] sm:$0xff] }
 0x35d   : > { %5627 = vmatprep.subr.bf16.mxu1 %v6767_v56  ;;  %v6585_v56 = vcombine.high %v3912_v62, %v3916_v22  ;;  %v4120_v13 = vld [vmem:[%s9576_s7 + $0x6d0] sm:$0xff] }
 0x35e   : > { %5575 = vmatpush2.bf16.msra.mxu0 %v6638_v30  ;;  %v4036_v30 = vld [vmem:[%s9576_s7 + $0x430] sm:$0xff] }
 0x35f   : > { %5650 = vmatprep.subr.bf16.mxu0 %v6633_v36  ;;  %v6712_v36 = vcombine.low %v4040_v43, %v4044_v6  ;;  %v6705_v60 = vcombine.high %v4032_v16, %v4036_v30  ;;  %v3988_v43 = vld [vmem:[%s9576_s7 + $0x2b0] sm:$0xff] }
 0x360   : > { %5628 = vmatpush2.bf16.msra.mxu1 %v6766_v4  ;;  %v6584_v4 = vcombine.low %v3912_v62, %v3916_v22  ;;  %v3984_v22 = vld [vmem:[%s9576_s7 + $0x290] sm:$0xff] }
 0x361   : > { %5703 = vmatprep.subr.bf16.mxu1 %v6761_v59  ;;  %5577 = vmatmul.mubr.bf16.vlgmr.msra.gmra.mxu0 %v8723_v48  ;;  %v6577_v59 = vcombine.high %v3904_v14, %v3908_v26  ;;  %v4112_v6 = vld [vmem:[%s9576_s7 + $0x690] sm:$0xff] }
 0x362   : > { %5651 = vmatpush1.bf16.msra.mxu0 %v6632_v45  ;;  %5586 = vmatprep.mubr.bf16.mxu0 %v8743_v32  ;;  %v4156_v45 = vld [vmem:[%s9576_s7 + $0x7f0] sm:$0xff] }
 0x363   : > { %5630 = vmatmul.mubr.bf16.vlgmr.msra.gmra.mxu1 %v8733_v58  ;;  %5652 = vmatprep.subr.bf16.mxu0 %v6625_v50  ;;  %v6704_v50 = vcombine.low %v4032_v16, %v4036_v30  ;;  %v6825_v25 = vcombine.high %v4152_v15, %v4156_v45  ;;  %v3980_v16 = vld [vmem:[%s9576_s7 + $0x270] sm:$0xff] }
 0x364   : > { %5704 = vmatpush1.bf16.msra.mxu1 %v6760_v24  ;;  %5639 = vmatprep.mubr.bf16.mxu1 %v8754_v39  ;;  %v6576_v24 = vcombine.low %v3904_v14, %v3908_v26  ;;  %v3976_v26 = vld [vmem:[%s9576_s7 + $0x250] sm:$0xff] }
 0x365   : > { %5705 = vmatprep.subr.bf16.mxu1 %v6753_v33  ;;  %v6697_v33 = vcombine.high %v4024_v41, %v4028_v35  ;;  %v4104_v30 = vld [vmem:[%s9576_s7 + $0x650] sm:$0xff] }
 0x366   : > { %5653 = vmatpush1.bf16.msra.mxu0 %v6624_v54  ;;  %v4148_v54 = vld [vmem:[%s9576_s7 + $0x7b0] sm:$0xff] }
 0x367   : > { %5654 = vmatprep.subr.bf16.mxu0 %v6617_v28  ;;  %v6824_v28 = vcombine.low %v4152_v15, %v4156_v45  ;;  %v6817_v57 = vcombine.high %v4144_v44, %v4148_v54  ;;  %v3972_v15 = vld [vmem:[%s9576_s7 + $0x230] sm:$0xff] }
 0x368   : > { %5706 = vmatpush1.bf16.msra.mxu1 %v6752_v8  ;;  %v6696_v8 = vcombine.low %v4024_v41, %v4028_v35  ;;  %v3968_v35 = vld [vmem:[%s9576_s7 + $0x210] sm:$0xff] }
 0x369   : > { %5707 = vmatprep.subr.bf16.mxu1 %v6745_v1  ;;  %5587 = vmatmul.mubr.bf16.gmra.mxu0 %v8773_v10  ;;  %v6689_v1 = vcombine.high %v4016_v37, %v4020_v42  ;;  %v4096_v45 = vld [vmem:[%s9576_s7 + $0x610] sm:$0xff] }
 0x36a   : > { %5655 = vmatpush1.bf16.msra.mxu0 %v6616_v18  ;;  %5682 = vmatprep.mubr.bf16.mxu0 %v8514_v19  ;;  %v4140_v18 = vld [vmem:[%s9576_s7 + $0x770] sm:$0xff] }
 0x36b   : > { %5640 = vmatmul.mubr.bf16.gmra.mxu1 %v8777_v49  ;;  %5656 = vmatprep.subr.bf16.mxu0 %v6609_v20  ;;  %v6816_v20 = vcombine.low %v4144_v44, %v4148_v54  ;;  %v6809_v63 = vcombine.high %v4136_v46, %v4140_v18  ;;  %v3965_v44 = vld [vmem:[%s9576_s7 + $0x1f8] sm:$0xff] }
 0x36c   : > { %5708 = vmatpush1.bf16.msra.mxu1 %v6744_v47  ;;  %5735 = vmatprep.mubr.bf16.mxu1 %v8516_v38  ;;  %v6688_v47 = vcombine.low %v4016_v37, %v4020_v42  ;;  %v3961_v42 = vld [vmem:[%s9576_s7 + $0x1d8] sm:$0xff] }
 0x36d   : > { %5709 = vmatprep.subr.bf16.mxu1 %v6737_v27  ;;  %v6681_v27 = vcombine.high %v4008_v9, %v4012_v2  ;;  %v4089_v54 = vld [vmem:[%s9576_s7 + $0x5d8] sm:$0xff] }
 0x36e   : > { %5657 = vmatpush1.bf16.msra.mxu0 %v6608_v61  ;;  %v4132_v61 = vld [vmem:[%s9576_s7 + $0x730] sm:$0xff] }
 0x36f   : > { %5658 = vmatprep.subr.bf16.mxu0 %v6601_v52  ;;  %v6808_v52 = vcombine.low %v4136_v46, %v4140_v18  ;;  %v6801_v0 = vcombine.high %v4128_v23, %v4132_v61  ;;  %v3957_v46 = vld [vmem:[%s9576_s7 + $0x1b8] sm:$0xff] }
 0x370   : > { %5710 = vmatpush1.bf16.msra.mxu1 %v6736_v40  ;;  %v6680_v40 = vcombine.low %v4008_v9, %v4012_v2  ;;  %v3953_v2 = vld [vmem:[%s9576_s7 + $0x198] sm:$0xff] }
 0x371   : > { %5711 = vmatprep.subr.bf16.mxu1 %v6729_v34  ;;  %v6673_v34 = vcombine.high %v4000_v17, %v4004_v29  ;;  %v4081_v18 = vld [vmem:[%s9576_s7 + $0x598] sm:$0xff] }
 0x372   : > { %5659 = vmatpush1.bf16.msra.mxu0 %v6600_v55  ;;  %v4124_v55 = vld [vmem:[%s9576_s7 + $0x6f0] sm:$0xff] }
 0x373   : > { %5660 = vmatprep.subr.bf16.mxu0 %v6593_v11  ;;  %v6800_v11 = vcombine.low %v4128_v23, %v4132_v61  ;;  %v6793_v62 = vcombine.high %v4120_v13, %v4124_v55  ;;  %v3949_v23 = vld [vmem:[%s9576_s7 + $0x178] sm:$0xff] }
 0x374   : > { %5712 = vmatpush1.bf16.msra.mxu1 %v6728_v31  ;;  %v6672_v31 = vcombine.low %v4000_v17, %v4004_v29  ;;  %v3945_v29 = vld [vmem:[%s9576_s7 + $0x158] sm:$0xff] }
 0x375   : > { %5713 = vmatprep.subr.bf16.mxu1 %v6721_v3  ;;  %v6665_v3 = vcombine.high %v3992_v7, %v3996_v21  ;;  %v4073_v61 = vld [vmem:[%s9576_s7 + $0x558] sm:$0xff] }
 0x376   : > { %5661 = vmatpush1.bf16.msra.mxu0 %v6592_v53  ;;  %v4116_v53 = vld [vmem:[%s9576_s7 + $0x6b0] sm:$0xff] }
 0x377   : > { %5662 = vmatprep.subr.bf16.mxu0 %v6585_v56  ;;  %v6792_v56 = vcombine.low %v4120_v13, %v4124_v55  ;;  %v6785_v14 = vcombine.high %v4112_v6, %v4116_v53  ;;  %v3941_v13 = vld [vmem:[%s9576_s7 + $0x138] sm:$0xff] }
 0x378   : > { %5714 = vmatpush1.bf16.msra.mxu1 %v6720_v51  ;;  %v6664_v51 = vcombine.low %v3992_v7, %v3996_v21  ;;  %v3937_v21 = vld [vmem:[%s9576_s7 + $0x118] sm:$0xff] }
 0x379   : > { %5715 = vmatprep.subr.bf16.mxu1 %v6713_v12  ;;  %v6657_v12 = vcombine.high %v3984_v22, %v3988_v43  ;;  %v4065_v55 = vld [vmem:[%s9576_s7 + $0x518] sm:$0xff] }
 0x37a   : > { %5663 = vmatpush1.bf16.msra.mxu0 %v6584_v4  ;;  %v4108_v4 = vld [vmem:[%s9576_s7 + $0x670] sm:$0xff] }
 0x37b   : > { %5664 = vmatprep.subr.bf16.mxu0 %v6577_v59  ;;  %v6784_v59 = vcombine.low %v4112_v6, %v4116_v53  ;;  %v6777_v41 = vcombine.high %v4104_v30, %v4108_v4  ;;  %v3933_v6 = vld [vmem:[%s9576_s7 + $0xf8] sm:$0xff] }
 0x37c   : > { %5716 = vmatpush1.bf16.msra.mxu1 %v6712_v36  ;;  %v6656_v36 = vcombine.low %v3984_v22, %v3988_v43  ;;  %v3929_v43 = vld [vmem:[%s9576_s7 + $0xd8] sm:$0xff] }
 0x37d   : > { %5717 = vmatprep.subr.bf16.mxu1 %v6705_v60  ;;  %v6649_v60 = vcombine.high %v3976_v26, %v3980_v16  ;;  %v4057_v53 = vld [vmem:[%s9576_s7 + $0x4d8] sm:$0xff] }
 0x37e   : > { %5665 = vmatpush1.bf16.msra.mxu0 %v6576_v24  ;;  %v4100_v24 = vld [vmem:[%s9576_s7 + $0x630] sm:$0xff] }
 0x37f   : > { %5666 = vmatprep.subr.bf16.mxu0 %v6697_v33  ;;  %v6776_v33 = vcombine.low %v4104_v30, %v4108_v4  ;;  %v6769_v37 = vcombine.high %v4096_v45, %v4100_v24  ;;  %v3925_v30 = vld [vmem:[%s9576_s7 + $0xb8] sm:$0xff] }
 0x380   : > { %5718 = vmatpush1.bf16.msra.mxu1 %v6704_v50  ;;  %v6648_v50 = vcombine.low %v3976_v26, %v3980_v16  ;;  %v3921_v16 = vld [vmem:[%s9576_s7 + $0x98] sm:$0xff] }
 0x381   : > { %5719 = vmatprep.subr.bf16.mxu1 %v6825_v25  ;;  %v6641_v25 = vcombine.high %v3968_v35, %v3972_v15  ;;  %v4049_v4 = vld [vmem:[%s9576_s7 + $0x498] sm:$0xff] }
 0x382   : > { %5667 = vmatpush2.bf16.msra.mxu0 %v6696_v8  ;;  %v4093_v8 = vld [vmem:[%s9576_s7 + $0x5f8] sm:$0xff] }
 0x383   : > { %5668 = vmatprep.subr.bf16.mxu0 %v6689_v1  ;;  %v6768_v1 = vcombine.low %v4096_v45, %v4100_v24  ;;  %v6763_v9 = vcombine.high %v4089_v54, %v4093_v8  ;;  %v4045_v45 = vld [vmem:[%s9576_s7 + $0x478] sm:$0xff]  ;;  %v6594_v24 = vcombine.low %v3921_v16, %v3925_v30 }
 0x384   : > { %5720 = vmatpush2.bf16.msra.mxu1 %v6824_v28  ;;  %v6640_v28 = vcombine.low %v3968_v35, %v3972_v15  ;;  %v3917_v15 = vld [vmem:[%s9576_s7 + $0x78] sm:$0xff] }
 0x385   : > { %5721 = vmatprep.subr.bf16.mxu1 %v6817_v57  ;;  %v6635_v57 = vcombine.high %v3961_v42, %v3965_v44 }
 0x386   : > { %5669 = vmatpush2.bf16.msra.mxu0 %v6688_v47  ;;  %v4085_v47 = vld [vmem:[%s9576_s7 + $0x5b8] sm:$0xff] }
 0x387   : > { %5670 = vmatprep.subr.bf16.mxu0 %v6681_v27  ;;  %v6762_v27 = vcombine.low %v4089_v54, %v4093_v8  ;;  %v6755_v17 = vcombine.high %v4081_v18, %v4085_v47  ;;  %v4037_v54 = vld [vmem:[%s9576_s7 + $0x438] sm:$0xff] }
 0x388   : > { %5722 = vmatpush2.bf16.msra.mxu1 %v6816_v20  ;;  %v6634_v20 = vcombine.low %v3961_v42, %v3965_v44  ;;  %v3909_v42 = vld [vmem:[%s9576_s7 + $0x38] sm:$0xff] }
 0x389   : > { %5723 = vmatprep.subr.bf16.mxu1 %v6809_v63  ;;  %v6627_v63 = vcombine.high %v3953_v2, %v3957_v46  ;;  %v4033_v44 = vld [vmem:[%s9576_s7 + $0x418] sm:$0xff] }
 0x38a   : > { %5671 = vmatpush2.bf16.msra.mxu0 %v6680_v40  ;;  %v4077_v40 = vld [vmem:[%s9576_s7 + $0x578] sm:$0xff] }
 0x38b   : > { %5672 = vmatprep.subr.bf16.mxu0 %v6673_v34  ;;  %v6754_v34 = vcombine.low %v4081_v18, %v4085_v47  ;;  %v6747_v7 = vcombine.high %v4073_v61, %v4077_v40  ;;  %v4157_v18 = vld [vmem:[%s9576_s7 + $0x7f8] sm:$0xff] }
 0x38c   : > { %5724 = vmatpush2.bf16.msra.mxu1 %v6808_v52  ;;  %v6626_v52 = vcombine.low %v3953_v2, %v3957_v46  ;;  %v4029_v2 = vld [vmem:[%s9576_s7 + $0x3f8] sm:$0xff] }
 0x38d   : > { %5725 = vmatprep.subr.bf16.mxu1 %v6801_v0  ;;  %v6619_v0 = vcombine.high %v3945_v29, %v3949_v23  ;;  %v4153_v46 = vld [vmem:[%s9576_s7 + $0x7d8] sm:$0xff] }
 0x38e   : > { %5673 = vmatpush2.bf16.msra.mxu0 %v6672_v31  ;;  %v4069_v31 = vld [vmem:[%s9576_s7 + $0x538] sm:$0xff] }
 0x38f   : > { %5674 = vmatprep.subr.bf16.mxu0 %v6665_v3  ;;  %v6746_v3 = vcombine.low %v4073_v61, %v4077_v40  ;;  %v6739_v22 = vcombine.high %v4065_v55, %v4069_v31  ;;  %v4149_v61 = vld [vmem:[%s9576_s7 + $0x7b8] sm:$0xff] }
 0x390   : > { %5726 = vmatpush2.bf16.msra.mxu1 %v6800_v11  ;;  %v6618_v11 = vcombine.low %v3945_v29, %v3949_v23  ;;  %v4021_v29 = vld [vmem:[%s9576_s7 + $0x3b8] sm:$0xff] }
 0x391   : > { %5727 = vmatprep.subr.bf16.mxu1 %v6793_v62  ;;  %v6611_v62 = vcombine.high %v3937_v21, %v3941_v13  ;;  %v4145_v23 = vld [vmem:[%s9576_s7 + $0x798] sm:$0xff] }
 0x392   : > { %5675 = vmatpush2.bf16.msra.mxu0 %v6664_v51  ;;  %v4061_v51 = vld [vmem:[%s9576_s7 + $0x4f8] sm:$0xff] }
 0x393   : > { %5676 = vmatprep.subr.bf16.mxu0 %v6657_v12  ;;  %v6738_v12 = vcombine.low %v4065_v55, %v4069_v31  ;;  %v6731_v26 = vcombine.high %v4057_v53, %v4061_v51  ;;  %v4141_v55 = vld [vmem:[%s9576_s7 + $0x778] sm:$0xff] }
 0x394   : > { %5728 = vmatpush2.bf16.msra.mxu1 %v6792_v56  ;;  %v6610_v56 = vcombine.low %v3937_v21, %v3941_v13  ;;  %v4013_v21 = vld [vmem:[%s9576_s7 + $0x378] sm:$0xff] }
 0x395   : > { %5729 = vmatprep.subr.bf16.mxu1 %v6785_v14  ;;  %v6603_v14 = vcombine.high %v3929_v43, %v3933_v6  ;;  %v4137_v13 = vld [vmem:[%s9576_s7 + $0x758] sm:$0xff] }
 0x396   : > { %5677 = vmatpush2.bf16.msra.mxu0 %v6656_v36  ;;  %v4053_v36 = vld [vmem:[%s9576_s7 + $0x4b8] sm:$0xff] }
 0x397   : > { %5678 = vmatprep.subr.bf16.mxu0 %v6649_v60  ;;  %v6730_v60 = vcombine.low %v4057_v53, %v4061_v51  ;;  %v6723_v35 = vcombine.high %v4049_v4, %v4053_v36  ;;  %v4133_v53 = vld [vmem:[%s9576_s7 + $0x738] sm:$0xff] }
 0x398   : > { %5730 = vmatpush2.bf16.msra.mxu1 %v6784_v59  ;;  %v6602_v59 = vcombine.low %v3929_v43, %v3933_v6  ;;  %v4005_v43 = vld [vmem:[%s9576_s7 + $0x338] sm:$0xff] }
 0x399   : > { %5731 = vmatprep.subr.bf16.mxu1 %v6777_v41  ;;  %v6595_v41 = vcombine.high %v3921_v16, %v3925_v30  ;;  %v4129_v6 = vld [vmem:[%s9576_s7 + $0x718] sm:$0xff] }
 0x39a   : > { %5679 = vmatpush2.bf16.msra.mxu0 %v6648_v50  ;;  %v6722_v50 = vcombine.low %v4049_v4, %v4053_v36  ;;  %v3997_v16 = vld [vmem:[%s9576_s7 + $0x2f8] sm:$0xff] }
 0x39b   : > { %5680 = vmatprep.subr.bf16.mxu0 %v6641_v25  ;;  %v4121_v30 = vld [vmem:[%s9576_s7 + $0x6d8] sm:$0xff] }
 0x39c   : > { %5732 = vmatpush2.bf16.msra.mxu1 %v6776_v33  ;;  %v4125_v4 = vld [vmem:[%s9576_s7 + $0x6f8] sm:$0xff] }
 0x39d   : > { %5733 = vmatprep.subr.bf16.mxu1 %v6769_v37  ;;  %v3905_v37 = vld [vmem:[%s9576_s7 + $0x18] sm:$0xff] }
 0x39e   : > { %5681 = vmatpush2.bf16.msra.mxu0 %v6640_v28  ;;  %v6578_v47 = vcombine.low %v3905_v37, %v3909_v42 }
 0x39f   : > { %5756 = vmatprep.subr.bf16.mxu0 %v6635_v57  ;;  %v6707_v57 = vcombine.high %v4033_v44, %v4037_v54 }
 0x3a0   : > { %5734 = vmatpush2.bf16.msra.mxu1 %v6768_v1  ;;  %v6579_v1 = vcombine.high %v3905_v37, %v3909_v42  ;;  %v3981_v37 = vld [vmem:[%s9576_s7 + $0x278] sm:$0xff] }
 0x3a1   : > { %5809 = vmatprep.subr.bf16.mxu1 %v6763_v9  ;;  %5683 = vmatmul.mubr.bf16.vlgmr.msra.gmra.mxu0 %v8723_v48  ;;  %v4025_v9 = vld [vmem:[%s9576_s7 + $0x3d8] sm:$0xff] }
 0x3a2   : > { %5757 = vmatpush1.bf16.msra.mxu0 %v6634_v20  ;;  %5692 = vmatprep.mubr.bf16.mxu0 %v8743_v32  ;;  %v6706_v20 = vcombine.low %v4033_v44, %v4037_v54  ;;  %v6698_v40 = vcombine.low %v4025_v9, %v4029_v2  ;;  %v4105_v42 = vld [vmem:[%s9576_s7 + $0x658] sm:$0xff] }
 0x3a3   : > { %5736 = vmatmul.mubr.bf16.vlgmr.msra.gmra.mxu1 %v8733_v58  ;;  %5758 = vmatprep.subr.bf16.mxu0 %v6627_v63  ;;  %v6827_v63 = vcombine.high %v4153_v46, %v4157_v18  ;;  %v4109_v44 = vld [vmem:[%s9576_s7 + $0x678] sm:$0xff] }
 0x3a4   : > { %5810 = vmatpush1.bf16.msra.mxu1 %v6762_v27  ;;  %5745 = vmatprep.mubr.bf16.mxu1 %v8754_v39  ;;  %v6699_v27 = vcombine.high %v4025_v9, %v4029_v2  ;;  %v3973_v9 = vld [vmem:[%s9576_s7 + $0x238] sm:$0xff] }
 0x3a5   : > { %5811 = vmatprep.subr.bf16.mxu1 %v6755_v17  ;;  %v4017_v17 = vld [vmem:[%s9576_s7 + $0x398] sm:$0xff] }
 0x3a6   : > { %5759 = vmatpush1.bf16.msra.mxu0 %v6626_v52  ;;  %v6826_v52 = vcombine.low %v4153_v46, %v4157_v18  ;;  %v6690_v31 = vcombine.low %v4017_v17, %v4021_v29  ;;  %v4097_v2 = vld [vmem:[%s9576_s7 + $0x618] sm:$0xff] }
 0x3a7   : > { %5760 = vmatprep.subr.bf16.mxu0 %v6619_v0  ;;  %v6819_v0 = vcombine.high %v4145_v23, %v4149_v61  ;;  %v4101_v46 = vld [vmem:[%s9576_s7 + $0x638] sm:$0xff] }
 0x3a8   : > { %5812 = vmatpush1.bf16.msra.mxu1 %v6754_v34  ;;  %v6691_v34 = vcombine.high %v4017_v17, %v4021_v29  ;;  %v6770_v17 = vcombine.low %v4097_v2, %v4101_v46 }
 0x3a9   : > { %5813 = vmatprep.subr.bf16.mxu1 %v6747_v7  ;;  %5693 = vmatmul.mubr.bf16.gmra.mxu0 %v8773_v10  ;;  %v4009_v7 = vld [vmem:[%s9576_s7 + $0x358] sm:$0xff] }
 0x3aa   : > { %5761 = vmatpush1.bf16.msra.mxu0 %v6618_v11  ;;  %5788 = vmatprep.mubr.bf16.mxu0 %v8514_v19  ;;  %v3913_v19 = vld [vmem:[%s9576_s7 + $0x58] sm:$0xff]  ;;  %v6818_v11 = vcombine.low %v4145_v23, %v4149_v61  ;;  %v6682_v51 = vcombine.low %v4009_v7, %v4013_v21 }
 0x3ab   : > { %5746 = vmatmul.mubr.bf16.gmra.mxu1 %v8777_v49  ;;  %5762 = vmatprep.subr.bf16.mxu0 %v6611_v62  ;;  %v6587_v33 = vcombine.high %v3913_v19, %v3917_v15  ;;  %v6586_v8 = vcombine.low %v3913_v19, %v3917_v15  ;;  %v6811_v62 = vcombine.high %v4137_v13, %v4141_v55  ;;  %v3989_v19 = vld [vmem:[%s9576_s7 + $0x2b8] sm:$0xff] }
 0x3ac   : > { %5814 = vmatpush1.bf16.msra.mxu1 %v6746_v3  ;;  %5841 = vmatprep.mubr.bf16.mxu1 %v8516_v38  ;;  %v4041_v38 = vld [vmem:[%s9576_s7 + $0x458] sm:$0xff]  ;;  %v6683_v3 = vcombine.high %v4009_v7, %v4013_v21 }
 0x3ad   : > { %5815 = vmatprep.subr.bf16.mxu1 %v6739_v22  ;;  %v6715_v25 = vcombine.high %v4041_v38, %v4045_v45  ;;  %v6714_v28 = vcombine.low %v4041_v38, %v4045_v45  ;;  %v4001_v22 = vld [vmem:[%s9576_s7 + $0x318] sm:$0xff] }
 0x3ae   : > { %5763 = vmatpush1.bf16.msra.mxu0 %v6610_v56  ;;  %v6810_v56 = vcombine.low %v4137_v13, %v4141_v55  ;;  %v6674_v36 = vcombine.low %v4001_v22, %v4005_v43  ;;  %v4113_v15 = vld [vmem:[%s9576_s7 + $0x698] sm:$0xff] }
 0x3af   : > { %5764 = vmatprep.subr.bf16.mxu0 %v6603_v14  ;;  %v6803_v14 = vcombine.high %v4129_v6, %v4133_v53  ;;  %v4117_v38 = vld [vmem:[%s9576_s7 + $0x6b8] sm:$0xff] }
 0x3b0   : > { %5816 = vmatpush1.bf16.msra.mxu1 %v6738_v12  ;;  %v6675_v12 = vcombine.high %v4001_v22, %v4005_v43 }
 0x3b1   : > { %5817 = vmatprep.subr.bf16.mxu1 %v6731_v26  ;;  %v3993_v26 = vld [vmem:[%s9576_s7 + $0x2d8] sm:$0xff] }
 0x3b2   : > { %5765 = vmatpush1.bf16.msra.mxu0 %v6602_v59  ;;  %v6802_v59 = vcombine.low %v4129_v6, %v4133_v53  ;;  %v6666_v45 = vcombine.low %v3993_v26, %v3997_v16 }
 0x3b3   : > { %5766 = vmatprep.subr.bf16.mxu0 %v6595_v41  ;;  %v6795_v41 = vcombine.high %v4121_v30, %v4125_v4 }
 0x3b4   : > { %5818 = vmatpush1.bf16.msra.mxu1 %v6730_v60  ;;  %v6667_v60 = vcombine.high %v3993_v26, %v3997_v16 }
 0x3b5   : > { %5819 = vmatprep.subr.bf16.mxu1 %v6723_v35  ;;  %v3985_v35 = vld [vmem:[%s9576_s7 + $0x298] sm:$0xff] }
 0x3b6   : > { %5767 = vmatpush1.bf16.msra.mxu0 %v6594_v24  ;;  %v6794_v24 = vcombine.low %v4121_v30, %v4125_v4  ;;  %v6658_v54 = vcombine.low %v3985_v35, %v3989_v19 }
 0x3b7   : > { %5768 = vmatprep.subr.bf16.mxu0 %v6587_v33  ;;  %v6787_v33 = vcombine.high %v4113_v15, %v4117_v38 }
 0x3b8   : > { %5820 = vmatpush1.bf16.msra.mxu1 %v6722_v50  ;;  %v6659_v50 = vcombine.high %v3985_v35, %v3989_v19 }
 0x3b9   : > { %5821 = vmatprep.subr.bf16.mxu1 %v6715_v25  ;;  %v3977_v25 = vld [vmem:[%s9576_s7 + $0x258] sm:$0xff] }
 0x3ba   : > { %5769 = vmatpush1.bf16.msra.mxu0 %v6586_v8  ;;  %v6786_v8 = vcombine.low %v4113_v15, %v4117_v38  ;;  %v6650_v18 = vcombine.low %v3977_v25, %v3981_v37 }
 0x3bb   : > { %5770 = vmatprep.subr.bf16.mxu0 %v6579_v1  ;;  %v6779_v1 = vcombine.high %v4105_v42, %v4109_v44 }
 0x3bc   : > { %5822 = vmatpush1.bf16.msra.mxu1 %v6714_v28  ;;  %v6651_v28 = vcombine.high %v3977_v25, %v3981_v37 }
 0x3bd   : > { %5823 = vmatprep.subr.bf16.mxu1 %v6707_v57  ;;  %v3969_v57 = vld [vmem:[%s9576_s7 + $0x218] sm:$0xff] }
 0x3be   : > { %5771 = vmatpush1.bf16.msra.mxu0 %v6578_v47  ;;  %v6778_v47 = vcombine.low %v4105_v42, %v4109_v44 }
 0x3bf   : > { %5772 = vmatprep.subr.bf16.mxu0 %v6699_v27  ;;  %v6771_v27 = vcombine.high %v4097_v2, %v4101_v46 }
 0x3c0   : > { %5824 = vmatpush1.bf16.msra.mxu1 %v6706_v20  ;;  %v6643_v20 = vcombine.high %v3969_v57, %v3973_v9 }
 0x3c1   : > { %5825 = vmatprep.subr.bf16.mxu1 %v6827_v63  ;;  %v6642_v63 = vcombine.low %v3969_v57, %v3973_v9 }
 0x3c2   : > { %5773 = vmatpush2.bf16.msra.mxu0 %v6698_v40 }
 0x3c3   : > { %5774 = vmatprep.subr.bf16.mxu0 %v6691_v34 }
 0x3c4   : > { %5826 = vmatpush2.bf16.msra.mxu1 %v6826_v52 }
 0x3c5   : > { %5827 = vmatprep.subr.bf16.mxu1 %v6819_v0 }
 0x3c6   : > { %5775 = vmatpush2.bf16.msra.mxu0 %v6690_v31 }
 0x3c7   : > { %5776 = vmatprep.subr.bf16.mxu0 %v6683_v3 }
 0x3c8   : > { %5828 = vmatpush2.bf16.msra.mxu1 %v6818_v11 }
 0x3c9   : > { %5829 = vmatprep.subr.bf16.mxu1 %v6811_v62 }
 0x3ca   : > { %5777 = vmatpush2.bf16.msra.mxu0 %v6682_v51 }
 0x3cb   : > { %5778 = vmatprep.subr.bf16.mxu0 %v6675_v12 }
 0x3cc   : > { %5830 = vmatpush2.bf16.msra.mxu1 %v6810_v56 }
 0x3cd   : > { %5831 = vmatprep.subr.bf16.mxu1 %v6803_v14 }
 0x3ce   : > { %5779 = vmatpush2.bf16.msra.mxu0 %v6674_v36 }
 0x3cf   : > { %5780 = vmatprep.subr.bf16.mxu0 %v6667_v60 }
 0x3d0   : > { %5832 = vmatpush2.bf16.msra.mxu1 %v6802_v59 }
 0x3d1   : > { %5833 = vmatprep.subr.bf16.mxu1 %v6795_v41 }
 0x3d2   : > { %5781 = vmatpush2.bf16.msra.mxu0 %v6666_v45 }
 0x3d3   : > { %5782 = vmatprep.subr.bf16.mxu0 %v6659_v50  ;;  %v5904_v50 = vld [vmem:[%s9577_s8 + $0x20] sm:$0x1] }
 0x3d4   : > { %5834 = vmatpush2.bf16.msra.mxu1 %v6794_v24 }
 0x3d5   : > { %5835 = vmatprep.subr.bf16.mxu1 %v6787_v33 }
 0x3d6   : > { %5783 = vmatpush2.bf16.msra.mxu0 %v6658_v54 }
 0x3d7   : > { %5784 = vmatprep.subr.bf16.mxu0 %v6651_v28 }
 0x3d8   : > { %5836 = vmatpush2.bf16.msra.mxu1 %v6786_v8  ;;  %v5905_v8 = vld [vmem:[%s9577_s8 + $0x28] sm:$0x1] }
 0x3d9   : > { %5837 = vmatprep.subr.bf16.mxu1 %v6779_v1 }
 0x3da   : > { %5785 = vmatpush2.bf16.msra.mxu0 %v6650_v18 }
 0x3db   : > { %5786 = vmatprep.subr.bf16.mxu0 %v6643_v20 }
 0x3dc   : > { %5838 = vmatpush2.bf16.msra.mxu1 %v6778_v47 }
 0x3dd   : > { %5839 = vmatprep.subr.bf16.mxu1 %v6771_v27 }
 0x3de   : > { %5787 = vmatpush2.bf16.msra.mxu0 %v6642_v63 }
 0x3e0   : > { %5840 = vmatpush2.bf16.msra.mxu1 %v6770_v17 }
 0x3e1   : > { %v5472_v29 = vpop.f32.mrf.mxu0  ;;  %5789 = vmatmul.mubr.bf16.vlgmr.msra.gmra.mxu0 %v8723_v48 }
 0x3e2   : > { %5798 = vmatprep.mubr.bf16.mxu0 %v8743_v32 }
 0x3e3   : > { %v5525_v23 = vpop.f32.mrf.mxu1  ;;  %5842 = vmatmul.mubr.bf16.vlgmr.msra.gmra.mxu1 %v8733_v58  ;;  %v5474_v40 = vpop.f32.mrf.mxu0 }
 0x3e4   : > { %v5526_v61 = vadd.f32 %v5525_v23, %v5472_v29  ;;  %5851 = vmatprep.mubr.bf16.mxu1 %v8754_v39 }
 0x3e5   : > { %v5527_v52 = vpop.f32.mrf.mxu1  ;;  %v5476_v7 = vpop.f32.mrf.mxu0 }
 0x3e6   : > { %v5884_v34 = vadd.f32 %v8979_v5, %v5526_v61  ;;  %v5528_v0 = vadd.f32 %v5527_v52, %v5474_v40 }
 0x3e7   : > { %v5529_v21 = vpop.f32.mrf.mxu1  ;;  %v5478_v58 = vpop.f32.mrf.mxu0 }
 0x3e8   : > { %5892 = vst [vmem:[%s9577_s8] sm:$0xff] %v5884_v34  ;;  %v5885_v48 = vadd.f32 %v8979_v5, %v5528_v0  ;;  %v5530_v13 = vadd.f32 %v5529_v21, %v5476_v7 }
 0x3e9   : > { %v5531_v55 = vpop.f32.mrf.mxu1  ;;  %5799 = vmatmul.mubr.bf16.gmra.mxu0 %v8773_v10  ;;  %v5482_v39 = vpop.f32.mrf.mxu0 }
 0x3ea   : > { %5893 = vst [vmem:[%s9577_s8 + $0x8] sm:$0xff] %v5885_v48  ;;  %v5532_v32 = vadd.f32 %v5531_v55, %v5478_v58  ;;  %v5886_v54 = vadd.f32 %v8979_v5, %v5530_v13  ;;  %v5910_v13 = vld [vmem:[%s9577_s8 + $0x50] sm:$0x1] }
 0x3eb   : > { %5852 = vmatmul.mubr.bf16.gmra.mxu1 %v8777_v49  ;;  %v5535_v31 = vpop.f32.mrf.mxu1  ;;  %v5484_v3 = vpop.f32.mrf.mxu0 }
 0x3ec   : > { %v5536_v11 = vadd.f32 %v5535_v31, %v5482_v39  ;;  %v5887_v18 = vadd.f32 %v8979_v5, %v5532_v32 }
 0x3ed   : > { %v5537_v62 = vpop.f32.mrf.mxu1  ;;  %v5486_v6 = vpop.f32.mrf.mxu0 }
 0x3ee   : > { %v5888_v22 = vadd.f32 %v8979_v5, %v5536_v11  ;;  %v5538_v43 = vadd.f32 %v5537_v62, %v5484_v3  ;;  %v5911_v11 = vld [vmem:[%s9577_s8 + $0x58] sm:$0x1] }
 0x3ef   : > { %v5539_v53 = vpop.f32.mrf.mxu1  ;;  %v5488_v10 = vpop.f32.mrf.mxu0  ;;  %v5900_v41 = vld [vmem:[%s9577_s8] sm:$0xfe] }
 0x3f0   : > { %5896 = vst [vmem:[%s9577_s8 + $0x30] sm:$0xff] %v5888_v22  ;;  %v5889_v51 = vadd.f32 %v8979_v5, %v5538_v43  ;;  %v5540_v56 = vadd.f32 %v5539_v53, %v5486_v6 }
 0x3f1   : > { %v5541_v12 = vpop.f32.mrf.mxu1  ;;  %v5901_v24 = vld [vmem:[%s9577_s8 + $0x8] sm:$0xfe] }
 0x3f2   : > { %5897 = vst [vmem:[%s9577_s8 + $0x38] sm:$0xff] %v5889_v51  ;;  %v9367_v49 = vadd.f32 %v5541_v12, %v5488_v10  ;;  %v5890_v31 = vadd.f32 %v8979_v5, %v5540_v56 }
 0x3f4   : > { %v5891_v43 = vadd.f32 %v8979_v5, %v9367_v49 }
 0x3f7   : > { %v5906_v40 = vld [vmem:[%s9577_s8 + $0x30] sm:$0xfe] }
 0x3f9   : > { %v5907_v48 = vld [vmem:[%s9577_s8 + $0x38] sm:$0xfe] }
 0x421   : > { %v5578_v14 = vpop.f32.mrf.mxu0 }
 0x423   : > { %v5631_v26 = vpop.f32.mrf.mxu1  ;;  %v5580_v30 = vpop.f32.mrf.mxu0 }
 0x424   : > { %v5632_v16 = vadd.f32 %v5631_v26, %v5578_v14 }
 0x425   : > { %v5633_v4 = vpop.f32.mrf.mxu1  ;;  %v5582_v60 = vpop.f32.mrf.mxu0 }
 0x426   : > { %v5921_v36 = vrot.slane %v5632_v16, 7  ;;  %v5634_v59 = vadd.f32 %v5633_v4, %v5580_v30 }
 0x427   : > { %v5635_v35 = vpop.f32.mrf.mxu1  ;;  %v5584_v45 = vpop.f32.mrf.mxu0 }
 0x428   : > { %v5945_v19 = vadd.f32 %v5921_v36, %v5900_v41  ;;  %v5922_v15 = vrot.slane %v5634_v59, 7  ;;  %v5636_v38 = vadd.f32 %v5635_v35, %v5582_v60 }
 0x429   : > { %v5637_v33 = vpop.f32.mrf.mxu1  ;;  %v5588_v44 = vpop.f32.mrf.mxu0 }
 0x42a   : > { %5957 = vst [vmem:[%s9577_s8] sm:$0xfe] %v5945_v19  ;;  %v5946_v25 = vadd.f32 %v5922_v15, %v5901_v24  ;;  %v5923_v37 = vrot.slane %v5636_v38, 7  ;;  %v5638_v42 = vadd.f32 %v5637_v33, %v5584_v45 }
 0x42b   : > { %v5641_v28 = vpop.f32.mrf.mxu1  ;;  %v5590_v46 = vpop.f32.mrf.mxu0 }
 0x42c   : > { %5958 = vst [vmem:[%s9577_s8 + $0x8] sm:$0xfe] %v5946_v25  ;;  %v5924_v1 = vsel %vm5920_vm6, %v5921_v36, %v5923_v37  ;;  %v5949_v57 = vadd.f32 %v5923_v37, %v5904_v50  ;;  %v5925_v9 = vrot.slane %v5638_v42, 7  ;;  %v5642_v2 = vadd.f32 %v5641_v28, %v5588_v44 }
 0x42d   : > { %v9390_v47 = vadd.f32 %v5924_v1, %v5886_v54  ;;  %v5643_v20 = vpop.f32.mrf.mxu1  ;;  %v5592_v23 = vpop.f32.mrf.mxu0 }
 0x42e   : > { %5961 = vst [vmem:[%s9577_s8 + $0x20] sm:$0x1] %v5949_v57  ;;  %v5926_v27 = vsel %vm5920_vm6, %v5922_v15, %v5925_v9  ;;  %v5950_v63 = vadd.f32 %v5925_v9, %v5905_v8  ;;  %v5927_v17 = vrot.slane %v5642_v2, 7  ;;  %v5644_v29 = vadd.f32 %v5643_v20, %v5590_v46 }
 0x42f   : > { %v9396_v61 = vadd.f32 %v5926_v27, %v5887_v18  ;;  %v5645_v52 = vpop.f32.mrf.mxu1  ;;  %v5594_v21 = vpop.f32.mrf.mxu0 }
 0x430   : > { %5962 = vst [vmem:[%s9577_s8 + $0x28] sm:$0x1] %v5950_v63  ;;  %v5951_v34 = vadd.f32 %v5927_v17, %v5906_v40  ;;  %v5928_v0 = vrot.slane %v5644_v29, 7  ;;  %v5646_v7 = vadd.f32 %v5645_v52, %v5592_v23 }
 0x431   : > { %v5647_v58 = vpop.f32.mrf.mxu1  ;;  %v5969_v4 = vld [vmem:[%s9577_s8] sm:$0xfc] }
 0x432   : > { %5963 = vst [vmem:[%s9577_s8 + $0x30] sm:$0xfe] %v5951_v34  ;;  %v5952_v55 = vadd.f32 %v5928_v0, %v5907_v48  ;;  %v5929_v32 = vrot.slane %v5646_v7, 7  ;;  %v5648_v39 = vadd.f32 %v5647_v58, %v5594_v21 }
 0x433   : > { %v5970_v19 = vld [vmem:[%s9577_s8 + $0x8] sm:$0xfc] }
 0x434   : > { %5964 = vst [vmem:[%s9577_s8 + $0x38] sm:$0xfe] %v5952_v55  ;;  %v5930_v3 = vsel %vm5920_vm6, %v5927_v17, %v5929_v32  ;;  %v5955_v62 = vadd.f32 %v5929_v32, %v5910_v13  ;;  %v5931_v22 = vrot.slane %v5648_v39, 7 }
 0x435   : > { %v9423_v6 = vadd.f32 %v5930_v3, %v5890_v31  ;;  %v5973_v33 = vld [vmem:[%s9577_s8 + $0x20] sm:$0x3] }
 0x436   : > { %5967 = vst [vmem:[%s9577_s8 + $0x50] sm:$0x1] %v5955_v62  ;;  %v5932_v53 = vsel %vm5920_vm6, %v5928_v0, %v5931_v22  ;;  %v5956_v51 = vadd.f32 %v5931_v22, %v5911_v11 }
 0x437   : > { %v9429_v56 = vadd.f32 %v5932_v53, %v5891_v43  ;;  %v5974_v1 = vld [vmem:[%s9577_s8 + $0x28] sm:$0x3] }
 0x438   : > { %5968 = vst [vmem:[%s9577_s8 + $0x58] sm:$0x1] %v5956_v51 }
 0x43b   : > { %v5976_v52 = vld [vmem:[%s9577_s8 + $0x38] sm:$0xfc] }
 0x43d   : > { %v5979_v21 = vld [vmem:[%s9577_s8 + $0x50] sm:$0x3] }
 0x43f   : > { %v5980_v32 = vld [vmem:[%s9577_s8 + $0x58] sm:$0x3] }
 0x461   : > { %v5684_v10 = vpop.f32.mrf.mxu0 }
 0x463   : > { %v5737_v12 = vpop.f32.mrf.mxu1  ;;  %v5686_v26 = vpop.f32.mrf.mxu0 }
 0x464   : > { %v5738_v14 = vadd.f32 %v5737_v12, %v5684_v10 }
 0x465   : > { %v5739_v5 = vpop.f32.mrf.mxu1  ;;  %v5688_v30 = vpop.f32.mrf.mxu0 }
 0x466   : > { %v5990_v49 = vrot.slane %v5738_v14, 6  ;;  %v5740_v16 = vadd.f32 %v5739_v5, %v5686_v26 }
 0x467   : > { %v5741_v36 = vpop.f32.mrf.mxu1  ;;  %v5690_v35 = vpop.f32.mrf.mxu0 }
 0x468   : > { %v6014_v59 = vadd.f32 %v5990_v49, %v5969_v4  ;;  %v5991_v60 = vrot.slane %v5740_v16, 6  ;;  %v5742_v41 = vadd.f32 %v5741_v36, %v5688_v30 }
 0x469   : > { %v5743_v15 = vpop.f32.mrf.mxu1  ;;  %v5694_v50 = vpop.f32.mrf.mxu0 }
 0x46a   : > { %6026 = vst [vmem:[%s9577_s8] sm:$0xfc] %v6014_v59  ;;  %v6015_v38 = vadd.f32 %v5991_v60, %v5970_v19  ;;  %v5992_v45 = vrot.slane %v5742_v41, 6  ;;  %v5744_v24 = vadd.f32 %v5743_v15, %v5690_v35 }
 0x46b   : > { %v5747_v25 = vpop.f32.mrf.mxu1  ;;  %v5696_v8 = vpop.f32.mrf.mxu0 }
 0x46c   : > { %6027 = vst [vmem:[%s9577_s8 + $0x8] sm:$0xfc] %v6015_v38  ;;  %v5993_v37 = vsel %vm5989_vm7, %v5990_v49, %v5992_v45  ;;  %v6018_v42 = vadd.f32 %v5992_v45, %v5973_v33  ;;  %v5994_v44 = vrot.slane %v5744_v24, 6  ;;  %v5748_v54 = vadd.f32 %v5747_v25, %v5694_v50 }
 0x46d   : > { %v9451_v28 = vadd.f32 %v5993_v37, %v9390_v47  ;;  %v5749_v57 = vpop.f32.mrf.mxu1  ;;  %v5698_v20 = vpop.f32.mrf.mxu0  ;;  %v5975_v47 = vld [vmem:[%s9577_s8 + $0x30] sm:$0xfc] }
 0x46e   : > { %6030 = vst [vmem:[%s9577_s8 + $0x20] sm:$0x3] %v6018_v42  ;;  %v5995_v9 = vsel %vm5989_vm7, %v5991_v60, %v5994_v44  ;;  %v6019_v2 = vadd.f32 %v5994_v44, %v5974_v1  ;;  %v5996_v46 = vrot.slane %v5748_v54, 6  ;;  %v5750_v18 = vadd.f32 %v5749_v57, %v5696_v8 }
 0x46f   : > { %v9461_v27 = vadd.f32 %v5995_v9, %v9396_v61  ;;  %v5751_v63 = vpop.f32.mrf.mxu1  ;;  %v5700_v40 = vpop.f32.mrf.mxu0 }
 0x470   : > { %6031 = vst [vmem:[%s9577_s8 + $0x28] sm:$0x3] %v6019_v2  ;;  %v6020_v17 = vadd.f32 %v5996_v46, %v5975_v47  ;;  %v5997_v29 = vrot.slane %v5750_v18, 6  ;;  %v5752_v23 = vadd.f32 %v5751_v63, %v5698_v20 }
 0x471   : > { %v5753_v34 = vpop.f32.mrf.mxu1  ;;  %v6038_v12 = vld [vmem:[%s9577_s8] sm:$0xf8] }
 0x472   : > { %6032 = vst [vmem:[%s9577_s8 + $0x30] sm:$0xfc] %v6020_v17  ;;  %v6021_v61 = vadd.f32 %v5997_v29, %v5976_v52  ;;  %v5998_v0 = vrot.slane %v5752_v23, 6  ;;  %v5754_v7 = vadd.f32 %v5753_v34, %v5700_v40 }
 0x473   : > { %v6039_v16 = vld [vmem:[%s9577_s8 + $0x8] sm:$0xf8] }
 0x474   : > { %6033 = vst [vmem:[%s9577_s8 + $0x38] sm:$0xfc] %v6021_v61  ;;  %v5999_v48 = vsel %vm5989_vm7, %v5996_v46, %v5998_v0  ;;  %v6024_v13 = vadd.f32 %v5998_v0, %v5979_v21  ;;  %v6000_v58 = vrot.slane %v5754_v7, 6 }
 0x475   : > { %v9483_v55 = vadd.f32 %v5999_v48, %v9423_v6  ;;  %v6042_v41 = vld [vmem:[%s9577_s8 + $0x20] sm:$0x7] }
 0x476   : > { %6036 = vst [vmem:[%s9577_s8 + $0x50] sm:$0x3] %v6024_v13  ;;  %v6001_v39 = vsel %vm5989_vm7, %v5997_v29, %v6000_v58  ;;  %v6025_v31 = vadd.f32 %v6000_v58, %v5980_v32 }
 0x477   : > { %v9493_v11 = vadd.f32 %v6001_v39, %v9429_v56  ;;  %v6043_v33 = vld [vmem:[%s9577_s8 + $0x28] sm:$0x7] }
 0x478   : > { %6037 = vst [vmem:[%s9577_s8 + $0x58] sm:$0x3] %v6025_v31 }
 0x479   : > { %v6044_v1 = vld [vmem:[%s9577_s8 + $0x30] sm:$0xf8] }
 0x47b   : > { %v6045_v20 = vld [vmem:[%s9577_s8 + $0x38] sm:$0xf8] }
 0x47d   : > { %v6048_v29 = vld [vmem:[%s9577_s8 + $0x50] sm:$0x7] }
 0x47f   : > { %v6049_v61 = vld [vmem:[%s9577_s8 + $0x58] sm:$0x7] }
 0x4a1   : > { %v5790_v3 = vpop.f32.mrf.mxu0 }
 0x4a3   : > { %v5843_v62 = vpop.f32.mrf.mxu1  ;;  %v5792_v43 = vpop.f32.mrf.mxu0 }
 0x4a4   : > { %v5844_v22 = vadd.f32 %v5843_v62, %v5790_v3 }
 0x4a5   : > { %v5845_v6 = vpop.f32.mrf.mxu1  ;;  %v5794_v10 = vpop.f32.mrf.mxu0 }
 0x4a6   : > { %v6059_v53 = vrot.slane %v5844_v22, 5  ;;  %v5846_v51 = vadd.f32 %v5845_v6, %v5792_v43 }
 0x4a7   : > { %v5847_v14 = vpop.f32.mrf.mxu1  ;;  %v5796_v49 = vpop.f32.mrf.mxu0 }
 0x4a8   : > { %v6083_v26 = vadd.f32 %v6059_v53, %v6038_v12  ;;  %v6060_v56 = vrot.slane %v5846_v51, 5  ;;  %v5848_v5 = vadd.f32 %v5847_v14, %v5794_v10 }
 0x4a9   : > { %v5849_v30 = vpop.f32.mrf.mxu1  ;;  %v5800_v60 = vpop.f32.mrf.mxu0 }
 0x4aa   : > { %6095 = vst [vmem:[%s9577_s8] sm:$0xf8] %v6083_v26  ;;  %v6084_v4 = vadd.f32 %v6060_v56, %v6039_v16  ;;  %v6061_v36 = vrot.slane %v5848_v5, 5  ;;  %v5850_v59 = vadd.f32 %v5849_v30, %v5796_v49 }
 0x4ab   : > { %v5853_v35 = vpop.f32.mrf.mxu1  ;;  %v5802_v24 = vpop.f32.mrf.mxu0 }
 0x4ac   : > { %6096 = vst [vmem:[%s9577_s8 + $0x8] sm:$0xf8] %v6084_v4  ;;  %v6062_v19 = vsel %vm6058_vm8, %v6059_v53, %v6061_v36  ;;  %v6087_v15 = vadd.f32 %v6061_v36, %v6042_v41  ;;  %v6063_v38 = vrot.slane %v5850_v59, 5  ;;  %v5854_v45 = vadd.f32 %v5853_v35, %v5800_v60 }
 0x4ad   : > { %v6085_v50 = vadd.f32 %v6062_v19, %v9451_v28  ;;  %v5855_v25 = vpop.f32.mrf.mxu1  ;;  %v5804_v8 = vpop.f32.mrf.mxu0 }
 0x4ae   : > { %6099 = vst [vmem:[%s9577_s8 + $0x20] sm:$0x7] %v6087_v15  ;;  %v6064_v37 = vsel %vm6058_vm8, %v6060_v56, %v6063_v38  ;;  %v6088_v42 = vadd.f32 %v6063_v38, %v6043_v33  ;;  %v6065_v44 = vrot.slane %v5854_v45, 5  ;;  %v5856_v54 = vadd.f32 %v5855_v25, %v5802_v24 }
 0x4af   : > { %6097 = vst [vmem:[%s9577_s8 + $0x10] sm:$0xff] %v6085_v50  ;;  %v6086_v28 = vadd.f32 %v6064_v37, %v9461_v27  ;;  %v5857_v57 = vpop.f32.mrf.mxu1  ;;  %v5806_v18 = vpop.f32.mrf.mxu0 }
 0x4b0   : > { %6100 = vst [vmem:[%s9577_s8 + $0x28] sm:$0x7] %v6088_v42  ;;  %v6089_v9 = vadd.f32 %v6065_v44, %v6044_v1  ;;  %v6066_v2 = vrot.slane %v5856_v54, 5  ;;  %v5858_v46 = vadd.f32 %v5857_v57, %v5804_v8 }
 0x4b1   : > { %6098 = vst [vmem:[%s9577_s8 + $0x18] sm:$0xff] %v6086_v28  ;;  %v5859_v27 = vpop.f32.mrf.mxu1 }
 0x4b2   : > { %6101 = vst [vmem:[%s9577_s8 + $0x30] sm:$0xf8] %v6089_v9  ;;  %v6090_v47 = vadd.f32 %v6066_v2, %v6045_v20  ;;  %v6067_v63 = vrot.slane %v5858_v46, 5  ;;  %v5860_v17 = vadd.f32 %v5859_v27, %v5806_v18 }
 0x4b4   : > { %6102 = vst [vmem:[%s9577_s8 + $0x38] sm:$0xf8] %v6090_v47  ;;  %v6068_v23 = vsel %vm6058_vm8, %v6065_v44, %v6067_v63  ;;  %v6093_v40 = vadd.f32 %v6067_v63, %v6048_v29  ;;  %v6069_v52 = vrot.slane %v5860_v17, 5 }
 0x4b5   : > { %v6091_v34 = vadd.f32 %v6068_v23, %v9483_v55 }
 0x4b6   : > { %6105 = vst [vmem:[%s9577_s8 + $0x50] sm:$0x7] %v6093_v40  ;;  %v6070_v0 = vsel %vm6058_vm8, %v6066_v2, %v6069_v52  ;;  %v6094_v7 = vadd.f32 %v6069_v52, %v6049_v61 }
 0x4b7   : > { %6103 = vst [vmem:[%s9577_s8 + $0x40] sm:$0xff] %v6091_v34  ;;  %v6092_v21 = vadd.f32 %v6070_v0, %v9493_v11 }
 0x4b8   : > { %6106 = vst [vmem:[%s9577_s8 + $0x58] sm:$0x7] %v6094_v7 }
 0x4b9   : > { %6104 = vst [vmem:[%s9577_s8 + $0x48] sm:$0xff] %v6092_v21 }
 0x4ba PF: > { %s25_s12 = sadd.s32 1, %s7473_s12  }
 0x4bb   : > { %p22_p12 = scmp.ge.s32.totalorder %s25_s12, 4  }
 0x4bd   :  { %24 = sbr.rel (!%p22_p12) target bundleno = 16 (0x10), region = 123 }
 0x4c2   :  { %6118 = vsyncmov [#allocation3] }
 0x4c5   :  { %s6119_s14 = vpop.sfrf %6118 }
 0x4c6   :  { %p6830_p13 = scmp.ne.s32.totalorder %s6119_s14, 0 }
 0x4c8   :  { %6123 = shalt.err (%p6830_p13)  }

</bundles_post_ra>
